<compile_context>
chip_gen: v5e
topology: v5e:2x2
jax: 0.10.0
libtpu: 0.0.40
codegen_flags: <defaults>
</compile_context>

<pallas_src>
import math

import jax
import jax.numpy as jnp
from jax.experimental import pallas as pl
from jax.experimental.pallas import tpu as pltpu


# ----------------------------------------------------------------------------
# Pallas kernel: one bidirectional LSTM layer, both sides fused (4 streams),
# single launch, unrolled in-kernel time loop.
# ----------------------------------------------------------------------------
def _bilstm_layer_kernel(gin_ref, mask_ref, wbd_ref,
                         out_f_ref, out_b_ref, hlast_ref):
    # gin_ref : (T, B, 4*W) f32  precomputed x@W_ih + b, stacked over the 4
    #           streams [left-fwd, right-fwd, left-bwd, right-bwd]; columns are
    #           gate-major: col = gate*W + stream*H + j.  Backward streams are
    #           already time-reversed, so row t holds their step-t input.
    # mask_ref: (T, B, W)  f32  0/1 validity per stream lane (bwd lanes reversed).
    # wbd_ref : (W, 4*W)  bf16  block-diagonal recurrent weights (same layout).
    # out_f_ref / out_b_ref : (T, B, W//2)  fwd / bwd stream outputs, written in
    #           natural (un-reversed) time order.
    # hlast_ref: (B, W)  final hidden state of every stream.
    T, B, _ = gin_ref.shape
    W = mask_ref.shape[-1]
    half = W // 2

    w_bd = wbd_ref[...]                               # load weights once

    def step(t, carry):
        h, c = carry                                  # (B, W) f32, vreg-resident
        # single MXU matmul for all 4 streams; bf16 inputs, f32 accumulation
        gates = gin_ref[t] + jnp.dot(h.astype(jnp.bfloat16), w_bd,
                                     preferred_element_type=jnp.float32)
        # gate slices are full 128-lane-aligned vreg slices (W = 128)
        i_g = jax.nn.sigmoid(gates[:, 0 * W:1 * W])
        f_g = jax.nn.sigmoid(gates[:, 1 * W:2 * W])
        g_g = jnp.tanh(gates[:, 2 * W:3 * W])
        o_g = jax.nn.sigmoid(gates[:, 3 * W:4 * W])

        c_new = f_g * c + i_g * g_g
        h_new = o_g * jnp.tanh(c_new)

        m = mask_ref[t]                               # (B, W) 0/1
        h_out = h_new * m                             # padded positions -> exact 0
        out_f_ref[t] = h_out[:, :half]                # fwd streams: natural time t
        out_b_ref[T - 1 - t] = h_out[:, half:]        # bwd streams: natural T-1-t

        # packed-sequence semantics: state only advances over valid timesteps
        h = jnp.where(m > 0.0, h_new, h)
        c = jnp.where(m > 0.0, c_new, c)
        return h, c

    zeros = jnp.zeros((B, W), jnp.float32)
    h_fin, _ = jax.lax.fori_loop(0, T, step, (zeros, zeros), unroll=True)
    hlast_ref[...] = h_fin


def _bilstm_layer_pallas(gin, mask, wbd):
    T, B, G = gin.shape
    W = mask.shape[-1]
    half = W // 2
    return pl.pallas_call(
        _bilstm_layer_kernel,
        out_shape=(jax.ShapeDtypeStruct((T, B, half), jnp.float32),
                   jax.ShapeDtypeStruct((T, B, half), jnp.float32),
                   jax.ShapeDtypeStruct((B, W), jnp.float32)),
        grid_spec=pltpu.PrefetchScalarGridSpec(
            num_scalar_prefetch=0,
            grid=(1,),                                # single launch; time loop in-kernel
            in_specs=[
                pl.BlockSpec((T, B, G), lambda i: (0, 0, 0)),
                pl.BlockSpec((T, B, W), lambda i: (0, 0, 0)),
                pl.BlockSpec((W, G), lambda i: (0, 0)),
            ],
            out_specs=[
                pl.BlockSpec((T, B, half), lambda i: (0, 0, 0)),
                pl.BlockSpec((T, B, half), lambda i: (0, 0, 0)),
                pl.BlockSpec((B, W), lambda i: (0, 0)),
            ],
        ),
        compiler_params=pltpu.CompilerParams(
            dimension_semantics=("arbitrary",),
            # generous for these shapes; re-budget (tile the 4H axis / keep
            # weights bf16) for large H, especially on v7x's 64 MiB VMEM.
            vmem_limit_bytes=32 * 1024 * 1024,
        ),
    )(gin, mask, wbd)


# ----------------------------------------------------------------------------
# Host-side (XLA) glue: hoisted input projections, stream stacking, weights.
# Stream order everywhere: [left-fwd, right-fwd, left-bwd, right-bwd].
# ----------------------------------------------------------------------------
def _input_projection(x_tbe, w_ih_t, b):
    """x_t @ W_ih + b for all timesteps: one lane-dense bf16 matmul, f32 acc."""
    g = jnp.einsum("tbe,eg->tbg",
                   x_tbe.astype(jnp.bfloat16), w_ih_t.astype(jnp.bfloat16),
                   preferred_element_type=jnp.float32)
    return g + b[None, None, :]


def _stack_gate_inputs(gin_lf, gin_rf, gin_lb, gin_rb, H):
    """(T,B,4H) per stream -> (T,B,16H) gate-major: col = gate*4H + stream*H + j.
    Backward streams are time-reversed so kernel loop index t addresses their
    natural position T-1-t (fused into this small re-pack, not a pass over x)."""
    T, B, _ = gin_lf.shape
    parts = [gin_lf, gin_rf, jnp.flip(gin_lb, axis=0), jnp.flip(gin_rb, axis=0)]
    parts = [g.reshape(T, B, 4, H) for g in parts]
    return jnp.stack(parts, axis=3).reshape(T, B, 4 * 4 * H)


def _stack_masks(mask_left_tb, mask_right_tb, H):
    T, B = mask_left_tb.shape
    streams = jnp.stack([mask_left_tb, mask_right_tb,
                         jnp.flip(mask_left_tb, axis=0),
                         jnp.flip(mask_right_tb, axis=0)], axis=-1)   # (T,B,4)
    return jnp.broadcast_to(streams[..., None], (T, B, 4, H)).reshape(T, B, 4 * H)


def _block_diag_whh(whh_list, H):
    """Block-diagonal recurrent weights for the 4 lane-stacked streams;
    output column layout matches the stacked gates (gate-major)."""
    S = len(whh_list)
    wbd = jnp.zeros((S * H, 4 * S * H), jnp.float32)
    for s, w in enumerate(whh_list):           # w: (H, 4H), columns [i|f|g|o]
        w4 = w.reshape(H, 4, H)
        for k in range(4):
            col = k * S * H + s * H
            wbd = wbd.at[s * H:(s + 1) * H, col:col + H].set(w4[:, k, :])
    return wbd.astype(jnp.bfloat16)


def _run_bilstm_layer(x_left_tbe, x_right_tbe, mask_stacked, lp_left, lp_right, H):
    gin = _stack_gate_inputs(
        _input_projection(x_left_tbe, lp_left["w_ih_f"], lp_left["b_f"]),
        _input_projection(x_right_tbe, lp_right["w_ih_f"], lp_right["b_f"]),
        _input_projection(x_left_tbe, lp_left["w_ih_b"], lp_left["b_b"]),
        _input_projection(x_right_tbe, lp_right["w_ih_b"], lp_right["b_b"]),
        H)
    wbd = _block_diag_whh([lp_left["w_hh_f"], lp_right["w_hh_f"],
                           lp_left["w_hh_b"], lp_right["w_hh_b"]], H)
    return _bilstm_layer_pallas(gin, mask_stacked, wbd)


# ----------------------------------------------------------------------------
# MirrorLSTM forward.
# ----------------------------------------------------------------------------
def mirror_lstm_forward(x_left, x_right, emb_weight, params_left, params_right):
    B, T = x_left.shape
    H = params_left["l0"]["w_hh_f"].shape[0]

    def prep(tokens):
        lengths = jnp.sum((tokens != 0).astype(jnp.int32), axis=1)     # ne(0).sum
        mask = (jnp.arange(T)[None, :] < lengths[:, None]).astype(jnp.float32)
        x = emb_weight[tokens]                                         # dropout p=0 -> id
        return jnp.transpose(x, (1, 0, 2)), jnp.transpose(mask), lengths

    xl, ml, len_l = prep(x_left)
    xr, mr, len_r = prep(x_right)
    mask_stacked = _stack_masks(ml, mr, H)                             # (T,B,4H)

    # layer 0: both sides + both directions in one kernel launch
    out_f0, out_b0, hlast0 = _run_bilstm_layer(
        xl, xr, mask_stacked, params_left["l0"], params_right["l0"], H)

    # layer 1 consumes each side's concat(fwd, bwd) masked output
    x1_l = jnp.concatenate([out_f0[..., :H], out_b0[..., :H]], axis=-1)
    x1_r = jnp.concatenate([out_f0[..., H:], out_b0[..., H:]], axis=-1)
    out_f1, out_b1, _ = _run_bilstm_layer(
        x1_l, x1_r, mask_stacked, params_left["l1"], params_right["l1"], H)

    # pad_packed_sequence(batch_first) output, already in original batch order.
    # TODO(synk): pad_packed_sequence truncates T to max(lengths); with static
    # shapes we keep T and build test inputs so that max(lengths) == T.
    out_left = jnp.transpose(
        jnp.concatenate([out_f1[..., :H], out_b1[..., :H]], axis=-1), (1, 0, 2))
    out_right = jnp.transpose(
        jnp.concatenate([out_f1[..., H:], out_b1[..., H:]], axis=-1), (1, 0, 2))

    # last_output = cat(h_n[0], h_n[1]): layer-0 fwd/bwd final hidden states,
    # in length-sorted order (reproduces the module's un-permuting quirk).
    last_left = jnp.concatenate(
        [hlast0[:, 0 * H:1 * H], hlast0[:, 2 * H:3 * H]], axis=1)[jnp.argsort(-len_l)]
    last_right = jnp.concatenate(
        [hlast0[:, 1 * H:2 * H], hlast0[:, 3 * H:4 * H]], axis=1)[jnp.argsort(-len_r)]

    return [(out_left, last_left), (out_right, last_right)]


# ----------------------------------------------------------------------------
# Deterministic parameter init (shapes per nn.LSTM(E, H, num_layers=2,
# bidirectional=True) and nn.Embedding(V, E)); weights stored pre-transposed.
# ----------------------------------------------------------------------------
def init_lstm_params(key, E, H):
    k = 1.0 / math.sqrt(H)
    params = {}
    for layer, in_size in (("l0", E), ("l1", 2 * H)):
        lp = {}
        for d in ("f", "b"):
            key, k0, k1, k2, k3 = jax.random.split(key, 5)
            lp["w_ih_" + d] = jax.random.uniform(k0, (in_size, 4 * H),
                                                 jnp.float32, -k, k)
            lp["w_hh_" + d] = jax.random.uniform(k1, (H, 4 * H),
                                                 jnp.float32, -k, k)
            b_ih = jax.random.uniform(k2, (4 * H,), jnp.float32, -k, k)
            b_hh = jax.random.uniform(k3, (4 * H,), jnp.float32, -k, k)
            lp["b_" + d] = b_ih + b_hh
        params[layer] = lp
    return params, key


def make_tokens(key, B, T, vocab):
    ka, kb = jax.random.split(key)
    toks = jax.random.randint(ka, (B, T), 1, vocab)
    lens = jax.random.randint(kb, (B,), 1, T + 1)
    lens = lens.at[0].set(T)  # ensure max length == T (see TODO above)
    valid = jnp.arange(T)[None, :] < lens[:, None]
    return jnp.where(valid, toks, 0).astype(jnp.int32)


if __name__ == "__main__":
    B, T, E, H, VOCAB = 4, 8, 32, 32, 20

    key = jax.random.PRNGKey(0)
    key, k_emb, k_xl, k_xr = jax.random.split(key, 4)

    # kaiming_uniform-style deterministic embedding init (frozen / synthetic)
    bound = math.sqrt(6.0 / E)
    emb_weight = jax.random.uniform(k_emb, (VOCAB, E), jnp.float32, -bound, bound)

    params_left, key = init_lstm_params(key, E, H)
    params_right, key = init_lstm_params(key, E, H)

    x_left = make_tokens(k_xl, B, T, VOCAB)
    x_right = make_tokens(k_xr, B, T, VOCAB)

    fwd = jax.jit(mirror_lstm_forward)
    outputs = fwd(x_left, x_right, emb_weight, params_left, params_right)
    for out, last in outputs:
        jax.block_until_ready(out)
        jax.block_until_ready(last)
        assert out.shape == (B, T, 2 * H)
        assert last.shape == (B, 2 * H)

    print("KERNEL_OK")
</pallas_src>

<mosaic_0001>
module attributes {stable_mosaic.version = 11 : i64} {
  func.func @_bilstm_layer_kernel(%arg0: i32, %arg1: memref<8x4x512xf32, #tpu.memory_space<vmem>>, %arg2: memref<8x4x128xf32, #tpu.memory_space<vmem>>, %arg3: memref<128x512xbf16, #tpu.memory_space<vmem>>, %arg4: memref<8x4x64xf32, #tpu.memory_space<vmem>>, %arg5: memref<8x4x64xf32, #tpu.memory_space<vmem>>, %arg6: memref<4x128xf32, #tpu.memory_space<vmem>>) attributes {dimension_semantics = [#tpu.dimension_semantics<arbitrary>], iteration_bounds = array<i64: 1>, scalar_prefetch = 0 : i64, scratch_operands = 0 : i64, tpu.core_type = #tpu.core_type<tc>, window_params = [{pipeline_mode = #tpu.pipeline_mode<synchronous>, transform_indices = @transform_0, window_bounds = array<i64: 8, 4, 512>}, {pipeline_mode = #tpu.pipeline_mode<synchronous>, transform_indices = @transform_1, window_bounds = array<i64: 8, 4, 128>}, {pipeline_mode = #tpu.pipeline_mode<synchronous>, transform_indices = @transform_2, window_bounds = array<i64: 128, 512>}, {pipeline_mode = #tpu.pipeline_mode<synchronous>, transform_indices = @transform_3, window_bounds = array<i64: 8, 4, 64>}, {pipeline_mode = #tpu.pipeline_mode<synchronous>, transform_indices = @transform_4, window_bounds = array<i64: 8, 4, 64>}, {pipeline_mode = #tpu.pipeline_mode<synchronous>, transform_indices = @transform_5, window_bounds = array<i64: 4, 128>}]} {
    %c0 = arith.constant 0 : index
    %c0_0 = arith.constant 0 : index
    %0 = vector.load %arg3[%c0, %c0_0] : memref<128x512xbf16, #tpu.memory_space<vmem>>, vector<128x512xbf16>
    %cst = arith.constant 0.000000e+00 : f32
    %1 = vector.broadcast %cst : f32 to vector<4x128xf32>
    %c0_i32 = arith.constant 0 : i32
    %2 = arith.index_cast %c0_i32 : i32 to index
    %c0_1 = arith.constant 0 : index
    %c0_2 = arith.constant 0 : index
    %3 = vector.load %arg1[%2, %c0_1, %c0_2] : memref<8x4x512xf32, #tpu.memory_space<vmem>>, vector<1x4x512xf32>
    %4 = vector.shape_cast %3 : vector<1x4x512xf32> to vector<4x512xf32>
    %5 = arith.truncf %1 : vector<4x128xf32> to vector<4x128xbf16>
    %cst_3 = arith.constant dense<0.000000e+00> : vector<4x512xf32>
    %6 = tpu.matmul %5, %0, %cst_3 {dimension_numbers = #tpu.dot_dimension_numbers<[1], [0], [0], [1], [0, 0, 1, 1], [], []>} : vector<4x128xbf16>, vector<128x512xbf16>, vector<4x512xf32> -> vector<4x512xf32>
    %7 = arith.addf %4, %6 : vector<4x512xf32>
    %8 = vector.extract_strided_slice %7 {offsets = [0, 0], sizes = [4, 128], strides = [1, 1]} : vector<4x512xf32> to vector<4x128xf32>
    %9 = arith.negf %8 : vector<4x128xf32>
    %10 = math.exp %9 : vector<4x128xf32>
    %cst_4 = arith.constant 1.000000e+00 : f32
    %11 = vector.broadcast %cst_4 : f32 to vector<4x128xf32>
    %12 = arith.addf %11, %10 : vector<4x128xf32>
    %13 = arith.divf %11, %12 : vector<4x128xf32>
    %14 = vector.extract_strided_slice %7 {offsets = [0, 128], sizes = [4, 128], strides = [1, 1]} : vector<4x512xf32> to vector<4x128xf32>
    %15 = arith.negf %14 : vector<4x128xf32>
    %16 = math.exp %15 : vector<4x128xf32>
    %cst_5 = arith.constant 1.000000e+00 : f32
    %17 = vector.broadcast %cst_5 : f32 to vector<4x128xf32>
    %18 = arith.addf %17, %16 : vector<4x128xf32>
    %19 = arith.divf %17, %18 : vector<4x128xf32>
    %20 = vector.extract_strided_slice %7 {offsets = [0, 256], sizes = [4, 128], strides = [1, 1]} : vector<4x512xf32> to vector<4x128xf32>
    %21 = math.tanh %20 : vector<4x128xf32>
    %22 = vector.extract_strided_slice %7 {offsets = [0, 384], sizes = [4, 128], strides = [1, 1]} : vector<4x512xf32> to vector<4x128xf32>
    %23 = arith.negf %22 : vector<4x128xf32>
    %24 = math.exp %23 : vector<4x128xf32>
    %cst_6 = arith.constant 1.000000e+00 : f32
    %25 = vector.broadcast %cst_6 : f32 to vector<4x128xf32>
    %26 = arith.addf %25, %24 : vector<4x128xf32>
    %27 = arith.divf %25, %26 : vector<4x128xf32>
    %28 = arith.mulf %19, %1 : vector<4x128xf32>
    %29 = arith.mulf %13, %21 : vector<4x128xf32>
    %30 = arith.addf %28, %29 : vector<4x128xf32>
    %31 = math.tanh %30 : vector<4x128xf32>
    %32 = arith.mulf %27, %31 : vector<4x128xf32>
    %33 = arith.index_cast %c0_i32 : i32 to index
    %c0_7 = arith.constant 0 : index
    %c0_8 = arith.constant 0 : index
    %34 = vector.load %arg2[%33, %c0_7, %c0_8] : memref<8x4x128xf32, #tpu.memory_space<vmem>>, vector<1x4x128xf32>
    %35 = vector.shape_cast %34 : vector<1x4x128xf32> to vector<4x128xf32>
    %36 = arith.mulf %32, %35 : vector<4x128xf32>
    %37 = vector.extract_strided_slice %36 {offsets = [0, 0], sizes = [4, 64], strides = [1, 1]} : vector<4x128xf32> to vector<4x64xf32>
    %38 = arith.index_cast %c0_i32 : i32 to index
    %c0_9 = arith.constant 0 : index
    %c0_10 = arith.constant 0 : index
    %39 = vector.load %arg4[%38, %c0_9, %c0_10] : memref<8x4x64xf32, #tpu.memory_space<vmem>>, vector<1x4x64xf32>
    %40 = vector.shape_cast %39 : vector<1x4x64xf32> to vector<4x64xf32>
    %41 = vector.shape_cast %37 : vector<4x64xf32> to vector<1x4x64xf32>
    tpu.vector_store %arg4[%38, %c0_9, %c0_10], %41 {strides = array<i32>} : memref<8x4x64xf32, #tpu.memory_space<vmem>>, vector<1x4x64xf32>,
    %42 = vector.extract_strided_slice %36 {offsets = [0, 64], sizes = [4, 64], strides = [1, 1]} : vector<4x128xf32> to vector<4x64xf32>
    %c7_i32 = arith.constant 7 : i32
    %43 = arith.subi %c7_i32, %c0_i32 : i32
    %44 = arith.index_cast %43 : i32 to index
    %c0_11 = arith.constant 0 : index
    %c0_12 = arith.constant 0 : index
    %45 = vector.load %arg5[%44, %c0_11, %c0_12] : memref<8x4x64xf32, #tpu.memory_space<vmem>>, vector<1x4x64xf32>
    %46 = vector.shape_cast %45 : vector<1x4x64xf32> to vector<4x64xf32>
    %47 = vector.shape_cast %42 : vector<4x64xf32> to vector<1x4x64xf32>
    tpu.vector_store %arg5[%44, %c0_11, %c0_12], %47 {strides = array<i32>} : memref<8x4x64xf32, #tpu.memory_space<vmem>>, vector<1x4x64xf32>,
    %cst_13 = arith.constant 0.000000e+00 : f32
    %48 = vector.broadcast %cst_13 : f32 to vector<4x128xf32>
    %49 = arith.cmpf ogt, %35, %48 : vector<4x128xf32>
    %50 = arith.select %49, %32, %1 : vector<4x128xi1>, vector<4x128xf32>
    %cst_14 = arith.constant 0.000000e+00 : f32
    %51 = vector.broadcast %cst_14 : f32 to vector<4x128xf32>
    %52 = arith.cmpf ogt, %35, %51 : vector<4x128xf32>
    %53 = arith.select %52, %30, %1 : vector<4x128xi1>, vector<4x128xf32>
    %c1_i32 = arith.constant 1 : i32
    %54 = arith.index_cast %c1_i32 : i32 to index
    %c0_15 = arith.constant 0 : index
    %c0_16 = arith.constant 0 : index
    %55 = vector.load %arg1[%54, %c0_15, %c0_16] : memref<8x4x512xf32, #tpu.memory_space<vmem>>, vector<1x4x512xf32>
    %56 = vector.shape_cast %55 : vector<1x4x512xf32> to vector<4x512xf32>
    %57 = arith.truncf %50 : vector<4x128xf32> to vector<4x128xbf16>
    %cst_17 = arith.constant dense<0.000000e+00> : vector<4x512xf32>
    %58 = tpu.matmul %57, %0, %cst_17 {dimension_numbers = #tpu.dot_dimension_numbers<[1], [0], [0], [1], [0, 0, 1, 1], [], []>} : vector<4x128xbf16>, vector<128x512xbf16>, vector<4x512xf32> -> vector<4x512xf32>
    %59 = arith.addf %56, %58 : vector<4x512xf32>
    %60 = vector.extract_strided_slice %59 {offsets = [0, 0], sizes = [4, 128], strides = [1, 1]} : vector<4x512xf32> to vector<4x128xf32>
    %61 = arith.negf %60 : vector<4x128xf32>
    %62 = math.exp %61 : vector<4x128xf32>
    %cst_18 = arith.constant 1.000000e+00 : f32
    %63 = vector.broadcast %cst_18 : f32 to vector<4x128xf32>
    %64 = arith.addf %63, %62 : vector<4x128xf32>
    %65 = arith.divf %63, %64 : vector<4x128xf32>
    %66 = vector.extract_strided_slice %59 {offsets = [0, 128], sizes = [4, 128], strides = [1, 1]} : vector<4x512xf32> to vector<4x128xf32>
    %67 = arith.negf %66 : vector<4x128xf32>
    %68 = math.exp %67 : vector<4x128xf32>
    %cst_19 = arith.constant 1.000000e+00 : f32
    %69 = vector.broadcast %cst_19 : f32 to vector<4x128xf32>
    %70 = arith.addf %69, %68 : vector<4x128xf32>
    %71 = arith.divf %69, %70 : vector<4x128xf32>
    %72 = vector.extract_strided_slice %59 {offsets = [0, 256], sizes = [4, 128], strides = [1, 1]} : vector<4x512xf32> to vector<4x128xf32>
    %73 = math.tanh %72 : vector<4x128xf32>
    %74 = vector.extract_strided_slice %59 {offsets = [0, 384], sizes = [4, 128], strides = [1, 1]} : vector<4x512xf32> to vector<4x128xf32>
    %75 = arith.negf %74 : vector<4x128xf32>
    %76 = math.exp %75 : vector<4x128xf32>
    %cst_20 = arith.constant 1.000000e+00 : f32
    %77 = vector.broadcast %cst_20 : f32 to vector<4x128xf32>
    %78 = arith.addf %77, %76 : vector<4x128xf32>
    %79 = arith.divf %77, %78 : vector<4x128xf32>
    %80 = arith.mulf %71, %53 : vector<4x128xf32>
    %81 = arith.mulf %65, %73 : vector<4x128xf32>
    %82 = arith.addf %80, %81 : vector<4x128xf32>
    %83 = math.tanh %82 : vector<4x128xf32>
    %84 = arith.mulf %79, %83 : vector<4x128xf32>
    %85 = arith.index_cast %c1_i32 : i32 to index
    %c0_21 = arith.constant 0 : index
    %c0_22 = arith.constant 0 : index
    %86 = vector.load %arg2[%85, %c0_21, %c0_22] : memref<8x4x128xf32, #tpu.memory_space<vmem>>, vector<1x4x128xf32>
    %87 = vector.shape_cast %86 : vector<1x4x128xf32> to vector<4x128xf32>
    %88 = arith.mulf %84, %87 : vector<4x128xf32>
    %89 = vector.extract_strided_slice %88 {offsets = [0, 0], sizes = [4, 64], strides = [1, 1]} : vector<4x128xf32> to vector<4x64xf32>
    %90 = arith.index_cast %c1_i32 : i32 to index
    %c0_23 = arith.constant 0 : index
    %c0_24 = arith.constant 0 : index
    %91 = vector.load %arg4[%90, %c0_23, %c0_24] : memref<8x4x64xf32, #tpu.memory_space<vmem>>, vector<1x4x64xf32>
    %92 = vector.shape_cast %91 : vector<1x4x64xf32> to vector<4x64xf32>
    %93 = vector.shape_cast %89 : vector<4x64xf32> to vector<1x4x64xf32>
    tpu.vector_store %arg4[%90, %c0_23, %c0_24], %93 {strides = array<i32>} : memref<8x4x64xf32, #tpu.memory_space<vmem>>, vector<1x4x64xf32>,
    %94 = vector.extract_strided_slice %88 {offsets = [0, 64], sizes = [4, 64], strides = [1, 1]} : vector<4x128xf32> to vector<4x64xf32>
    %c7_i32_25 = arith.constant 7 : i32
    %95 = arith.subi %c7_i32_25, %c1_i32 : i32
    %96 = arith.index_cast %95 : i32 to index
    %c0_26 = arith.constant 0 : index
    %c0_27 = arith.constant 0 : index
    %97 = vector.load %arg5[%96, %c0_26, %c0_27] : memref<8x4x64xf32, #tpu.memory_space<vmem>>, vector<1x4x64xf32>
    %98 = vector.shape_cast %97 : vector<1x4x64xf32> to vector<4x64xf32>
    %99 = vector.shape_cast %94 : vector<4x64xf32> to vector<1x4x64xf32>
    tpu.vector_store %arg5[%96, %c0_26, %c0_27], %99 {strides = array<i32>} : memref<8x4x64xf32, #tpu.memory_space<vmem>>, vector<1x4x64xf32>,
    %cst_28 = arith.constant 0.000000e+00 : f32
    %100 = vector.broadcast %cst_28 : f32 to vector<4x128xf32>
    %101 = arith.cmpf ogt, %87, %100 : vector<4x128xf32>
    %102 = arith.select %101, %84, %50 : vector<4x128xi1>, vector<4x128xf32>
    %cst_29 = arith.constant 0.000000e+00 : f32
    %103 = vector.broadcast %cst_29 : f32 to vector<4x128xf32>
    %104 = arith.cmpf ogt, %87, %103 : vector<4x128xf32>
    %105 = arith.select %104, %82, %53 : vector<4x128xi1>, vector<4x128xf32>
    %c2_i32 = arith.constant 2 : i32
    %106 = arith.index_cast %c2_i32 : i32 to index
    %c0_30 = arith.constant 0 : index
    %c0_31 = arith.constant 0 : index
    %107 = vector.load %arg1[%106, %c0_30, %c0_31] : memref<8x4x512xf32, #tpu.memory_space<vmem>>, vector<1x4x512xf32>
    %108 = vector.shape_cast %107 : vector<1x4x512xf32> to vector<4x512xf32>
    %109 = arith.truncf %102 : vector<4x128xf32> to vector<4x128xbf16>
    %cst_32 = arith.constant dense<0.000000e+00> : vector<4x512xf32>
    %110 = tpu.matmul %109, %0, %cst_32 {dimension_numbers = #tpu.dot_dimension_numbers<[1], [0], [0], [1], [0, 0, 1, 1], [], []>} : vector<4x128xbf16>, vector<128x512xbf16>, vector<4x512xf32> -> vector<4x512xf32>
    %111 = arith.addf %108, %110 : vector<4x512xf32>
    %112 = vector.extract_strided_slice %111 {offsets = [0, 0], sizes = [4, 128], strides = [1, 1]} : vector<4x512xf32> to vector<4x128xf32>
    %113 = arith.negf %112 : vector<4x128xf32>
    %114 = math.exp %113 : vector<4x128xf32>
    %cst_33 = arith.constant 1.000000e+00 : f32
    %115 = vector.broadcast %cst_33 : f32 to vector<4x128xf32>
    %116 = arith.addf %115, %114 : vector<4x128xf32>
    %117 = arith.divf %115, %116 : vector<4x128xf32>
    %118 = vector.extract_strided_slice %111 {offsets = [0, 128], sizes = [4, 128], strides = [1, 1]} : vector<4x512xf32> to vector<4x128xf32>
    %119 = arith.negf %118 : vector<4x128xf32>
    %120 = math.exp %119 : vector<4x128xf32>
    %cst_34 = arith.constant 1.000000e+00 : f32
    %121 = vector.broadcast %cst_34 : f32 to vector<4x128xf32>
    %122 = arith.addf %121, %120 : vector<4x128xf32>
    %123 = arith.divf %121, %122 : vector<4x128xf32>
    %124 = vector.extract_strided_slice %111 {offsets = [0, 256], sizes = [4, 128], strides = [1, 1]} : vector<4x512xf32> to vector<4x128xf32>
    %125 = math.tanh %124 : vector<4x128xf32>
    %126 = vector.extract_strided_slice %111 {offsets = [0, 384], sizes = [4, 128], strides = [1, 1]} : vector<4x512xf32> to vector<4x128xf32>
    %127 = arith.negf %126 : vector<4x128xf32>
    %128 = math.exp %127 : vector<4x128xf32>
    %cst_35 = arith.constant 1.000000e+00 : f32
    %129 = vector.broadcast %cst_35 : f32 to vector<4x128xf32>
    %130 = arith.addf %129, %128 : vector<4x128xf32>
    %131 = arith.divf %129, %130 : vector<4x128xf32>
    %132 = arith.mulf %123, %105 : vector<4x128xf32>
    %133 = arith.mulf %117, %125 : vector<4x128xf32>
    %134 = arith.addf %132, %133 : vector<4x128xf32>
    %135 = math.tanh %134 : vector<4x128xf32>
    %136 = arith.mulf %131, %135 : vector<4x128xf32>
    %137 = arith.index_cast %c2_i32 : i32 to index
    %c0_36 = arith.constant 0 : index
    %c0_37 = arith.constant 0 : index
    %138 = vector.load %arg2[%137, %c0_36, %c0_37] : memref<8x4x128xf32, #tpu.memory_space<vmem>>, vector<1x4x128xf32>
    %139 = vector.shape_cast %138 : vector<1x4x128xf32> to vector<4x128xf32>
    %140 = arith.mulf %136, %139 : vector<4x128xf32>
    %141 = vector.extract_strided_slice %140 {offsets = [0, 0], sizes = [4, 64], strides = [1, 1]} : vector<4x128xf32> to vector<4x64xf32>
    %142 = arith.index_cast %c2_i32 : i32 to index
    %c0_38 = arith.constant 0 : index
    %c0_39 = arith.constant 0 : index
    %143 = vector.load %arg4[%142, %c0_38, %c0_39] : memref<8x4x64xf32, #tpu.memory_space<vmem>>, vector<1x4x64xf32>
    %144 = vector.shape_cast %143 : vector<1x4x64xf32> to vector<4x64xf32>
    %145 = vector.shape_cast %141 : vector<4x64xf32> to vector<1x4x64xf32>
    tpu.vector_store %arg4[%142, %c0_38, %c0_39], %145 {strides = array<i32>} : memref<8x4x64xf32, #tpu.memory_space<vmem>>, vector<1x4x64xf32>,
    %146 = vector.extract_strided_slice %140 {offsets = [0, 64], sizes = [4, 64], strides = [1, 1]} : vector<4x128xf32> to vector<4x64xf32>
    %c7_i32_40 = arith.constant 7 : i32
    %147 = arith.subi %c7_i32_40, %c2_i32 : i32
    %148 = arith.index_cast %147 : i32 to index
    %c0_41 = arith.constant 0 : index
    %c0_42 = arith.constant 0 : index
    %149 = vector.load %arg5[%148, %c0_41, %c0_42] : memref<8x4x64xf32, #tpu.memory_space<vmem>>, vector<1x4x64xf32>
    %150 = vector.shape_cast %149 : vector<1x4x64xf32> to vector<4x64xf32>
    %151 = vector.shape_cast %146 : vector<4x64xf32> to vector<1x4x64xf32>
    tpu.vector_store %arg5[%148, %c0_41, %c0_42], %151 {strides = array<i32>} : memref<8x4x64xf32, #tpu.memory_space<vmem>>, vector<1x4x64xf32>,
    %cst_43 = arith.constant 0.000000e+00 : f32
    %152 = vector.broadcast %cst_43 : f32 to vector<4x128xf32>
    %153 = arith.cmpf ogt, %139, %152 : vector<4x128xf32>
    %154 = arith.select %153, %136, %102 : vector<4x128xi1>, vector<4x128xf32>
    %cst_44 = arith.constant 0.000000e+00 : f32
    %155 = vector.broadcast %cst_44 : f32 to vector<4x128xf32>
    %156 = arith.cmpf ogt, %139, %155 : vector<4x128xf32>
    %157 = arith.select %156, %134, %105 : vector<4x128xi1>, vector<4x128xf32>
    %c3_i32 = arith.constant 3 : i32
    %158 = arith.index_cast %c3_i32 : i32 to index
    %c0_45 = arith.constant 0 : index
    %c0_46 = arith.constant 0 : index
    %159 = vector.load %arg1[%158, %c0_45, %c0_46] : memref<8x4x512xf32, #tpu.memory_space<vmem>>, vector<1x4x512xf32>
    %160 = vector.shape_cast %159 : vector<1x4x512xf32> to vector<4x512xf32>
    %161 = arith.truncf %154 : vector<4x128xf32> to vector<4x128xbf16>
    %cst_47 = arith.constant dense<0.000000e+00> : vector<4x512xf32>
    %162 = tpu.matmul %161, %0, %cst_47 {dimension_numbers = #tpu.dot_dimension_numbers<[1], [0], [0], [1], [0, 0, 1, 1], [], []>} : vector<4x128xbf16>, vector<128x512xbf16>, vector<4x512xf32> -> vector<4x512xf32>
    %163 = arith.addf %160, %162 : vector<4x512xf32>
    %164 = vector.extract_strided_slice %163 {offsets = [0, 0], sizes = [4, 128], strides = [1, 1]} : vector<4x512xf32> to vector<4x128xf32>
    %165 = arith.negf %164 : vector<4x128xf32>
    %166 = math.exp %165 : vector<4x128xf32>
    %cst_48 = arith.constant 1.000000e+00 : f32
    %167 = vector.broadcast %cst_48 : f32 to vector<4x128xf32>
    %168 = arith.addf %167, %166 : vector<4x128xf32>
    %169 = arith.divf %167, %168 : vector<4x128xf32>
    %170 = vector.extract_strided_slice %163 {offsets = [0, 128], sizes = [4, 128], strides = [1, 1]} : vector<4x512xf32> to vector<4x128xf32>
    %171 = arith.negf %170 : vector<4x128xf32>
    %172 = math.exp %171 : vector<4x128xf32>
    %cst_49 = arith.constant 1.000000e+00 : f32
    %173 = vector.broadcast %cst_49 : f32 to vector<4x128xf32>
    %174 = arith.addf %173, %172 : vector<4x128xf32>
    %175 = arith.divf %173, %174 : vector<4x128xf32>
    %176 = vector.extract_strided_slice %163 {offsets = [0, 256], sizes = [4, 128], strides = [1, 1]} : vector<4x512xf32> to vector<4x128xf32>
    %177 = math.tanh %176 : vector<4x128xf32>
    %178 = vector.extract_strided_slice %163 {offsets = [0, 384], sizes = [4, 128], strides = [1, 1]} : vector<4x512xf32> to vector<4x128xf32>
    %179 = arith.negf %178 : vector<4x128xf32>
    %180 = math.exp %179 : vector<4x128xf32>
    %cst_50 = arith.constant 1.000000e+00 : f32
    %181 = vector.broadcast %cst_50 : f32 to vector<4x128xf32>
    %182 = arith.addf %181, %180 : vector<4x128xf32>
    %183 = arith.divf %181, %182 : vector<4x128xf32>
    %184 = arith.mulf %175, %157 : vector<4x128xf32>
    %185 = arith.mulf %169, %177 : vector<4x128xf32>
    %186 = arith.addf %184, %185 : vector<4x128xf32>
    %187 = math.tanh %186 : vector<4x128xf32>
    %188 = arith.mulf %183, %187 : vector<4x128xf32>
    %189 = arith.index_cast %c3_i32 : i32 to index
    %c0_51 = arith.constant 0 : index
    %c0_52 = arith.constant 0 : index
    %190 = vector.load %arg2[%189, %c0_51, %c0_52] : memref<8x4x128xf32, #tpu.memory_space<vmem>>, vector<1x4x128xf32>
    %191 = vector.shape_cast %190 : vector<1x4x128xf32> to vector<4x128xf32>
    %192 = arith.mulf %188, %191 : vector<4x128xf32>
    %193 = vector.extract_strided_slice %192 {offsets = [0, 0], sizes = [4, 64], strides = [1, 1]} : vector<4x128xf32> to vector<4x64xf32>
    %194 = arith.index_cast %c3_i32 : i32 to index
    %c0_53 = arith.constant 0 : index
    %c0_54 = arith.constant 0 : index
    %195 = vector.load %arg4[%194, %c0_53, %c0_54] : memref<8x4x64xf32, #tpu.memory_space<vmem>>, vector<1x4x64xf32>
    %196 = vector.shape_cast %195 : vector<1x4x64xf32> to vector<4x64xf32>
    %197 = vector.shape_cast %193 : vector<4x64xf32> to vector<1x4x64xf32>
    tpu.vector_store %arg4[%194, %c0_53, %c0_54], %197 {strides = array<i32>} : memref<8x4x64xf32, #tpu.memory_space<vmem>>, vector<1x4x64xf32>,
    %198 = vector.extract_strided_slice %192 {offsets = [0, 64], sizes = [4, 64], strides = [1, 1]} : vector<4x128xf32> to vector<4x64xf32>
    %c7_i32_55 = arith.constant 7 : i32
    %199 = arith.subi %c7_i32_55, %c3_i32 : i32
    %200 = arith.index_cast %199 : i32 to index
    %c0_56 = arith.constant 0 : index
    %c0_57 = arith.constant 0 : index
    %201 = vector.load %arg5[%200, %c0_56, %c0_57] : memref<8x4x64xf32, #tpu.memory_space<vmem>>, vector<1x4x64xf32>
    %202 = vector.shape_cast %201 : vector<1x4x64xf32> to vector<4x64xf32>
    %203 = vector.shape_cast %198 : vector<4x64xf32> to vector<1x4x64xf32>
    tpu.vector_store %arg5[%200, %c0_56, %c0_57], %203 {strides = array<i32>} : memref<8x4x64xf32, #tpu.memory_space<vmem>>, vector<1x4x64xf32>,
    %cst_58 = arith.constant 0.000000e+00 : f32
    %204 = vector.broadcast %cst_58 : f32 to vector<4x128xf32>
    %205 = arith.cmpf ogt, %191, %204 : vector<4x128xf32>
    %206 = arith.select %205, %188, %154 : vector<4x128xi1>, vector<4x128xf32>
    %cst_59 = arith.constant 0.000000e+00 : f32
    %207 = vector.broadcast %cst_59 : f32 to vector<4x128xf32>
    %208 = arith.cmpf ogt, %191, %207 : vector<4x128xf32>
    %209 = arith.select %208, %186, %157 : vector<4x128xi1>, vector<4x128xf32>
    %c4_i32 = arith.constant 4 : i32
    %210 = arith.index_cast %c4_i32 : i32 to index
    %c0_60 = arith.constant 0 : index
    %c0_61 = arith.constant 0 : index
    %211 = vector.load %arg1[%210, %c0_60, %c0_61] : memref<8x4x512xf32, #tpu.memory_space<vmem>>, vector<1x4x512xf32>
    %212 = vector.shape_cast %211 : vector<1x4x512xf32> to vector<4x512xf32>
    %213 = arith.truncf %206 : vector<4x128xf32> to vector<4x128xbf16>
    %cst_62 = arith.constant dense<0.000000e+00> : vector<4x512xf32>
    %214 = tpu.matmul %213, %0, %cst_62 {dimension_numbers = #tpu.dot_dimension_numbers<[1], [0], [0], [1], [0, 0, 1, 1], [], []>} : vector<4x128xbf16>, vector<128x512xbf16>, vector<4x512xf32> -> vector<4x512xf32>
    %215 = arith.addf %212, %214 : vector<4x512xf32>
    %216 = vector.extract_strided_slice %215 {offsets = [0, 0], sizes = [4, 128], strides = [1, 1]} : vector<4x512xf32> to vector<4x128xf32>
    %217 = arith.negf %216 : vector<4x128xf32>
    %218 = math.exp %217 : vector<4x128xf32>
    %cst_63 = arith.constant 1.000000e+00 : f32
    %219 = vector.broadcast %cst_63 : f32 to vector<4x128xf32>
    %220 = arith.addf %219, %218 : vector<4x128xf32>
    %221 = arith.divf %219, %220 : vector<4x128xf32>
    %222 = vector.extract_strided_slice %215 {offsets = [0, 128], sizes = [4, 128], strides = [1, 1]} : vector<4x512xf32> to vector<4x128xf32>
    %223 = arith.negf %222 : vector<4x128xf32>
    %224 = math.exp %223 : vector<4x128xf32>
    %cst_64 = arith.constant 1.000000e+00 : f32
    %225 = vector.broadcast %cst_64 : f32 to vector<4x128xf32>
    %226 = arith.addf %225, %224 : vector<4x128xf32>
    %227 = arith.divf %225, %226 : vector<4x128xf32>
    %228 = vector.extract_strided_slice %215 {offsets = [0, 256], sizes = [4, 128], strides = [1, 1]} : vector<4x512xf32> to vector<4x128xf32>
    %229 = math.tanh %228 : vector<4x128xf32>
    %230 = vector.extract_strided_slice %215 {offsets = [0, 384], sizes = [4, 128], strides = [1, 1]} : vector<4x512xf32> to vector<4x128xf32>
    %231 = arith.negf %230 : vector<4x128xf32>
    %232 = math.exp %231 : vector<4x128xf32>
    %cst_65 = arith.constant 1.000000e+00 : f32
    %233 = vector.broadcast %cst_65 : f32 to vector<4x128xf32>
    %234 = arith.addf %233, %232 : vector<4x128xf32>
    %235 = arith.divf %233, %234 : vector<4x128xf32>
    %236 = arith.mulf %227, %209 : vector<4x128xf32>
    %237 = arith.mulf %221, %229 : vector<4x128xf32>
    %238 = arith.addf %236, %237 : vector<4x128xf32>
    %239 = math.tanh %238 : vector<4x128xf32>
    %240 = arith.mulf %235, %239 : vector<4x128xf32>
    %241 = arith.index_cast %c4_i32 : i32 to index
    %c0_66 = arith.constant 0 : index
    %c0_67 = arith.constant 0 : index
    %242 = vector.load %arg2[%241, %c0_66, %c0_67] : memref<8x4x128xf32, #tpu.memory_space<vmem>>, vector<1x4x128xf32>
    %243 = vector.shape_cast %242 : vector<1x4x128xf32> to vector<4x128xf32>
    %244 = arith.mulf %240, %243 : vector<4x128xf32>
    %245 = vector.extract_strided_slice %244 {offsets = [0, 0], sizes = [4, 64], strides = [1, 1]} : vector<4x128xf32> to vector<4x64xf32>
    %246 = arith.index_cast %c4_i32 : i32 to index
    %c0_68 = arith.constant 0 : index
    %c0_69 = arith.constant 0 : index
    %247 = vector.load %arg4[%246, %c0_68, %c0_69] : memref<8x4x64xf32, #tpu.memory_space<vmem>>, vector<1x4x64xf32>
    %248 = vector.shape_cast %247 : vector<1x4x64xf32> to vector<4x64xf32>
    %249 = vector.shape_cast %245 : vector<4x64xf32> to vector<1x4x64xf32>
    tpu.vector_store %arg4[%246, %c0_68, %c0_69], %249 {strides = array<i32>} : memref<8x4x64xf32, #tpu.memory_space<vmem>>, vector<1x4x64xf32>,
    %250 = vector.extract_strided_slice %244 {offsets = [0, 64], sizes = [4, 64], strides = [1, 1]} : vector<4x128xf32> to vector<4x64xf32>
    %c7_i32_70 = arith.constant 7 : i32
    %251 = arith.subi %c7_i32_70, %c4_i32 : i32
    %252 = arith.index_cast %251 : i32 to index
    %c0_71 = arith.constant 0 : index
    %c0_72 = arith.constant 0 : index
    %253 = vector.load %arg5[%252, %c0_71, %c0_72] : memref<8x4x64xf32, #tpu.memory_space<vmem>>, vector<1x4x64xf32>
    %254 = vector.shape_cast %253 : vector<1x4x64xf32> to vector<4x64xf32>
    %255 = vector.shape_cast %250 : vector<4x64xf32> to vector<1x4x64xf32>
    tpu.vector_store %arg5[%252, %c0_71, %c0_72], %255 {strides = array<i32>} : memref<8x4x64xf32, #tpu.memory_space<vmem>>, vector<1x4x64xf32>,
    %cst_73 = arith.constant 0.000000e+00 : f32
    %256 = vector.broadcast %cst_73 : f32 to vector<4x128xf32>
    %257 = arith.cmpf ogt, %243, %256 : vector<4x128xf32>
    %258 = arith.select %257, %240, %206 : vector<4x128xi1>, vector<4x128xf32>
    %cst_74 = arith.constant 0.000000e+00 : f32
    %259 = vector.broadcast %cst_74 : f32 to vector<4x128xf32>
    %260 = arith.cmpf ogt, %243, %259 : vector<4x128xf32>
    %261 = arith.select %260, %238, %209 : vector<4x128xi1>, vector<4x128xf32>
    %c5_i32 = arith.constant 5 : i32
    %262 = arith.index_cast %c5_i32 : i32 to index
    %c0_75 = arith.constant 0 : index
    %c0_76 = arith.constant 0 : index
    %263 = vector.load %arg1[%262, %c0_75, %c0_76] : memref<8x4x512xf32, #tpu.memory_space<vmem>>, vector<1x4x512xf32>
    %264 = vector.shape_cast %263 : vector<1x4x512xf32> to vector<4x512xf32>
    %265 = arith.truncf %258 : vector<4x128xf32> to vector<4x128xbf16>
    %cst_77 = arith.constant dense<0.000000e+00> : vector<4x512xf32>
    %266 = tpu.matmul %265, %0, %cst_77 {dimension_numbers = #tpu.dot_dimension_numbers<[1], [0], [0], [1], [0, 0, 1, 1], [], []>} : vector<4x128xbf16>, vector<128x512xbf16>, vector<4x512xf32> -> vector<4x512xf32>
    %267 = arith.addf %264, %266 : vector<4x512xf32>
    %268 = vector.extract_strided_slice %267 {offsets = [0, 0], sizes = [4, 128], strides = [1, 1]} : vector<4x512xf32> to vector<4x128xf32>
    %269 = arith.negf %268 : vector<4x128xf32>
    %270 = math.exp %269 : vector<4x128xf32>
    %cst_78 = arith.constant 1.000000e+00 : f32
    %271 = vector.broadcast %cst_78 : f32 to vector<4x128xf32>
    %272 = arith.addf %271, %270 : vector<4x128xf32>
    %273 = arith.divf %271, %272 : vector<4x128xf32>
    %274 = vector.extract_strided_slice %267 {offsets = [0, 128], sizes = [4, 128], strides = [1, 1]} : vector<4x512xf32> to vector<4x128xf32>
    %275 = arith.negf %274 : vector<4x128xf32>
    %276 = math.exp %275 : vector<4x128xf32>
    %cst_79 = arith.constant 1.000000e+00 : f32
    %277 = vector.broadcast %cst_79 : f32 to vector<4x128xf32>
    %278 = arith.addf %277, %276 : vector<4x128xf32>
    %279 = arith.divf %277, %278 : vector<4x128xf32>
    %280 = vector.extract_strided_slice %267 {offsets = [0, 256], sizes = [4, 128], strides = [1, 1]} : vector<4x512xf32> to vector<4x128xf32>
    %281 = math.tanh %280 : vector<4x128xf32>
    %282 = vector.extract_strided_slice %267 {offsets = [0, 384], sizes = [4, 128], strides = [1, 1]} : vector<4x512xf32> to vector<4x128xf32>
    %283 = arith.negf %282 : vector<4x128xf32>
    %284 = math.exp %283 : vector<4x128xf32>
    %cst_80 = arith.constant 1.000000e+00 : f32
    %285 = vector.broadcast %cst_80 : f32 to vector<4x128xf32>
    %286 = arith.addf %285, %284 : vector<4x128xf32>
    %287 = arith.divf %285, %286 : vector<4x128xf32>
    %288 = arith.mulf %279, %261 : vector<4x128xf32>
    %289 = arith.mulf %273, %281 : vector<4x128xf32>
    %290 = arith.addf %288, %289 : vector<4x128xf32>
    %291 = math.tanh %290 : vector<4x128xf32>
    %292 = arith.mulf %287, %291 : vector<4x128xf32>
    %293 = arith.index_cast %c5_i32 : i32 to index
    %c0_81 = arith.constant 0 : index
    %c0_82 = arith.constant 0 : index
    %294 = vector.load %arg2[%293, %c0_81, %c0_82] : memref<8x4x128xf32, #tpu.memory_space<vmem>>, vector<1x4x128xf32>
    %295 = vector.shape_cast %294 : vector<1x4x128xf32> to vector<4x128xf32>
    %296 = arith.mulf %292, %295 : vector<4x128xf32>
    %297 = vector.extract_strided_slice %296 {offsets = [0, 0], sizes = [4, 64], strides = [1, 1]} : vector<4x128xf32> to vector<4x64xf32>
    %298 = arith.index_cast %c5_i32 : i32 to index
    %c0_83 = arith.constant 0 : index
    %c0_84 = arith.constant 0 : index
    %299 = vector.load %arg4[%298, %c0_83, %c0_84] : memref<8x4x64xf32, #tpu.memory_space<vmem>>, vector<1x4x64xf32>
    %300 = vector.shape_cast %299 : vector<1x4x64xf32> to vector<4x64xf32>
    %301 = vector.shape_cast %297 : vector<4x64xf32> to vector<1x4x64xf32>
    tpu.vector_store %arg4[%298, %c0_83, %c0_84], %301 {strides = array<i32>} : memref<8x4x64xf32, #tpu.memory_space<vmem>>, vector<1x4x64xf32>,
    %302 = vector.extract_strided_slice %296 {offsets = [0, 64], sizes = [4, 64], strides = [1, 1]} : vector<4x128xf32> to vector<4x64xf32>
    %c7_i32_85 = arith.constant 7 : i32
    %303 = arith.subi %c7_i32_85, %c5_i32 : i32
    %304 = arith.index_cast %303 : i32 to index
    %c0_86 = arith.constant 0 : index
    %c0_87 = arith.constant 0 : index
    %305 = vector.load %arg5[%304, %c0_86, %c0_87] : memref<8x4x64xf32, #tpu.memory_space<vmem>>, vector<1x4x64xf32>
    %306 = vector.shape_cast %305 : vector<1x4x64xf32> to vector<4x64xf32>
    %307 = vector.shape_cast %302 : vector<4x64xf32> to vector<1x4x64xf32>
    tpu.vector_store %arg5[%304, %c0_86, %c0_87], %307 {strides = array<i32>} : memref<8x4x64xf32, #tpu.memory_space<vmem>>, vector<1x4x64xf32>,
    %cst_88 = arith.constant 0.000000e+00 : f32
    %308 = vector.broadcast %cst_88 : f32 to vector<4x128xf32>
    %309 = arith.cmpf ogt, %295, %308 : vector<4x128xf32>
    %310 = arith.select %309, %292, %258 : vector<4x128xi1>, vector<4x128xf32>
    %cst_89 = arith.constant 0.000000e+00 : f32
    %311 = vector.broadcast %cst_89 : f32 to vector<4x128xf32>
    %312 = arith.cmpf ogt, %295, %311 : vector<4x128xf32>
    %313 = arith.select %312, %290, %261 : vector<4x128xi1>, vector<4x128xf32>
    %c6_i32 = arith.constant 6 : i32
    %314 = arith.index_cast %c6_i32 : i32 to index
    %c0_90 = arith.constant 0 : index
    %c0_91 = arith.constant 0 : index
    %315 = vector.load %arg1[%314, %c0_90, %c0_91] : memref<8x4x512xf32, #tpu.memory_space<vmem>>, vector<1x4x512xf32>
    %316 = vector.shape_cast %315 : vector<1x4x512xf32> to vector<4x512xf32>
    %317 = arith.truncf %310 : vector<4x128xf32> to vector<4x128xbf16>
    %cst_92 = arith.constant dense<0.000000e+00> : vector<4x512xf32>
    %318 = tpu.matmul %317, %0, %cst_92 {dimension_numbers = #tpu.dot_dimension_numbers<[1], [0], [0], [1], [0, 0, 1, 1], [], []>} : vector<4x128xbf16>, vector<128x512xbf16>, vector<4x512xf32> -> vector<4x512xf32>
    %319 = arith.addf %316, %318 : vector<4x512xf32>
    %320 = vector.extract_strided_slice %319 {offsets = [0, 0], sizes = [4, 128], strides = [1, 1]} : vector<4x512xf32> to vector<4x128xf32>
    %321 = arith.negf %320 : vector<4x128xf32>
    %322 = math.exp %321 : vector<4x128xf32>
    %cst_93 = arith.constant 1.000000e+00 : f32
    %323 = vector.broadcast %cst_93 : f32 to vector<4x128xf32>
    %324 = arith.addf %323, %322 : vector<4x128xf32>
    %325 = arith.divf %323, %324 : vector<4x128xf32>
    %326 = vector.extract_strided_slice %319 {offsets = [0, 128], sizes = [4, 128], strides = [1, 1]} : vector<4x512xf32> to vector<4x128xf32>
    %327 = arith.negf %326 : vector<4x128xf32>
    %328 = math.exp %327 : vector<4x128xf32>
    %cst_94 = arith.constant 1.000000e+00 : f32
    %329 = vector.broadcast %cst_94 : f32 to vector<4x128xf32>
    %330 = arith.addf %329, %328 : vector<4x128xf32>
    %331 = arith.divf %329, %330 : vector<4x128xf32>
    %332 = vector.extract_strided_slice %319 {offsets = [0, 256], sizes = [4, 128], strides = [1, 1]} : vector<4x512xf32> to vector<4x128xf32>
    %333 = math.tanh %332 : vector<4x128xf32>
    %334 = vector.extract_strided_slice %319 {offsets = [0, 384], sizes = [4, 128], strides = [1, 1]} : vector<4x512xf32> to vector<4x128xf32>
    %335 = arith.negf %334 : vector<4x128xf32>
    %336 = math.exp %335 : vector<4x128xf32>
    %cst_95 = arith.constant 1.000000e+00 : f32
    %337 = vector.broadcast %cst_95 : f32 to vector<4x128xf32>
    %338 = arith.addf %337, %336 : vector<4x128xf32>
    %339 = arith.divf %337, %338 : vector<4x128xf32>
    %340 = arith.mulf %331, %313 : vector<4x128xf32>
    %341 = arith.mulf %325, %333 : vector<4x128xf32>
    %342 = arith.addf %340, %341 : vector<4x128xf32>
    %343 = math.tanh %342 : vector<4x128xf32>
    %344 = arith.mulf %339, %343 : vector<4x128xf32>
    %345 = arith.index_cast %c6_i32 : i32 to index
    %c0_96 = arith.constant 0 : index
    %c0_97 = arith.constant 0 : index
    %346 = vector.load %arg2[%345, %c0_96, %c0_97] : memref<8x4x128xf32, #tpu.memory_space<vmem>>, vector<1x4x128xf32>
    %347 = vector.shape_cast %346 : vector<1x4x128xf32> to vector<4x128xf32>
    %348 = arith.mulf %344, %347 : vector<4x128xf32>
    %349 = vector.extract_strided_slice %348 {offsets = [0, 0], sizes = [4, 64], strides = [1, 1]} : vector<4x128xf32> to vector<4x64xf32>
    %350 = arith.index_cast %c6_i32 : i32 to index
    %c0_98 = arith.constant 0 : index
    %c0_99 = arith.constant 0 : index
    %351 = vector.load %arg4[%350, %c0_98, %c0_99] : memref<8x4x64xf32, #tpu.memory_space<vmem>>, vector<1x4x64xf32>
    %352 = vector.shape_cast %351 : vector<1x4x64xf32> to vector<4x64xf32>
    %353 = vector.shape_cast %349 : vector<4x64xf32> to vector<1x4x64xf32>
    tpu.vector_store %arg4[%350, %c0_98, %c0_99], %353 {strides = array<i32>} : memref<8x4x64xf32, #tpu.memory_space<vmem>>, vector<1x4x64xf32>,
    %354 = vector.extract_strided_slice %348 {offsets = [0, 64], sizes = [4, 64], strides = [1, 1]} : vector<4x128xf32> to vector<4x64xf32>
    %c7_i32_100 = arith.constant 7 : i32
    %355 = arith.subi %c7_i32_100, %c6_i32 : i32
    %356 = arith.index_cast %355 : i32 to index
    %c0_101 = arith.constant 0 : index
    %c0_102 = arith.constant 0 : index
    %357 = vector.load %arg5[%356, %c0_101, %c0_102] : memref<8x4x64xf32, #tpu.memory_space<vmem>>, vector<1x4x64xf32>
    %358 = vector.shape_cast %357 : vector<1x4x64xf32> to vector<4x64xf32>
    %359 = vector.shape_cast %354 : vector<4x64xf32> to vector<1x4x64xf32>
    tpu.vector_store %arg5[%356, %c0_101, %c0_102], %359 {strides = array<i32>} : memref<8x4x64xf32, #tpu.memory_space<vmem>>, vector<1x4x64xf32>,
    %cst_103 = arith.constant 0.000000e+00 : f32
    %360 = vector.broadcast %cst_103 : f32 to vector<4x128xf32>
    %361 = arith.cmpf ogt, %347, %360 : vector<4x128xf32>
    %362 = arith.select %361, %344, %310 : vector<4x128xi1>, vector<4x128xf32>
    %cst_104 = arith.constant 0.000000e+00 : f32
    %363 = vector.broadcast %cst_104 : f32 to vector<4x128xf32>
    %364 = arith.cmpf ogt, %347, %363 : vector<4x128xf32>
    %365 = arith.select %364, %342, %313 : vector<4x128xi1>, vector<4x128xf32>
    %c7_i32_105 = arith.constant 7 : i32
    %366 = arith.index_cast %c7_i32_105 : i32 to index
    %c0_106 = arith.constant 0 : index
    %c0_107 = arith.constant 0 : index
    %367 = vector.load %arg1[%366, %c0_106, %c0_107] : memref<8x4x512xf32, #tpu.memory_space<vmem>>, vector<1x4x512xf32>
    %368 = vector.shape_cast %367 : vector<1x4x512xf32> to vector<4x512xf32>
    %369 = arith.truncf %362 : vector<4x128xf32> to vector<4x128xbf16>
    %cst_108 = arith.constant dense<0.000000e+00> : vector<4x512xf32>
    %370 = tpu.matmul %369, %0, %cst_108 {dimension_numbers = #tpu.dot_dimension_numbers<[1], [0], [0], [1], [0, 0, 1, 1], [], []>} : vector<4x128xbf16>, vector<128x512xbf16>, vector<4x512xf32> -> vector<4x512xf32>
    %371 = arith.addf %368, %370 : vector<4x512xf32>
    %372 = vector.extract_strided_slice %371 {offsets = [0, 0], sizes = [4, 128], strides = [1, 1]} : vector<4x512xf32> to vector<4x128xf32>
    %373 = arith.negf %372 : vector<4x128xf32>
    %374 = math.exp %373 : vector<4x128xf32>
    %cst_109 = arith.constant 1.000000e+00 : f32
    %375 = vector.broadcast %cst_109 : f32 to vector<4x128xf32>
    %376 = arith.addf %375, %374 : vector<4x128xf32>
    %377 = arith.divf %375, %376 : vector<4x128xf32>
    %378 = vector.extract_strided_slice %371 {offsets = [0, 128], sizes = [4, 128], strides = [1, 1]} : vector<4x512xf32> to vector<4x128xf32>
    %379 = arith.negf %378 : vector<4x128xf32>
    %380 = math.exp %379 : vector<4x128xf32>
    %cst_110 = arith.constant 1.000000e+00 : f32
    %381 = vector.broadcast %cst_110 : f32 to vector<4x128xf32>
    %382 = arith.addf %381, %380 : vector<4x128xf32>
    %383 = arith.divf %381, %382 : vector<4x128xf32>
    %384 = vector.extract_strided_slice %371 {offsets = [0, 256], sizes = [4, 128], strides = [1, 1]} : vector<4x512xf32> to vector<4x128xf32>
    %385 = math.tanh %384 : vector<4x128xf32>
    %386 = vector.extract_strided_slice %371 {offsets = [0, 384], sizes = [4, 128], strides = [1, 1]} : vector<4x512xf32> to vector<4x128xf32>
    %387 = arith.negf %386 : vector<4x128xf32>
    %388 = math.exp %387 : vector<4x128xf32>
    %cst_111 = arith.constant 1.000000e+00 : f32
    %389 = vector.broadcast %cst_111 : f32 to vector<4x128xf32>
    %390 = arith.addf %389, %388 : vector<4x128xf32>
    %391 = arith.divf %389, %390 : vector<4x128xf32>
    %392 = arith.mulf %383, %365 : vector<4x128xf32>
    %393 = arith.mulf %377, %385 : vector<4x128xf32>
    %394 = arith.addf %392, %393 : vector<4x128xf32>
    %395 = math.tanh %394 : vector<4x128xf32>
    %396 = arith.mulf %391, %395 : vector<4x128xf32>
    %397 = arith.index_cast %c7_i32_105 : i32 to index
    %c0_112 = arith.constant 0 : index
    %c0_113 = arith.constant 0 : index
    %398 = vector.load %arg2[%397, %c0_112, %c0_113] : memref<8x4x128xf32, #tpu.memory_space<vmem>>, vector<1x4x128xf32>
    %399 = vector.shape_cast %398 : vector<1x4x128xf32> to vector<4x128xf32>
    %400 = arith.mulf %396, %399 : vector<4x128xf32>
    %401 = vector.extract_strided_slice %400 {offsets = [0, 0], sizes = [4, 64], strides = [1, 1]} : vector<4x128xf32> to vector<4x64xf32>
    %402 = arith.index_cast %c7_i32_105 : i32 to index
    %c0_114 = arith.constant 0 : index
    %c0_115 = arith.constant 0 : index
    %403 = vector.load %arg4[%402, %c0_114, %c0_115] : memref<8x4x64xf32, #tpu.memory_space<vmem>>, vector<1x4x64xf32>
    %404 = vector.shape_cast %403 : vector<1x4x64xf32> to vector<4x64xf32>
    %405 = vector.shape_cast %401 : vector<4x64xf32> to vector<1x4x64xf32>
    tpu.vector_store %arg4[%402, %c0_114, %c0_115], %405 {strides = array<i32>} : memref<8x4x64xf32, #tpu.memory_space<vmem>>, vector<1x4x64xf32>,
    %406 = vector.extract_strided_slice %400 {offsets = [0, 64], sizes = [4, 64], strides = [1, 1]} : vector<4x128xf32> to vector<4x64xf32>
    %c7_i32_116 = arith.constant 7 : i32
    %407 = arith.subi %c7_i32_116, %c7_i32_105 : i32
    %408 = arith.index_cast %407 : i32 to index
    %c0_117 = arith.constant 0 : index
    %c0_118 = arith.constant 0 : index
    %409 = vector.load %arg5[%408, %c0_117, %c0_118] : memref<8x4x64xf32, #tpu.memory_space<vmem>>, vector<1x4x64xf32>
    %410 = vector.shape_cast %409 : vector<1x4x64xf32> to vector<4x64xf32>
    %411 = vector.shape_cast %406 : vector<4x64xf32> to vector<1x4x64xf32>
    tpu.vector_store %arg5[%408, %c0_117, %c0_118], %411 {strides = array<i32>} : memref<8x4x64xf32, #tpu.memory_space<vmem>>, vector<1x4x64xf32>,
    %cst_119 = arith.constant 0.000000e+00 : f32
    %412 = vector.broadcast %cst_119 : f32 to vector<4x128xf32>
    %413 = arith.cmpf ogt, %399, %412 : vector<4x128xf32>
    %414 = arith.select %413, %396, %362 : vector<4x128xi1>, vector<4x128xf32>
    %cst_120 = arith.constant 0.000000e+00 : f32
    %415 = vector.broadcast %cst_120 : f32 to vector<4x128xf32>
    %416 = arith.cmpf ogt, %399, %415 : vector<4x128xf32>
    %417 = arith.select %416, %394, %365 : vector<4x128xi1>, vector<4x128xf32>
    %c8_i32 = arith.constant 8 : i32
    %c0_121 = arith.constant 0 : index
    %c0_122 = arith.constant 0 : index
    %418 = vector.load %arg6[%c0_121, %c0_122] : memref<4x128xf32, #tpu.memory_space<vmem>>, vector<4x128xf32>
    tpu.vector_store %arg6[%c0_121, %c0_122], %414 {strides = array<i32>} : memref<4x128xf32, #tpu.memory_space<vmem>>, vector<4x128xf32>,
    return
  }
  func.func @transform_0(%arg0: i32) -> (i32, i32, i32) {
    %c0_i32 = arith.constant 0 : i32
    %c0_i32_0 = arith.constant 0 : i32
    %c0_i32_1 = arith.constant 0 : i32
    %c0_i32_2 = arith.constant 0 : i32
    return %c0_i32, %c0_i32_0, %c0_i32_1 : i32, i32, i32
  }
  func.func @transform_1(%arg0: i32) -> (i32, i32, i32) {
    %c0_i32 = arith.constant 0 : i32
    %c0_i32_0 = arith.constant 0 : i32
    %c0_i32_1 = arith.constant 0 : i32
    %c0_i32_2 = arith.constant 0 : i32
    return %c0_i32, %c0_i32_0, %c0_i32_1 : i32, i32, i32
  }
  func.func @transform_2(%arg0: i32) -> (i32, i32) {
    %c0_i32 = arith.constant 0 : i32
    %c0_i32_0 = arith.constant 0 : i32
    %c0_i32_1 = arith.constant 0 : i32
    return %c0_i32, %c0_i32_0 : i32, i32
  }
  func.func @transform_3(%arg0: i32) -> (i32, i32, i32) {
    %c0_i32 = arith.constant 0 : i32
    %c0_i32_0 = arith.constant 0 : i32
    %c0_i32_1 = arith.constant 0 : i32
    %c0_i32_2 = arith.constant 0 : i32
    return %c0_i32, %c0_i32_0, %c0_i32_1 : i32, i32, i32
  }
  func.func @transform_4(%arg0: i32) -> (i32, i32, i32) {
    %c0_i32 = arith.constant 0 : i32
    %c0_i32_0 = arith.constant 0 : i32
    %c0_i32_1 = arith.constant 0 : i32
    %c0_i32_2 = arith.constant 0 : i32
    return %c0_i32, %c0_i32_0, %c0_i32_1 : i32, i32, i32
  }
  func.func @transform_5(%arg0: i32) -> (i32, i32) {
    %c0_i32 = arith.constant 0 : i32
    %c0_i32_0 = arith.constant 0 : i32
    %c0_i32_1 = arith.constant 0 : i32
    return %c0_i32, %c0_i32_0 : i32, i32
  }
}

module attributes {stable_mosaic.version = 11 : i64} {
  func.func @_bilstm_layer_kernel(%arg0: i32, %arg1: memref<8x4x512xf32, #tpu.memory_space<vmem>>, %arg2: memref<8x4x128xf32, #tpu.memory_space<vmem>>, %arg3: memref<128x512xbf16, #tpu.memory_space<vmem>>, %arg4: memref<8x4x64xf32, #tpu.memory_space<vmem>>, %arg5: memref<8x4x64xf32, #tpu.memory_space<vmem>>, %arg6: memref<4x128xf32, #tpu.memory_space<vmem>>) attributes {dimension_semantics = [#tpu.dimension_semantics<arbitrary>], iteration_bounds = array<i64: 1>, scalar_prefetch = 0 : i64, scratch_operands = 0 : i64, tpu.core_type = #tpu.core_type<tc>, window_params = [{pipeline_mode = #tpu.pipeline_mode<synchronous>, transform_indices = @transform_0, window_bounds = array<i64: 8, 4, 512>}, {pipeline_mode = #tpu.pipeline_mode<synchronous>, transform_indices = @transform_1, window_bounds = array<i64: 8, 4, 128>}, {pipeline_mode = #tpu.pipeline_mode<synchronous>, transform_indices = @transform_2, window_bounds = array<i64: 128, 512>}, {pipeline_mode = #tpu.pipeline_mode<synchronous>, transform_indices = @transform_3, window_bounds = array<i64: 8, 4, 64>}, {pipeline_mode = #tpu.pipeline_mode<synchronous>, transform_indices = @transform_4, window_bounds = array<i64: 8, 4, 64>}, {pipeline_mode = #tpu.pipeline_mode<synchronous>, transform_indices = @transform_5, window_bounds = array<i64: 4, 128>}]} {
    %c0 = arith.constant 0 : index
    %c0_0 = arith.constant 0 : index
    %0 = vector.load %arg3[%c0, %c0_0] : memref<128x512xbf16, #tpu.memory_space<vmem>>, vector<128x512xbf16>
    %cst = arith.constant 0.000000e+00 : f32
    %1 = vector.broadcast %cst : f32 to vector<4x128xf32>
    %c0_i32 = arith.constant 0 : i32
    %2 = arith.index_cast %c0_i32 : i32 to index
    %c0_1 = arith.constant 0 : index
    %c0_2 = arith.constant 0 : index
    %3 = vector.load %arg1[%2, %c0_1, %c0_2] : memref<8x4x512xf32, #tpu.memory_space<vmem>>, vector<1x4x512xf32>
    %4 = vector.shape_cast %3 : vector<1x4x512xf32> to vector<4x512xf32>
    %5 = arith.truncf %1 : vector<4x128xf32> to vector<4x128xbf16>
    %cst_3 = arith.constant dense<0.000000e+00> : vector<4x512xf32>
    %6 = tpu.matmul %5, %0, %cst_3 {dimension_numbers = #tpu.dot_dimension_numbers<[1], [0], [0], [1], [0, 0, 1, 1], [], []>} : vector<4x128xbf16>, vector<128x512xbf16>, vector<4x512xf32> -> vector<4x512xf32>
    %7 = arith.addf %4, %6 : vector<4x512xf32>
    %8 = vector.extract_strided_slice %7 {offsets = [0, 0], sizes = [4, 128], strides = [1, 1]} : vector<4x512xf32> to vector<4x128xf32>
    %9 = arith.negf %8 : vector<4x128xf32>
    %10 = math.exp %9 : vector<4x128xf32>
    %cst_4 = arith.constant 1.000000e+00 : f32
    %11 = vector.broadcast %cst_4 : f32 to vector<4x128xf32>
    %12 = arith.addf %11, %10 : vector<4x128xf32>
    %13 = arith.divf %11, %12 : vector<4x128xf32>
    %14 = vector.extract_strided_slice %7 {offsets = [0, 128], sizes = [4, 128], strides = [1, 1]} : vector<4x512xf32> to vector<4x128xf32>
    %15 = arith.negf %14 : vector<4x128xf32>
    %16 = math.exp %15 : vector<4x128xf32>
    %cst_5 = arith.constant 1.000000e+00 : f32
    %17 = vector.broadcast %cst_5 : f32 to vector<4x128xf32>
    %18 = arith.addf %17, %16 : vector<4x128xf32>
    %19 = arith.divf %17, %18 : vector<4x128xf32>
    %20 = vector.extract_strided_slice %7 {offsets = [0, 256], sizes = [4, 128], strides = [1, 1]} : vector<4x512xf32> to vector<4x128xf32>
    %21 = math.tanh %20 : vector<4x128xf32>
    %22 = vector.extract_strided_slice %7 {offsets = [0, 384], sizes = [4, 128], strides = [1, 1]} : vector<4x512xf32> to vector<4x128xf32>
    %23 = arith.negf %22 : vector<4x128xf32>
    %24 = math.exp %23 : vector<4x128xf32>
    %cst_6 = arith.constant 1.000000e+00 : f32
    %25 = vector.broadcast %cst_6 : f32 to vector<4x128xf32>
    %26 = arith.addf %25, %24 : vector<4x128xf32>
    %27 = arith.divf %25, %26 : vector<4x128xf32>
    %28 = arith.mulf %19, %1 : vector<4x128xf32>
    %29 = arith.mulf %13, %21 : vector<4x128xf32>
    %30 = arith.addf %28, %29 : vector<4x128xf32>
    %31 = math.tanh %30 : vector<4x128xf32>
    %32 = arith.mulf %27, %31 : vector<4x128xf32>
    %33 = arith.index_cast %c0_i32 : i32 to index
    %c0_7 = arith.constant 0 : index
    %c0_8 = arith.constant 0 : index
    %34 = vector.load %arg2[%33, %c0_7, %c0_8] : memref<8x4x128xf32, #tpu.memory_space<vmem>>, vector<1x4x128xf32>
    %35 = vector.shape_cast %34 : vector<1x4x128xf32> to vector<4x128xf32>
    %36 = arith.mulf %32, %35 : vector<4x128xf32>
    %37 = vector.extract_strided_slice %36 {offsets = [0, 0], sizes = [4, 64], strides = [1, 1]} : vector<4x128xf32> to vector<4x64xf32>
    %38 = arith.index_cast %c0_i32 : i32 to index
    %c0_9 = arith.constant 0 : index
    %c0_10 = arith.constant 0 : index
    %39 = vector.load %arg4[%38, %c0_9, %c0_10] : memref<8x4x64xf32, #tpu.memory_space<vmem>>, vector<1x4x64xf32>
    %40 = vector.shape_cast %39 : vector<1x4x64xf32> to vector<4x64xf32>
    %41 = vector.shape_cast %37 : vector<4x64xf32> to vector<1x4x64xf32>
    tpu.vector_store %arg4[%38, %c0_9, %c0_10], %41 {strides = array<i32>} : memref<8x4x64xf32, #tpu.memory_space<vmem>>, vector<1x4x64xf32>,
    %42 = vector.extract_strided_slice %36 {offsets = [0, 64], sizes = [4, 64], strides = [1, 1]} : vector<4x128xf32> to vector<4x64xf32>
    %c7_i32 = arith.constant 7 : i32
    %43 = arith.subi %c7_i32, %c0_i32 : i32
    %44 = arith.index_cast %43 : i32 to index
    %c0_11 = arith.constant 0 : index
    %c0_12 = arith.constant 0 : index
    %45 = vector.load %arg5[%44, %c0_11, %c0_12] : memref<8x4x64xf32, #tpu.memory_space<vmem>>, vector<1x4x64xf32>
    %46 = vector.shape_cast %45 : vector<1x4x64xf32> to vector<4x64xf32>
    %47 = vector.shape_cast %42 : vector<4x64xf32> to vector<1x4x64xf32>
    tpu.vector_store %arg5[%44, %c0_11, %c0_12], %47 {strides = array<i32>} : memref<8x4x64xf32, #tpu.memory_space<vmem>>, vector<1x4x64xf32>,
    %cst_13 = arith.constant 0.000000e+00 : f32
    %48 = vector.broadcast %cst_13 : f32 to vector<4x128xf32>
    %49 = arith.cmpf ogt, %35, %48 : vector<4x128xf32>
    %50 = arith.select %49, %32, %1 : vector<4x128xi1>, vector<4x128xf32>
    %cst_14 = arith.constant 0.000000e+00 : f32
    %51 = vector.broadcast %cst_14 : f32 to vector<4x128xf32>
    %52 = arith.cmpf ogt, %35, %51 : vector<4x128xf32>
    %53 = arith.select %52, %30, %1 : vector<4x128xi1>, vector<4x128xf32>
    %c1_i32 = arith.constant 1 : i32
    %54 = arith.index_cast %c1_i32 : i32 to index
    %c0_15 = arith.constant 0 : index
    %c0_16 = arith.constant 0 : index
    %55 = vector.load %arg1[%54, %c0_15, %c0_16] : memref<8x4x512xf32, #tpu.memory_space<vmem>>, vector<1x4x512xf32>
    %56 = vector.shape_cast %55 : vector<1x4x512xf32> to vector<4x512xf32>
    %57 = arith.truncf %50 : vector<4x128xf32> to vector<4x128xbf16>
    %cst_17 = arith.constant dense<0.000000e+00> : vector<4x512xf32>
    %58 = tpu.matmul %57, %0, %cst_17 {dimension_numbers = #tpu.dot_dimension_numbers<[1], [0], [0], [1], [0, 0, 1, 1], [], []>} : vector<4x128xbf16>, vector<128x512xbf16>, vector<4x512xf32> -> vector<4x512xf32>
    %59 = arith.addf %56, %58 : vector<4x512xf32>
    %60 = vector.extract_strided_slice %59 {offsets = [0, 0], sizes = [4, 128], strides = [1, 1]} : vector<4x512xf32> to vector<4x128xf32>
    %61 = arith.negf %60 : vector<4x128xf32>
    %62 = math.exp %61 : vector<4x128xf32>
    %cst_18 = arith.constant 1.000000e+00 : f32
    %63 = vector.broadcast %cst_18 : f32 to vector<4x128xf32>
    %64 = arith.addf %63, %62 : vector<4x128xf32>
    %65 = arith.divf %63, %64 : vector<4x128xf32>
    %66 = vector.extract_strided_slice %59 {offsets = [0, 128], sizes = [4, 128], strides = [1, 1]} : vector<4x512xf32> to vector<4x128xf32>
    %67 = arith.negf %66 : vector<4x128xf32>
    %68 = math.exp %67 : vector<4x128xf32>
    %cst_19 = arith.constant 1.000000e+00 : f32
    %69 = vector.broadcast %cst_19 : f32 to vector<4x128xf32>
    %70 = arith.addf %69, %68 : vector<4x128xf32>
    %71 = arith.divf %69, %70 : vector<4x128xf32>
    %72 = vector.extract_strided_slice %59 {offsets = [0, 256], sizes = [4, 128], strides = [1, 1]} : vector<4x512xf32> to vector<4x128xf32>
    %73 = math.tanh %72 : vector<4x128xf32>
    %74 = vector.extract_strided_slice %59 {offsets = [0, 384], sizes = [4, 128], strides = [1, 1]} : vector<4x512xf32> to vector<4x128xf32>
    %75 = arith.negf %74 : vector<4x128xf32>
    %76 = math.exp %75 : vector<4x128xf32>
    %cst_20 = arith.constant 1.000000e+00 : f32
    %77 = vector.broadcast %cst_20 : f32 to vector<4x128xf32>
    %78 = arith.addf %77, %76 : vector<4x128xf32>
    %79 = arith.divf %77, %78 : vector<4x128xf32>
    %80 = arith.mulf %71, %53 : vector<4x128xf32>
    %81 = arith.mulf %65, %73 : vector<4x128xf32>
    %82 = arith.addf %80, %81 : vector<4x128xf32>
    %83 = math.tanh %82 : vector<4x128xf32>
    %84 = arith.mulf %79, %83 : vector<4x128xf32>
    %85 = arith.index_cast %c1_i32 : i32 to index
    %c0_21 = arith.constant 0 : index
    %c0_22 = arith.constant 0 : index
    %86 = vector.load %arg2[%85, %c0_21, %c0_22] : memref<8x4x128xf32, #tpu.memory_space<vmem>>, vector<1x4x128xf32>
    %87 = vector.shape_cast %86 : vector<1x4x128xf32> to vector<4x128xf32>
    %88 = arith.mulf %84, %87 : vector<4x128xf32>
    %89 = vector.extract_strided_slice %88 {offsets = [0, 0], sizes = [4, 64], strides = [1, 1]} : vector<4x128xf32> to vector<4x64xf32>
    %90 = arith.index_cast %c1_i32 : i32 to index
    %c0_23 = arith.constant 0 : index
    %c0_24 = arith.constant 0 : index
    %91 = vector.load %arg4[%90, %c0_23, %c0_24] : memref<8x4x64xf32, #tpu.memory_space<vmem>>, vector<1x4x64xf32>
    %92 = vector.shape_cast %91 : vector<1x4x64xf32> to vector<4x64xf32>
    %93 = vector.shape_cast %89 : vector<4x64xf32> to vector<1x4x64xf32>
    tpu.vector_store %arg4[%90, %c0_23, %c0_24], %93 {strides = array<i32>} : memref<8x4x64xf32, #tpu.memory_space<vmem>>, vector<1x4x64xf32>,
    %94 = vector.extract_strided_slice %88 {offsets = [0, 64], sizes = [4, 64], strides = [1, 1]} : vector<4x128xf32> to vector<4x64xf32>
    %c7_i32_25 = arith.constant 7 : i32
    %95 = arith.subi %c7_i32_25, %c1_i32 : i32
    %96 = arith.index_cast %95 : i32 to index
    %c0_26 = arith.constant 0 : index
    %c0_27 = arith.constant 0 : index
    %97 = vector.load %arg5[%96, %c0_26, %c0_27] : memref<8x4x64xf32, #tpu.memory_space<vmem>>, vector<1x4x64xf32>
    %98 = vector.shape_cast %97 : vector<1x4x64xf32> to vector<4x64xf32>
    %99 = vector.shape_cast %94 : vector<4x64xf32> to vector<1x4x64xf32>
    tpu.vector_store %arg5[%96, %c0_26, %c0_27], %99 {strides = array<i32>} : memref<8x4x64xf32, #tpu.memory_space<vmem>>, vector<1x4x64xf32>,
    %cst_28 = arith.constant 0.000000e+00 : f32
    %100 = vector.broadcast %cst_28 : f32 to vector<4x128xf32>
    %101 = arith.cmpf ogt, %87, %100 : vector<4x128xf32>
    %102 = arith.select %101, %84, %50 : vector<4x128xi1>, vector<4x128xf32>
    %cst_29 = arith.constant 0.000000e+00 : f32
    %103 = vector.broadcast %cst_29 : f32 to vector<4x128xf32>
    %104 = arith.cmpf ogt, %87, %103 : vector<4x128xf32>
    %105 = arith.select %104, %82, %53 : vector<4x128xi1>, vector<4x128xf32>
    %c2_i32 = arith.constant 2 : i32
    %106 = arith.index_cast %c2_i32 : i32 to index
    %c0_30 = arith.constant 0 : index
    %c0_31 = arith.constant 0 : index
    %107 = vector.load %arg1[%106, %c0_30, %c0_31] : memref<8x4x512xf32, #tpu.memory_space<vmem>>, vector<1x4x512xf32>
    %108 = vector.shape_cast %107 : vector<1x4x512xf32> to vector<4x512xf32>
    %109 = arith.truncf %102 : vector<4x128xf32> to vector<4x128xbf16>
    %cst_32 = arith.constant dense<0.000000e+00> : vector<4x512xf32>
    %110 = tpu.matmul %109, %0, %cst_32 {dimension_numbers = #tpu.dot_dimension_numbers<[1], [0], [0], [1], [0, 0, 1, 1], [], []>} : vector<4x128xbf16>, vector<128x512xbf16>, vector<4x512xf32> -> vector<4x512xf32>
    %111 = arith.addf %108, %110 : vector<4x512xf32>
    %112 = vector.extract_strided_slice %111 {offsets = [0, 0], sizes = [4, 128], strides = [1, 1]} : vector<4x512xf32> to vector<4x128xf32>
    %113 = arith.negf %112 : vector<4x128xf32>
    %114 = math.exp %113 : vector<4x128xf32>
    %cst_33 = arith.constant 1.000000e+00 : f32
    %115 = vector.broadcast %cst_33 : f32 to vector<4x128xf32>
    %116 = arith.addf %115, %114 : vector<4x128xf32>
    %117 = arith.divf %115, %116 : vector<4x128xf32>
    %118 = vector.extract_strided_slice %111 {offsets = [0, 128], sizes = [4, 128], strides = [1, 1]} : vector<4x512xf32> to vector<4x128xf32>
    %119 = arith.negf %118 : vector<4x128xf32>
    %120 = math.exp %119 : vector<4x128xf32>
    %cst_34 = arith.constant 1.000000e+00 : f32
    %121 = vector.broadcast %cst_34 : f32 to vector<4x128xf32>
    %122 = arith.addf %121, %120 : vector<4x128xf32>
    %123 = arith.divf %121, %122 : vector<4x128xf32>
    %124 = vector.extract_strided_slice %111 {offsets = [0, 256], sizes = [4, 128], strides = [1, 1]} : vector<4x512xf32> to vector<4x128xf32>
    %125 = math.tanh %124 : vector<4x128xf32>
    %126 = vector.extract_strided_slice %111 {offsets = [0, 384], sizes = [4, 128], strides = [1, 1]} : vector<4x512xf32> to vector<4x128xf32>
    %127 = arith.negf %126 : vector<4x128xf32>
    %128 = math.exp %127 : vector<4x128xf32>
    %cst_35 = arith.constant 1.000000e+00 : f32
    %129 = vector.broadcast %cst_35 : f32 to vector<4x128xf32>
    %130 = arith.addf %129, %128 : vector<4x128xf32>
    %131 = arith.divf %129, %130 : vector<4x128xf32>
    %132 = arith.mulf %123, %105 : vector<4x128xf32>
    %133 = arith.mulf %117, %125 : vector<4x128xf32>
    %134 = arith.addf %132, %133 : vector<4x128xf32>
    %135 = math.tanh %134 : vector<4x128xf32>
    %136 = arith.mulf %131, %135 : vector<4x128xf32>
    %137 = arith.index_cast %c2_i32 : i32 to index
    %c0_36 = arith.constant 0 : index
    %c0_37 = arith.constant 0 : index
    %138 = vector.load %arg2[%137, %c0_36, %c0_37] : memref<8x4x128xf32, #tpu.memory_space<vmem>>, vector<1x4x128xf32>
    %139 = vector.shape_cast %138 : vector<1x4x128xf32> to vector<4x128xf32>
    %140 = arith.mulf %136, %139 : vector<4x128xf32>
    %141 = vector.extract_strided_slice %140 {offsets = [0, 0], sizes = [4, 64], strides = [1, 1]} : vector<4x128xf32> to vector<4x64xf32>
    %142 = arith.index_cast %c2_i32 : i32 to index
    %c0_38 = arith.constant 0 : index
    %c0_39 = arith.constant 0 : index
    %143 = vector.load %arg4[%142, %c0_38, %c0_39] : memref<8x4x64xf32, #tpu.memory_space<vmem>>, vector<1x4x64xf32>
    %144 = vector.shape_cast %143 : vector<1x4x64xf32> to vector<4x64xf32>
    %145 = vector.shape_cast %141 : vector<4x64xf32> to vector<1x4x64xf32>
    tpu.vector_store %arg4[%142, %c0_38, %c0_39], %145 {strides = array<i32>} : memref<8x4x64xf32, #tpu.memory_space<vmem>>, vector<1x4x64xf32>,
    %146 = vector.extract_strided_slice %140 {offsets = [0, 64], sizes = [4, 64], strides = [1, 1]} : vector<4x128xf32> to vector<4x64xf32>
    %c7_i32_40 = arith.constant 7 : i32
    %147 = arith.subi %c7_i32_40, %c2_i32 : i32
    %148 = arith.index_cast %147 : i32 to index
    %c0_41 = arith.constant 0 : index
    %c0_42 = arith.constant 0 : index
    %149 = vector.load %arg5[%148, %c0_41, %c0_42] : memref<8x4x64xf32, #tpu.memory_space<vmem>>, vector<1x4x64xf32>
    %150 = vector.shape_cast %149 : vector<1x4x64xf32> to vector<4x64xf32>
    %151 = vector.shape_cast %146 : vector<4x64xf32> to vector<1x4x64xf32>
    tpu.vector_store %arg5[%148, %c0_41, %c0_42], %151 {strides = array<i32>} : memref<8x4x64xf32, #tpu.memory_space<vmem>>, vector<1x4x64xf32>,
    %cst_43 = arith.constant 0.000000e+00 : f32
    %152 = vector.broadcast %cst_43 : f32 to vector<4x128xf32>
    %153 = arith.cmpf ogt, %139, %152 : vector<4x128xf32>
    %154 = arith.select %153, %136, %102 : vector<4x128xi1>, vector<4x128xf32>
    %cst_44 = arith.constant 0.000000e+00 : f32
    %155 = vector.broadcast %cst_44 : f32 to vector<4x128xf32>
    %156 = arith.cmpf ogt, %139, %155 : vector<4x128xf32>
    %157 = arith.select %156, %134, %105 : vector<4x128xi1>, vector<4x128xf32>
    %c3_i32 = arith.constant 3 : i32
    %158 = arith.index_cast %c3_i32 : i32 to index
    %c0_45 = arith.constant 0 : index
    %c0_46 = arith.constant 0 : index
    %159 = vector.load %arg1[%158, %c0_45, %c0_46] : memref<8x4x512xf32, #tpu.memory_space<vmem>>, vector<1x4x512xf32>
    %160 = vector.shape_cast %159 : vector<1x4x512xf32> to vector<4x512xf32>
    %161 = arith.truncf %154 : vector<4x128xf32> to vector<4x128xbf16>
    %cst_47 = arith.constant dense<0.000000e+00> : vector<4x512xf32>
    %162 = tpu.matmul %161, %0, %cst_47 {dimension_numbers = #tpu.dot_dimension_numbers<[1], [0], [0], [1], [0, 0, 1, 1], [], []>} : vector<4x128xbf16>, vector<128x512xbf16>, vector<4x512xf32> -> vector<4x512xf32>
    %163 = arith.addf %160, %162 : vector<4x512xf32>
    %164 = vector.extract_strided_slice %163 {offsets = [0, 0], sizes = [4, 128], strides = [1, 1]} : vector<4x512xf32> to vector<4x128xf32>
    %165 = arith.negf %164 : vector<4x128xf32>
    %166 = math.exp %165 : vector<4x128xf32>
    %cst_48 = arith.constant 1.000000e+00 : f32
    %167 = vector.broadcast %cst_48 : f32 to vector<4x128xf32>
    %168 = arith.addf %167, %166 : vector<4x128xf32>
    %169 = arith.divf %167, %168 : vector<4x128xf32>
    %170 = vector.extract_strided_slice %163 {offsets = [0, 128], sizes = [4, 128], strides = [1, 1]} : vector<4x512xf32> to vector<4x128xf32>
    %171 = arith.negf %170 : vector<4x128xf32>
    %172 = math.exp %171 : vector<4x128xf32>
    %cst_49 = arith.constant 1.000000e+00 : f32
    %173 = vector.broadcast %cst_49 : f32 to vector<4x128xf32>
    %174 = arith.addf %173, %172 : vector<4x128xf32>
    %175 = arith.divf %173, %174 : vector<4x128xf32>
    %176 = vector.extract_strided_slice %163 {offsets = [0, 256], sizes = [4, 128], strides = [1, 1]} : vector<4x512xf32> to vector<4x128xf32>
    %177 = math.tanh %176 : vector<4x128xf32>
    %178 = vector.extract_strided_slice %163 {offsets = [0, 384], sizes = [4, 128], strides = [1, 1]} : vector<4x512xf32> to vector<4x128xf32>
    %179 = arith.negf %178 : vector<4x128xf32>
    %180 = math.exp %179 : vector<4x128xf32>
    %cst_50 = arith.constant 1.000000e+00 : f32
    %181 = vector.broadcast %cst_50 : f32 to vector<4x128xf32>
    %182 = arith.addf %181, %180 : vector<4x128xf32>
    %183 = arith.divf %181, %182 : vector<4x128xf32>
    %184 = arith.mulf %175, %157 : vector<4x128xf32>
    %185 = arith.mulf %169, %177 : vector<4x128xf32>
    %186 = arith.addf %184, %185 : vector<4x128xf32>
    %187 = math.tanh %186 : vector<4x128xf32>
    %188 = arith.mulf %183, %187 : vector<4x128xf32>
    %189 = arith.index_cast %c3_i32 : i32 to index
    %c0_51 = arith.constant 0 : index
    %c0_52 = arith.constant 0 : index
    %190 = vector.load %arg2[%189, %c0_51, %c0_52] : memref<8x4x128xf32, #tpu.memory_space<vmem>>, vector<1x4x128xf32>
    %191 = vector.shape_cast %190 : vector<1x4x128xf32> to vector<4x128xf32>
    %192 = arith.mulf %188, %191 : vector<4x128xf32>
    %193 = vector.extract_strided_slice %192 {offsets = [0, 0], sizes = [4, 64], strides = [1, 1]} : vector<4x128xf32> to vector<4x64xf32>
    %194 = arith.index_cast %c3_i32 : i32 to index
    %c0_53 = arith.constant 0 : index
    %c0_54 = arith.constant 0 : index
    %195 = vector.load %arg4[%194, %c0_53, %c0_54] : memref<8x4x64xf32, #tpu.memory_space<vmem>>, vector<1x4x64xf32>
    %196 = vector.shape_cast %195 : vector<1x4x64xf32> to vector<4x64xf32>
    %197 = vector.shape_cast %193 : vector<4x64xf32> to vector<1x4x64xf32>
    tpu.vector_store %arg4[%194, %c0_53, %c0_54], %197 {strides = array<i32>} : memref<8x4x64xf32, #tpu.memory_space<vmem>>, vector<1x4x64xf32>,
    %198 = vector.extract_strided_slice %192 {offsets = [0, 64], sizes = [4, 64], strides = [1, 1]} : vector<4x128xf32> to vector<4x64xf32>
    %c7_i32_55 = arith.constant 7 : i32
    %199 = arith.subi %c7_i32_55, %c3_i32 : i32
    %200 = arith.index_cast %199 : i32 to index
    %c0_56 = arith.constant 0 : index
    %c0_57 = arith.constant 0 : index
    %201 = vector.load %arg5[%200, %c0_56, %c0_57] : memref<8x4x64xf32, #tpu.memory_space<vmem>>, vector<1x4x64xf32>
    %202 = vector.shape_cast %201 : vector<1x4x64xf32> to vector<4x64xf32>
    %203 = vector.shape_cast %198 : vector<4x64xf32> to vector<1x4x64xf32>
    tpu.vector_store %arg5[%200, %c0_56, %c0_57], %203 {strides = array<i32>} : memref<8x4x64xf32, #tpu.memory_space<vmem>>, vector<1x4x64xf32>,
    %cst_58 = arith.constant 0.000000e+00 : f32
    %204 = vector.broadcast %cst_58 : f32 to vector<4x128xf32>
    %205 = arith.cmpf ogt, %191, %204 : vector<4x128xf32>
    %206 = arith.select %205, %188, %154 : vector<4x128xi1>, vector<4x128xf32>
    %cst_59 = arith.constant 0.000000e+00 : f32
    %207 = vector.broadcast %cst_59 : f32 to vector<4x128xf32>
    %208 = arith.cmpf ogt, %191, %207 : vector<4x128xf32>
    %209 = arith.select %208, %186, %157 : vector<4x128xi1>, vector<4x128xf32>
    %c4_i32 = arith.constant 4 : i32
    %210 = arith.index_cast %c4_i32 : i32 to index
    %c0_60 = arith.constant 0 : index
    %c0_61 = arith.constant 0 : index
    %211 = vector.load %arg1[%210, %c0_60, %c0_61] : memref<8x4x512xf32, #tpu.memory_space<vmem>>, vector<1x4x512xf32>
    %212 = vector.shape_cast %211 : vector<1x4x512xf32> to vector<4x512xf32>
    %213 = arith.truncf %206 : vector<4x128xf32> to vector<4x128xbf16>
    %cst_62 = arith.constant dense<0.000000e+00> : vector<4x512xf32>
    %214 = tpu.matmul %213, %0, %cst_62 {dimension_numbers = #tpu.dot_dimension_numbers<[1], [0], [0], [1], [0, 0, 1, 1], [], []>} : vector<4x128xbf16>, vector<128x512xbf16>, vector<4x512xf32> -> vector<4x512xf32>
    %215 = arith.addf %212, %214 : vector<4x512xf32>
    %216 = vector.extract_strided_slice %215 {offsets = [0, 0], sizes = [4, 128], strides = [1, 1]} : vector<4x512xf32> to vector<4x128xf32>
    %217 = arith.negf %216 : vector<4x128xf32>
    %218 = math.exp %217 : vector<4x128xf32>
    %cst_63 = arith.constant 1.000000e+00 : f32
    %219 = vector.broadcast %cst_63 : f32 to vector<4x128xf32>
    %220 = arith.addf %219, %218 : vector<4x128xf32>
    %221 = arith.divf %219, %220 : vector<4x128xf32>
    %222 = vector.extract_strided_slice %215 {offsets = [0, 128], sizes = [4, 128], strides = [1, 1]} : vector<4x512xf32> to vector<4x128xf32>
    %223 = arith.negf %222 : vector<4x128xf32>
    %224 = math.exp %223 : vector<4x128xf32>
    %cst_64 = arith.constant 1.000000e+00 : f32
    %225 = vector.broadcast %cst_64 : f32 to vector<4x128xf32>
    %226 = arith.addf %225, %224 : vector<4x128xf32>
    %227 = arith.divf %225, %226 : vector<4x128xf32>
    %228 = vector.extract_strided_slice %215 {offsets = [0, 256], sizes = [4, 128], strides = [1, 1]} : vector<4x512xf32> to vector<4x128xf32>
    %229 = math.tanh %228 : vector<4x128xf32>
    %230 = vector.extract_strided_slice %215 {offsets = [0, 384], sizes = [4, 128], strides = [1, 1]} : vector<4x512xf32> to vector<4x128xf32>
    %231 = arith.negf %230 : vector<4x128xf32>
    %232 = math.exp %231 : vector<4x128xf32>
    %cst_65 = arith.constant 1.000000e+00 : f32
    %233 = vector.broadcast %cst_65 : f32 to vector<4x128xf32>
    %234 = arith.addf %233, %232 : vector<4x128xf32>
    %235 = arith.divf %233, %234 : vector<4x128xf32>
    %236 = arith.mulf %227, %209 : vector<4x128xf32>
    %237 = arith.mulf %221, %229 : vector<4x128xf32>
    %238 = arith.addf %236, %237 : vector<4x128xf32>
    %239 = math.tanh %238 : vector<4x128xf32>
    %240 = arith.mulf %235, %239 : vector<4x128xf32>
    %241 = arith.index_cast %c4_i32 : i32 to index
    %c0_66 = arith.constant 0 : index
    %c0_67 = arith.constant 0 : index
    %242 = vector.load %arg2[%241, %c0_66, %c0_67] : memref<8x4x128xf32, #tpu.memory_space<vmem>>, vector<1x4x128xf32>
    %243 = vector.shape_cast %242 : vector<1x4x128xf32> to vector<4x128xf32>
    %244 = arith.mulf %240, %243 : vector<4x128xf32>
    %245 = vector.extract_strided_slice %244 {offsets = [0, 0], sizes = [4, 64], strides = [1, 1]} : vector<4x128xf32> to vector<4x64xf32>
    %246 = arith.index_cast %c4_i32 : i32 to index
    %c0_68 = arith.constant 0 : index
    %c0_69 = arith.constant 0 : index
    %247 = vector.load %arg4[%246, %c0_68, %c0_69] : memref<8x4x64xf32, #tpu.memory_space<vmem>>, vector<1x4x64xf32>
    %248 = vector.shape_cast %247 : vector<1x4x64xf32> to vector<4x64xf32>
    %249 = vector.shape_cast %245 : vector<4x64xf32> to vector<1x4x64xf32>
    tpu.vector_store %arg4[%246, %c0_68, %c0_69], %249 {strides = array<i32>} : memref<8x4x64xf32, #tpu.memory_space<vmem>>, vector<1x4x64xf32>,
    %250 = vector.extract_strided_slice %244 {offsets = [0, 64], sizes = [4, 64], strides = [1, 1]} : vector<4x128xf32> to vector<4x64xf32>
    %c7_i32_70 = arith.constant 7 : i32
    %251 = arith.subi %c7_i32_70, %c4_i32 : i32
    %252 = arith.index_cast %251 : i32 to index
    %c0_71 = arith.constant 0 : index
    %c0_72 = arith.constant 0 : index
    %253 = vector.load %arg5[%252, %c0_71, %c0_72] : memref<8x4x64xf32, #tpu.memory_space<vmem>>, vector<1x4x64xf32>
    %254 = vector.shape_cast %253 : vector<1x4x64xf32> to vector<4x64xf32>
    %255 = vector.shape_cast %250 : vector<4x64xf32> to vector<1x4x64xf32>
    tpu.vector_store %arg5[%252, %c0_71, %c0_72], %255 {strides = array<i32>} : memref<8x4x64xf32, #tpu.memory_space<vmem>>, vector<1x4x64xf32>,
    %cst_73 = arith.constant 0.000000e+00 : f32
    %256 = vector.broadcast %cst_73 : f32 to vector<4x128xf32>
    %257 = arith.cmpf ogt, %243, %256 : vector<4x128xf32>
    %258 = arith.select %257, %240, %206 : vector<4x128xi1>, vector<4x128xf32>
    %cst_74 = arith.constant 0.000000e+00 : f32
    %259 = vector.broadcast %cst_74 : f32 to vector<4x128xf32>
    %260 = arith.cmpf ogt, %243, %259 : vector<4x128xf32>
    %261 = arith.select %260, %238, %209 : vector<4x128xi1>, vector<4x128xf32>
    %c5_i32 = arith.constant 5 : i32
    %262 = arith.index_cast %c5_i32 : i32 to index
    %c0_75 = arith.constant 0 : index
    %c0_76 = arith.constant 0 : index
    %263 = vector.load %arg1[%262, %c0_75, %c0_76] : memref<8x4x512xf32, #tpu.memory_space<vmem>>, vector<1x4x512xf32>
    %264 = vector.shape_cast %263 : vector<1x4x512xf32> to vector<4x512xf32>
    %265 = arith.truncf %258 : vector<4x128xf32> to vector<4x128xbf16>
    %cst_77 = arith.constant dense<0.000000e+00> : vector<4x512xf32>
    %266 = tpu.matmul %265, %0, %cst_77 {dimension_numbers = #tpu.dot_dimension_numbers<[1], [0], [0], [1], [0, 0, 1, 1], [], []>} : vector<4x128xbf16>, vector<128x512xbf16>, vector<4x512xf32> -> vector<4x512xf32>
    %267 = arith.addf %264, %266 : vector<4x512xf32>
    %268 = vector.extract_strided_slice %267 {offsets = [0, 0], sizes = [4, 128], strides = [1, 1]} : vector<4x512xf32> to vector<4x128xf32>
    %269 = arith.negf %268 : vector<4x128xf32>
    %270 = math.exp %269 : vector<4x128xf32>
    %cst_78 = arith.constant 1.000000e+00 : f32
    %271 = vector.broadcast %cst_78 : f32 to vector<4x128xf32>
    %272 = arith.addf %271, %270 : vector<4x128xf32>
    %273 = arith.divf %271, %272 : vector<4x128xf32>
    %274 = vector.extract_strided_slice %267 {offsets = [0, 128], sizes = [4, 128], strides = [1, 1]} : vector<4x512xf32> to vector<4x128xf32>
    %275 = arith.negf %274 : vector<4x128xf32>
    %276 = math.exp %275 : vector<4x128xf32>
    %cst_79 = arith.constant 1.000000e+00 : f32
    %277 = vector.broadcast %cst_79 : f32 to vector<4x128xf32>
    %278 = arith.addf %277, %276 : vector<4x128xf32>
    %279 = arith.divf %277, %278 : vector<4x128xf32>
    %280 = vector.extract_strided_slice %267 {offsets = [0, 256], sizes = [4, 128], strides = [1, 1]} : vector<4x512xf32> to vector<4x128xf32>
    %281 = math.tanh %280 : vector<4x128xf32>
    %282 = vector.extract_strided_slice %267 {offsets = [0, 384], sizes = [4, 128], strides = [1, 1]} : vector<4x512xf32> to vector<4x128xf32>
    %283 = arith.negf %282 : vector<4x128xf32>
    %284 = math.exp %283 : vector<4x128xf32>
    %cst_80 = arith.constant 1.000000e+00 : f32
    %285 = vector.broadcast %cst_80 : f32 to vector<4x128xf32>
    %286 = arith.addf %285, %284 : vector<4x128xf32>
    %287 = arith.divf %285, %286 : vector<4x128xf32>
    %288 = arith.mulf %279, %261 : vector<4x128xf32>
    %289 = arith.mulf %273, %281 : vector<4x128xf32>
    %290 = arith.addf %288, %289 : vector<4x128xf32>
    %291 = math.tanh %290 : vector<4x128xf32>
    %292 = arith.mulf %287, %291 : vector<4x128xf32>
    %293 = arith.index_cast %c5_i32 : i32 to index
    %c0_81 = arith.constant 0 : index
    %c0_82 = arith.constant 0 : index
    %294 = vector.load %arg2[%293, %c0_81, %c0_82] : memref<8x4x128xf32, #tpu.memory_space<vmem>>, vector<1x4x128xf32>
    %295 = vector.shape_cast %294 : vector<1x4x128xf32> to vector<4x128xf32>
    %296 = arith.mulf %292, %295 : vector<4x128xf32>
    %297 = vector.extract_strided_slice %296 {offsets = [0, 0], sizes = [4, 64], strides = [1, 1]} : vector<4x128xf32> to vector<4x64xf32>
    %298 = arith.index_cast %c5_i32 : i32 to index
    %c0_83 = arith.constant 0 : index
    %c0_84 = arith.constant 0 : index
    %299 = vector.load %arg4[%298, %c0_83, %c0_84] : memref<8x4x64xf32, #tpu.memory_space<vmem>>, vector<1x4x64xf32>
    %300 = vector.shape_cast %299 : vector<1x4x64xf32> to vector<4x64xf32>
    %301 = vector.shape_cast %297 : vector<4x64xf32> to vector<1x4x64xf32>
    tpu.vector_store %arg4[%298, %c0_83, %c0_84], %301 {strides = array<i32>} : memref<8x4x64xf32, #tpu.memory_space<vmem>>, vector<1x4x64xf32>,
    %302 = vector.extract_strided_slice %296 {offsets = [0, 64], sizes = [4, 64], strides = [1, 1]} : vector<4x128xf32> to vector<4x64xf32>
    %c7_i32_85 = arith.constant 7 : i32
    %303 = arith.subi %c7_i32_85, %c5_i32 : i32
    %304 = arith.index_cast %303 : i32 to index
    %c0_86 = arith.constant 0 : index
    %c0_87 = arith.constant 0 : index
    %305 = vector.load %arg5[%304, %c0_86, %c0_87] : memref<8x4x64xf32, #tpu.memory_space<vmem>>, vector<1x4x64xf32>
    %306 = vector.shape_cast %305 : vector<1x4x64xf32> to vector<4x64xf32>
    %307 = vector.shape_cast %302 : vector<4x64xf32> to vector<1x4x64xf32>
    tpu.vector_store %arg5[%304, %c0_86, %c0_87], %307 {strides = array<i32>} : memref<8x4x64xf32, #tpu.memory_space<vmem>>, vector<1x4x64xf32>,
    %cst_88 = arith.constant 0.000000e+00 : f32
    %308 = vector.broadcast %cst_88 : f32 to vector<4x128xf32>
    %309 = arith.cmpf ogt, %295, %308 : vector<4x128xf32>
    %310 = arith.select %309, %292, %258 : vector<4x128xi1>, vector<4x128xf32>
    %cst_89 = arith.constant 0.000000e+00 : f32
    %311 = vector.broadcast %cst_89 : f32 to vector<4x128xf32>
    %312 = arith.cmpf ogt, %295, %311 : vector<4x128xf32>
    %313 = arith.select %312, %290, %261 : vector<4x128xi1>, vector<4x128xf32>
    %c6_i32 = arith.constant 6 : i32
    %314 = arith.index_cast %c6_i32 : i32 to index
    %c0_90 = arith.constant 0 : index
    %c0_91 = arith.constant 0 : index
    %315 = vector.load %arg1[%314, %c0_90, %c0_91] : memref<8x4x512xf32, #tpu.memory_space<vmem>>, vector<1x4x512xf32>
    %316 = vector.shape_cast %315 : vector<1x4x512xf32> to vector<4x512xf32>
    %317 = arith.truncf %310 : vector<4x128xf32> to vector<4x128xbf16>
    %cst_92 = arith.constant dense<0.000000e+00> : vector<4x512xf32>
    %318 = tpu.matmul %317, %0, %cst_92 {dimension_numbers = #tpu.dot_dimension_numbers<[1], [0], [0], [1], [0, 0, 1, 1], [], []>} : vector<4x128xbf16>, vector<128x512xbf16>, vector<4x512xf32> -> vector<4x512xf32>
    %319 = arith.addf %316, %318 : vector<4x512xf32>
    %320 = vector.extract_strided_slice %319 {offsets = [0, 0], sizes = [4, 128], strides = [1, 1]} : vector<4x512xf32> to vector<4x128xf32>
    %321 = arith.negf %320 : vector<4x128xf32>
    %322 = math.exp %321 : vector<4x128xf32>
    %cst_93 = arith.constant 1.000000e+00 : f32
    %323 = vector.broadcast %cst_93 : f32 to vector<4x128xf32>
    %324 = arith.addf %323, %322 : vector<4x128xf32>
    %325 = arith.divf %323, %324 : vector<4x128xf32>
    %326 = vector.extract_strided_slice %319 {offsets = [0, 128], sizes = [4, 128], strides = [1, 1]} : vector<4x512xf32> to vector<4x128xf32>
    %327 = arith.negf %326 : vector<4x128xf32>
    %328 = math.exp %327 : vector<4x128xf32>
    %cst_94 = arith.constant 1.000000e+00 : f32
    %329 = vector.broadcast %cst_94 : f32 to vector<4x128xf32>
    %330 = arith.addf %329, %328 : vector<4x128xf32>
    %331 = arith.divf %329, %330 : vector<4x128xf32>
    %332 = vector.extract_strided_slice %319 {offsets = [0, 256], sizes = [4, 128], strides = [1, 1]} : vector<4x512xf32> to vector<4x128xf32>
    %333 = math.tanh %332 : vector<4x128xf32>
    %334 = vector.extract_strided_slice %319 {offsets = [0, 384], sizes = [4, 128], strides = [1, 1]} : vector<4x512xf32> to vector<4x128xf32>
    %335 = arith.negf %334 : vector<4x128xf32>
    %336 = math.exp %335 : vector<4x128xf32>
    %cst_95 = arith.constant 1.000000e+00 : f32
    %337 = vector.broadcast %cst_95 : f32 to vector<4x128xf32>
    %338 = arith.addf %337, %336 : vector<4x128xf32>
    %339 = arith.divf %337, %338 : vector<4x128xf32>
    %340 = arith.mulf %331, %313 : vector<4x128xf32>
    %341 = arith.mulf %325, %333 : vector<4x128xf32>
    %342 = arith.addf %340, %341 : vector<4x128xf32>
    %343 = math.tanh %342 : vector<4x128xf32>
    %344 = arith.mulf %339, %343 : vector<4x128xf32>
    %345 = arith.index_cast %c6_i32 : i32 to index
    %c0_96 = arith.constant 0 : index
    %c0_97 = arith.constant 0 : index
    %346 = vector.load %arg2[%345, %c0_96, %c0_97] : memref<8x4x128xf32, #tpu.memory_space<vmem>>, vector<1x4x128xf32>
    %347 = vector.shape_cast %346 : vector<1x4x128xf32> to vector<4x128xf32>
    %348 = arith.mulf %344, %347 : vector<4x128xf32>
    %349 = vector.extract_strided_slice %348 {offsets = [0, 0], sizes = [4, 64], strides = [1, 1]} : vector<4x128xf32> to vector<4x64xf32>
    %350 = arith.index_cast %c6_i32 : i32 to index
    %c0_98 = arith.constant 0 : index
    %c0_99 = arith.constant 0 : index
    %351 = vector.load %arg4[%350, %c0_98, %c0_99] : memref<8x4x64xf32, #tpu.memory_space<vmem>>, vector<1x4x64xf32>
    %352 = vector.shape_cast %351 : vector<1x4x64xf32> to vector<4x64xf32>
    %353 = vector.shape_cast %349 : vector<4x64xf32> to vector<1x4x64xf32>
    tpu.vector_store %arg4[%350, %c0_98, %c0_99], %353 {strides = array<i32>} : memref<8x4x64xf32, #tpu.memory_space<vmem>>, vector<1x4x64xf32>,
    %354 = vector.extract_strided_slice %348 {offsets = [0, 64], sizes = [4, 64], strides = [1, 1]} : vector<4x128xf32> to vector<4x64xf32>
    %c7_i32_100 = arith.constant 7 : i32
    %355 = arith.subi %c7_i32_100, %c6_i32 : i32
    %356 = arith.index_cast %355 : i32 to index
    %c0_101 = arith.constant 0 : index
    %c0_102 = arith.constant 0 : index
    %357 = vector.load %arg5[%356, %c0_101, %c0_102] : memref<8x4x64xf32, #tpu.memory_space<vmem>>, vector<1x4x64xf32>
    %358 = vector.shape_cast %357 : vector<1x4x64xf32> to vector<4x64xf32>
    %359 = vector.shape_cast %354 : vector<4x64xf32> to vector<1x4x64xf32>
    tpu.vector_store %arg5[%356, %c0_101, %c0_102], %359 {strides = array<i32>} : memref<8x4x64xf32, #tpu.memory_space<vmem>>, vector<1x4x64xf32>,
    %cst_103 = arith.constant 0.000000e+00 : f32
    %360 = vector.broadcast %cst_103 : f32 to vector<4x128xf32>
    %361 = arith.cmpf ogt, %347, %360 : vector<4x128xf32>
    %362 = arith.select %361, %344, %310 : vector<4x128xi1>, vector<4x128xf32>
    %cst_104 = arith.constant 0.000000e+00 : f32
    %363 = vector.broadcast %cst_104 : f32 to vector<4x128xf32>
    %364 = arith.cmpf ogt, %347, %363 : vector<4x128xf32>
    %365 = arith.select %364, %342, %313 : vector<4x128xi1>, vector<4x128xf32>
    %c7_i32_105 = arith.constant 7 : i32
    %366 = arith.index_cast %c7_i32_105 : i32 to index
    %c0_106 = arith.constant 0 : index
    %c0_107 = arith.constant 0 : index
    %367 = vector.load %arg1[%366, %c0_106, %c0_107] : memref<8x4x512xf32, #tpu.memory_space<vmem>>, vector<1x4x512xf32>
    %368 = vector.shape_cast %367 : vector<1x4x512xf32> to vector<4x512xf32>
    %369 = arith.truncf %362 : vector<4x128xf32> to vector<4x128xbf16>
    %cst_108 = arith.constant dense<0.000000e+00> : vector<4x512xf32>
    %370 = tpu.matmul %369, %0, %cst_108 {dimension_numbers = #tpu.dot_dimension_numbers<[1], [0], [0], [1], [0, 0, 1, 1], [], []>} : vector<4x128xbf16>, vector<128x512xbf16>, vector<4x512xf32> -> vector<4x512xf32>
    %371 = arith.addf %368, %370 : vector<4x512xf32>
    %372 = vector.extract_strided_slice %371 {offsets = [0, 0], sizes = [4, 128], strides = [1, 1]} : vector<4x512xf32> to vector<4x128xf32>
    %373 = arith.negf %372 : vector<4x128xf32>
    %374 = math.exp %373 : vector<4x128xf32>
    %cst_109 = arith.constant 1.000000e+00 : f32
    %375 = vector.broadcast %cst_109 : f32 to vector<4x128xf32>
    %376 = arith.addf %375, %374 : vector<4x128xf32>
    %377 = arith.divf %375, %376 : vector<4x128xf32>
    %378 = vector.extract_strided_slice %371 {offsets = [0, 128], sizes = [4, 128], strides = [1, 1]} : vector<4x512xf32> to vector<4x128xf32>
    %379 = arith.negf %378 : vector<4x128xf32>
    %380 = math.exp %379 : vector<4x128xf32>
    %cst_110 = arith.constant 1.000000e+00 : f32
    %381 = vector.broadcast %cst_110 : f32 to vector<4x128xf32>
    %382 = arith.addf %381, %380 : vector<4x128xf32>
    %383 = arith.divf %381, %382 : vector<4x128xf32>
    %384 = vector.extract_strided_slice %371 {offsets = [0, 256], sizes = [4, 128], strides = [1, 1]} : vector<4x512xf32> to vector<4x128xf32>
    %385 = math.tanh %384 : vector<4x128xf32>
    %386 = vector.extract_strided_slice %371 {offsets = [0, 384], sizes = [4, 128], strides = [1, 1]} : vector<4x512xf32> to vector<4x128xf32>
    %387 = arith.negf %386 : vector<4x128xf32>
    %388 = math.exp %387 : vector<4x128xf32>
    %cst_111 = arith.constant 1.000000e+00 : f32
    %389 = vector.broadcast %cst_111 : f32 to vector<4x128xf32>
    %390 = arith.addf %389, %388 : vector<4x128xf32>
    %391 = arith.divf %389, %390 : vector<4x128xf32>
    %392 = arith.mulf %383, %365 : vector<4x128xf32>
    %393 = arith.mulf %377, %385 : vector<4x128xf32>
    %394 = arith.addf %392, %393 : vector<4x128xf32>
    %395 = math.tanh %394 : vector<4x128xf32>
    %396 = arith.mulf %391, %395 : vector<4x128xf32>
    %397 = arith.index_cast %c7_i32_105 : i32 to index
    %c0_112 = arith.constant 0 : index
    %c0_113 = arith.constant 0 : index
    %398 = vector.load %arg2[%397, %c0_112, %c0_113] : memref<8x4x128xf32, #tpu.memory_space<vmem>>, vector<1x4x128xf32>
    %399 = vector.shape_cast %398 : vector<1x4x128xf32> to vector<4x128xf32>
    %400 = arith.mulf %396, %399 : vector<4x128xf32>
    %401 = vector.extract_strided_slice %400 {offsets = [0, 0], sizes = [4, 64], strides = [1, 1]} : vector<4x128xf32> to vector<4x64xf32>
    %402 = arith.index_cast %c7_i32_105 : i32 to index
    %c0_114 = arith.constant 0 : index
    %c0_115 = arith.constant 0 : index
    %403 = vector.load %arg4[%402, %c0_114, %c0_115] : memref<8x4x64xf32, #tpu.memory_space<vmem>>, vector<1x4x64xf32>
    %404 = vector.shape_cast %403 : vector<1x4x64xf32> to vector<4x64xf32>
    %405 = vector.shape_cast %401 : vector<4x64xf32> to vector<1x4x64xf32>
    tpu.vector_store %arg4[%402, %c0_114, %c0_115], %405 {strides = array<i32>} : memref<8x4x64xf32, #tpu.memory_space<vmem>>, vector<1x4x64xf32>,
    %406 = vector.extract_strided_slice %400 {offsets = [0, 64], sizes = [4, 64], strides = [1, 1]} : vector<4x128xf32> to vector<4x64xf32>
    %c7_i32_116 = arith.constant 7 : i32
    %407 = arith.subi %c7_i32_116, %c7_i32_105 : i32
    %408 = arith.index_cast %407 : i32 to index
    %c0_117 = arith.constant 0 : index
    %c0_118 = arith.constant 0 : index
    %409 = vector.load %arg5[%408, %c0_117, %c0_118] : memref<8x4x64xf32, #tpu.memory_space<vmem>>, vector<1x4x64xf32>
    %410 = vector.shape_cast %409 : vector<1x4x64xf32> to vector<4x64xf32>
    %411 = vector.shape_cast %406 : vector<4x64xf32> to vector<1x4x64xf32>
    tpu.vector_store %arg5[%408, %c0_117, %c0_118], %411 {strides = array<i32>} : memref<8x4x64xf32, #tpu.memory_space<vmem>>, vector<1x4x64xf32>,
    %cst_119 = arith.constant 0.000000e+00 : f32
    %412 = vector.broadcast %cst_119 : f32 to vector<4x128xf32>
    %413 = arith.cmpf ogt, %399, %412 : vector<4x128xf32>
    %414 = arith.select %413, %396, %362 : vector<4x128xi1>, vector<4x128xf32>
    %cst_120 = arith.constant 0.000000e+00 : f32
    %415 = vector.broadcast %cst_120 : f32 to vector<4x128xf32>
    %416 = arith.cmpf ogt, %399, %415 : vector<4x128xf32>
    %417 = arith.select %416, %394, %365 : vector<4x128xi1>, vector<4x128xf32>
    %c8_i32 = arith.constant 8 : i32
    %c0_121 = arith.constant 0 : index
    %c0_122 = arith.constant 0 : index
    %418 = vector.load %arg6[%c0_121, %c0_122] : memref<4x128xf32, #tpu.memory_space<vmem>>, vector<4x128xf32>
    tpu.vector_store %arg6[%c0_121, %c0_122], %414 {strides = array<i32>} : memref<4x128xf32, #tpu.memory_space<vmem>>, vector<4x128xf32>,
    return
  }
  func.func @transform_0(%arg0: i32) -> (i32, i32, i32) {
    %c0_i32 = arith.constant 0 : i32
    %c0_i32_0 = arith.constant 0 : i32
    %c0_i32_1 = arith.constant 0 : i32
    %c0_i32_2 = arith.constant 0 : i32
    return %c0_i32, %c0_i32_0, %c0_i32_1 : i32, i32, i32
  }
  func.func @transform_1(%arg0: i32) -> (i32, i32, i32) {
    %c0_i32 = arith.constant 0 : i32
    %c0_i32_0 = arith.constant 0 : i32
    %c0_i32_1 = arith.constant 0 : i32
    %c0_i32_2 = arith.constant 0 : i32
    return %c0_i32, %c0_i32_0, %c0_i32_1 : i32, i32, i32
  }
  func.func @transform_2(%arg0: i32) -> (i32, i32) {
    %c0_i32 = arith.constant 0 : i32
    %c0_i32_0 = arith.constant 0 : i32
    %c0_i32_1 = arith.constant 0 : i32
    return %c0_i32, %c0_i32_0 : i32, i32
  }
  func.func @transform_3(%arg0: i32) -> (i32, i32, i32) {
    %c0_i32 = arith.constant 0 : i32
    %c0_i32_0 = arith.constant 0 : i32
    %c0_i32_1 = arith.constant 0 : i32
    %c0_i32_2 = arith.constant 0 : i32
    return %c0_i32, %c0_i32_0, %c0_i32_1 : i32, i32, i32
  }
  func.func @transform_4(%arg0: i32) -> (i32, i32, i32) {
    %c0_i32 = arith.constant 0 : i32
    %c0_i32_0 = arith.constant 0 : i32
    %c0_i32_1 = arith.constant 0 : i32
    %c0_i32_2 = arith.constant 0 : i32
    return %c0_i32, %c0_i32_0, %c0_i32_1 : i32, i32, i32
  }
  func.func @transform_5(%arg0: i32) -> (i32, i32) {
    %c0_i32 = arith.constant 0 : i32
    %c0_i32_0 = arith.constant 0 : i32
    %c0_i32_1 = arith.constant 0 : i32
    return %c0_i32, %c0_i32_0 : i32, i32
  }
}

</mosaic_0001>

<bundles_post_ra>
// kernel: neg.2
= control target key start
LH: loop header
LB: loop body
LE: loop exit
PB: predicated region body
PF: predicated region fallthrough
CT: control target
= control target key end

     0   :  { %s24_s0 = inlined_call_operand.vmem [shape: s32[4], index: 0, kind: input, shape index: {}]   ;;  %s25_s1 = inlined_call_operand.vmem [shape: s32[4], index: 1, kind: output, shape index: {}]  }
   0x1   :  { %v2_v0 = vld [vmem:[%s24_s0] sm:$0x1] }
   0x2   :  { %v5_v1 = vsub.s32 0, %v2_v0 }
   0x4   :  { %7 = vst [vmem:[%s25_s1] sm:$0x1] %v5_v1 }

// kernel: mirror_lstm_forward.2
= control target key start
LH: loop header
LB: loop body
LE: loop exit
PB: predicated region body
PF: predicated region fallthrough
CT: control target
= control target key end

     0   :  { %vm270_vm0 = vcmask 1043456   ;;  %vm348_vm14 = vcmask 519168   ;;  %s1805_s28 = smov 64   ;;  %s2587_s2 = inlined_call_operand.vmem [shape: bf16[128,512], index: 2, kind: input, shape index: {}]   ;;  %s2588_s0 = inlined_call_operand.vmem [shape: f32[8,4,512], index: 0, kind: input, shape index: {}]   ;;  %s2589_s1 = inlined_call_operand.vmem [shape: f32[8,4,128], index: 1, kind: input, shape index: {}]   ;;  %s2590_s3 = inlined_call_operand.vmem [shape: f32[8,4,64], index: 3, kind: output, shape index: {0}]   ;;  %s2591_s4 = inlined_call_operand.vmem [shape: f32[8,4,64], index: 4, kind: output, shape index: {1}]   ;;  %s2592_s5 = inlined_call_operand.vmem [shape: f32[4,128], index: 5, kind: output, shape index: {2}]  }
   0x1   :  { %v1557_v0 = vld [vmem:[%s2587_s2 + $0xe0] sm:$0xf]  ;;  %v1672_v1 = vld [vmem:[%s2587_s2 + $0xec] sm:$0xf0]  ;;  %v1670_v2 = vld [vmem:[%s2587_s2 + $0xe4] sm:$0xf] }
   0x2   :  { %v1845_v3 = vor.u32 %v1672_v1, %v1557_v0  ;;  %v1559_v4 = vld [vmem:[%s2587_s2 + $0xf0] sm:$0xf0]  ;;  %v1565_v5 = vld [vmem:[%s2587_s2 + $0xe8] sm:$0xf]  ;;  %v1673_v6 = vld [vmem:[%s2587_s2 + $0xf4] sm:$0xf0] }
   0x3   :  { %v1856_v7 = vor.u32 %v1670_v2, %v1559_v4  ;;  %v1858_v8 = vor.u32 %v1673_v6, %v1565_v5  ;;  %v1671_v9 = vld [vmem:[%s2587_s2 + $0xec] sm:$0xf]  ;;  %v1567_v10 = vld [vmem:[%s2587_s2 + $0xf8] sm:$0xf0]  ;;  %v1541_v11 = vld [vmem:[%s2587_s2 + $0xc0] sm:$0xf] }
   0x4   :  { %212 = vmatpush.bf16.msra.mxu0 %v1845_v3  ;;  %v1870_v12 = vor.u32 %v1671_v9, %v1567_v10  ;;  %v1668_v13 = vld [vmem:[%s2587_s2 + $0xcc] sm:$0xf0]  ;;  %v1666_v14 = vld [vmem:[%s2587_s2 + $0xc4] sm:$0xf]  ;;  %v1543_v15 = vld [vmem:[%s2587_s2 + $0xd0] sm:$0xf0] }
   0x5   :  { %225 = vmatpush.bf16.msra.mxu1 %v1856_v7  ;;  %238 = vmatpush.bf16.msra.mxu2 %v1858_v8  ;;  %v1883_v16 = vor.u32 %v1668_v13, %v1541_v11  ;;  %v1885_v17 = vor.u32 %v1666_v14, %v1543_v15  ;;  %v1549_v18 = vld [vmem:[%s2587_s2 + $0xc8] sm:$0xf]  ;;  %v1669_v19 = vld [vmem:[%s2587_s2 + $0xd4] sm:$0xf0]  ;;  %v1667_v20 = vld [vmem:[%s2587_s2 + $0xcc] sm:$0xf] }
   0x6   :  { %251 = vmatpush.bf16.msra.mxu3 %v1870_v12  ;;  %v1897_v21 = vor.u32 %v1669_v19, %v1549_v18  ;;  %v1551_v22 = vld [vmem:[%s2587_s2 + $0xd8] sm:$0xf0]  ;;  %v1525_v23 = vld [vmem:[%s2587_s2 + $0xa0] sm:$0xf]  ;;  %v1664_v24 = vld [vmem:[%s2587_s2 + $0xac] sm:$0xf0] }
   0x7   :  { %v1908_v25 = vor.u32 %v1667_v20, %v1551_v22  ;;  %v1662_v26 = vld [vmem:[%s2587_s2 + $0xa4] sm:$0xf]  ;;  %v1527_v27 = vld [vmem:[%s2587_s2 + $0xb0] sm:$0xf0]  ;;  %v1533_v28 = vld [vmem:[%s2587_s2 + $0xa8] sm:$0xf]  ;;  %v1920_v29 = vor.u32 %v1664_v24, %v1525_v23 }
   0x8   :  { %213 = vmatpush.bf16.msra.mxu0 %v1883_v16  ;;  %v1665_v30 = vld [vmem:[%s2587_s2 + $0xb4] sm:$0xf0]  ;;  %v1663_v31 = vld [vmem:[%s2587_s2 + $0xac] sm:$0xf]  ;;  %v1535_v32 = vld [vmem:[%s2587_s2 + $0xb8] sm:$0xf0]  ;;  %v1933_v33 = vor.u32 %v1662_v26, %v1527_v27 }
   0x9   :  { %226 = vmatpush.bf16.msra.mxu1 %v1885_v17  ;;  %239 = vmatpush.bf16.msra.mxu2 %v1897_v21  ;;  %v1935_v34 = vor.u32 %v1665_v30, %v1533_v28  ;;  %v1509_v35 = vld [vmem:[%s2587_s2 + $0x80] sm:$0xf]  ;;  %v1660_v36 = vld [vmem:[%s2587_s2 + $0x8c] sm:$0xf0]  ;;  %v1658_v37 = vld [vmem:[%s2587_s2 + $0x84] sm:$0xf]  ;;  %v1947_v38 = vor.u32 %v1663_v31, %v1535_v32 }
   0xa   :  { %252 = vmatpush.bf16.msra.mxu3 %v1908_v25  ;;  %v1511_v39 = vld [vmem:[%s2587_s2 + $0x90] sm:$0xf0]  ;;  %v1517_v40 = vld [vmem:[%s2587_s2 + $0x88] sm:$0xf]  ;;  %v1661_v41 = vld [vmem:[%s2587_s2 + $0x94] sm:$0xf0]  ;;  %v1965_v44 = vor.u32 %v1660_v36, %v1509_v35 }
   0xb   :  { %v1659_v42 = vld [vmem:[%s2587_s2 + $0x8c] sm:$0xf]  ;;  %v1519_v43 = vld [vmem:[%s2587_s2 + $0x98] sm:$0xf0]  ;;  %v1969_v45 = vor.u32 %v1658_v37, %v1511_v39  ;;  %v1971_v46 = vor.u32 %v1661_v41, %v1517_v40  ;;  %v1493_v47 = vld [vmem:[%s2587_s2 + $0x60] sm:$0xf] }
   0xc   :  { %214 = vmatpush.bf16.msra.mxu0 %v1920_v29  ;;  %v1656_v48 = vld [vmem:[%s2587_s2 + $0x6c] sm:$0xf0]  ;;  %v1654_v49 = vld [vmem:[%s2587_s2 + $0x64] sm:$0xf]  ;;  %v1983_v50 = vor.u32 %v1659_v42, %v1519_v43  ;;  %v1495_v51 = vld [vmem:[%s2587_s2 + $0x70] sm:$0xf0] }
   0xd   :  { %227 = vmatpush.bf16.msra.mxu1 %v1933_v33  ;;  %240 = vmatpush.bf16.msra.mxu2 %v1935_v34  ;;  %v1501_v52 = vld [vmem:[%s2587_s2 + $0x68] sm:$0xf]  ;;  %v1657_v53 = vld [vmem:[%s2587_s2 + $0x74] sm:$0xf0]  ;;  %v1655_v54 = vld [vmem:[%s2587_s2 + $0x6c] sm:$0xf]  ;;  %v2001_v56 = vor.u32 %v1656_v48, %v1493_v47  ;;  %v2005_v57 = vor.u32 %v1654_v49, %v1495_v51 }
   0xe   :  { %253 = vmatpush.bf16.msra.mxu3 %v1947_v38  ;;  %v1503_v55 = vld [vmem:[%s2587_s2 + $0x78] sm:$0xf0]  ;;  %v2007_v58 = vor.u32 %v1657_v53, %v1501_v52  ;;  %v1477_v59 = vld [vmem:[%s2587_s2 + $0x40] sm:$0xf]  ;;  %v1652_v60 = vld [vmem:[%s2587_s2 + $0x4c] sm:$0xf0] }
   0xf   :  { %v1650_v61 = vld [vmem:[%s2587_s2 + $0x44] sm:$0xf]  ;;  %v2019_v62 = vor.u32 %v1655_v54, %v1503_v55  ;;  %v1479_v63 = vld [vmem:[%s2587_s2 + $0x50] sm:$0xf0]  ;;  %v1485_v0 = vld [vmem:[%s2587_s2 + $0x48] sm:$0xf]  ;;  %v2037_v5 = vor.u32 %v1652_v60, %v1477_v59 }
  0x10   :  { %215 = vmatpush.bf16.msra.mxu0 %v1965_v44  ;;  %v1653_v1 = vld [vmem:[%s2587_s2 + $0x54] sm:$0xf0]  ;;  %v1651_v2 = vld [vmem:[%s2587_s2 + $0x4c] sm:$0xf]  ;;  %v1487_v4 = vld [vmem:[%s2587_s2 + $0x58] sm:$0xf0]  ;;  %v2041_v6 = vor.u32 %v1650_v61, %v1479_v63 }
  0x11   :  { %228 = vmatpush.bf16.msra.mxu1 %v1969_v45  ;;  %241 = vmatpush.bf16.msra.mxu2 %v1971_v46  ;;  %v2043_v9 = vor.u32 %v1653_v1, %v1485_v0  ;;  %v1461_v10 = vld [vmem:[%s2587_s2 + $0x20] sm:$0xf]  ;;  %v1648_v11 = vld [vmem:[%s2587_s2 + $0x2c] sm:$0xf0]  ;;  %v1646_v13 = vld [vmem:[%s2587_s2 + $0x24] sm:$0xf]  ;;  %v2055_v14 = vor.u32 %v1651_v2, %v1487_v4 }
  0x12   :  { %254 = vmatpush.bf16.msra.mxu3 %v1983_v50  ;;  %v1463_v15 = vld [vmem:[%s2587_s2 + $0x30] sm:$0xf0]  ;;  %v1469_v18 = vld [vmem:[%s2587_s2 + $0x28] sm:$0xf]  ;;  %v1649_v19 = vld [vmem:[%s2587_s2 + $0x34] sm:$0xf0]  ;;  %v2073_v23 = vor.u32 %v1648_v11, %v1461_v10 }
  0x13   :  { %v1647_v20 = vld [vmem:[%s2587_s2 + $0x2c] sm:$0xf]  ;;  %v1471_v22 = vld [vmem:[%s2587_s2 + $0x38] sm:$0xf0]  ;;  %v2077_v24 = vor.u32 %v1646_v13, %v1463_v15  ;;  %v2079_v26 = vor.u32 %v1649_v19, %v1469_v18  ;;  %v1445_v27 = vld [vmem:[%s2587_s2] sm:$0xf] }
  0x14   :  { %216 = vmatpush.bf16.msra.mxu0 %v2001_v56  ;;  %v1644_v28 = vld [vmem:[%s2587_s2 + $0xc] sm:$0xf0]  ;;  %v1642_v30 = vld [vmem:[%s2587_s2 + $0x4] sm:$0xf]  ;;  %v2091_v31 = vor.u32 %v1647_v20, %v1471_v22  ;;  %v1447_v32 = vld [vmem:[%s2587_s2 + $0x10] sm:$0xf0] }
  0x15   :  { %229 = vmatpush.bf16.msra.mxu1 %v2005_v57  ;;  %242 = vmatpush.bf16.msra.mxu2 %v2007_v58  ;;  %v1453_v35 = vld [vmem:[%s2587_s2 + $0x8] sm:$0xf]  ;;  %v1645_v36 = vld [vmem:[%s2587_s2 + $0x14] sm:$0xf0]  ;;  %v1643_v37 = vld [vmem:[%s2587_s2 + $0xc] sm:$0xf]  ;;  %v2109_v40 = vor.u32 %v1644_v28, %v1445_v27  ;;  %v2113_v41 = vor.u32 %v1642_v30, %v1447_v32 }
  0x16   :  { %255 = vmatpush.bf16.msra.mxu3 %v2019_v62  ;;  %v1455_v39 = vld [vmem:[%s2587_s2 + $0x18] sm:$0xf0]  ;;  %v2115_v42 = vor.u32 %v1645_v36, %v1453_v35  ;;  %v1804_v47 = vmov 0   ;;  %v50_v51 = vld [vmem:[%s2588_s0] sm:$0xff]  ;;  %v51_v1 = vld [vmem:[%s2588_s0 + $0x8] sm:$0xff] }
  0x17   :  { %v2118_v43 = vor.u32 %v1643_v37, %v1455_v39 }
  0x18   :  { %217 = vmatpush.bf16.msra.mxu0 %v2037_v5 }
  0x19   :  { %230 = vmatpush.bf16.msra.mxu1 %v2041_v6  ;;  %243 = vmatpush.bf16.msra.mxu2 %v2043_v9 }
  0x1a   :  { %256 = vmatpush.bf16.msra.mxu3 %v2055_v14 }
  0x1c   :  { %218 = vmatpush.bf16.msra.mxu0 %v2073_v23 }
  0x1d   :  { %231 = vmatpush.bf16.msra.mxu1 %v2077_v24  ;;  %244 = vmatpush.bf16.msra.mxu2 %v2079_v26 }
  0x1e   :  { %257 = vmatpush.bf16.msra.mxu3 %v2091_v31 }
  0x20   :  { %219 = vmatpush.bf16.msra.mxu0 %v2109_v40 }
  0x21   :  { %232 = vmatpush.bf16.msra.mxu1 %v2113_v41  ;;  %245 = vmatpush.bf16.msra.mxu2 %v2115_v42 }
  0x22   :  { %258 = vmatpush.bf16.msra.mxu3 %v2118_v43 }
  0x23   :  { %220 = vmatmul.bf16.vlgmr.msra.gmra.mxu0 %v1804_v47 }
  0x24   :  { %365 = vmatpush.bf16.msrb.mxu0 %v1845_v3  ;;  %233 = vmatmul.bf16.vlgmr.msra.gmra.mxu1 %v1804_v47 }
  0x25   :  { %378 = vmatpush.bf16.msrb.mxu1 %v1856_v7  ;;  %246 = vmatmul.bf16.vlgmr.msra.gmra.mxu2 %v1804_v47 }
  0x26   :  { %259 = vmatmul.bf16.vlgmr.msra.gmra.mxu3 %v1804_v47  ;;  %391 = vmatpush.bf16.msrb.mxu2 %v1858_v8 }
  0x27   :  { %404 = vmatpush.bf16.msrb.mxu3 %v1870_v12 }
  0x28   :  { %366 = vmatpush.bf16.msrb.mxu0 %v1883_v16 }
  0x29   :  { %379 = vmatpush.bf16.msrb.mxu1 %v1885_v17 }
  0x2a   :  { %392 = vmatpush.bf16.msrb.mxu2 %v1897_v21 }
  0x2b   :  { %405 = vmatpush.bf16.msrb.mxu3 %v1908_v25 }
  0x2c   :  { %367 = vmatpush.bf16.msrb.mxu0 %v1920_v29 }
  0x2d   :  { %380 = vmatpush.bf16.msrb.mxu1 %v1933_v33 }
  0x2e   :  { %393 = vmatpush.bf16.msrb.mxu2 %v1935_v34 }
  0x2f   :  { %406 = vmatpush.bf16.msrb.mxu3 %v1947_v38 }
  0x30   :  { %368 = vmatpush.bf16.msrb.mxu0 %v1965_v44 }
  0x31   :  { %381 = vmatpush.bf16.msrb.mxu1 %v1969_v45 }
  0x32   :  { %394 = vmatpush.bf16.msrb.mxu2 %v1971_v46 }
  0x33   :  { %407 = vmatpush.bf16.msrb.mxu3 %v1983_v50 }
  0x34   :  { %369 = vmatpush.bf16.msrb.mxu0 %v2001_v56 }
  0x35   :  { %382 = vmatpush.bf16.msrb.mxu1 %v2005_v57 }
  0x36   :  { %395 = vmatpush.bf16.msrb.mxu2 %v2007_v58 }
  0x37   :  { %408 = vmatpush.bf16.msrb.mxu3 %v2019_v62 }
  0x38   :  { %370 = vmatpush.bf16.msrb.mxu0 %v2037_v5 }
  0x39   :  { %383 = vmatpush.bf16.msrb.mxu1 %v2041_v6 }
  0x3a   :  { %396 = vmatpush.bf16.msrb.mxu2 %v2043_v9 }
  0x3b   :  { %409 = vmatpush.bf16.msrb.mxu3 %v2055_v14 }
  0x3c   :  { %371 = vmatpush.bf16.msrb.mxu0 %v2073_v23 }
  0x3d   :  { %384 = vmatpush.bf16.msrb.mxu1 %v2077_v24 }
  0x3e   :  { %397 = vmatpush.bf16.msrb.mxu2 %v2079_v26 }
  0x3f   :  { %410 = vmatpush.bf16.msrb.mxu3 %v2091_v31 }
  0x40   :  { %372 = vmatpush.bf16.msrb.mxu0 %v2109_v40 }
  0x41   :  { %385 = vmatpush.bf16.msrb.mxu1 %v2113_v41 }
  0x42   :  { %398 = vmatpush.bf16.msrb.mxu2 %v2115_v42 }
  0x43   :  { %411 = vmatpush.bf16.msrb.mxu3 %v2118_v43 }
  0x44   :  { %518 = vmatpush.bf16.msra.mxu0 %v1845_v3 }
  0x45   :  { %531 = vmatpush.bf16.msra.mxu1 %v1856_v7 }
  0x46   :  { %544 = vmatpush.bf16.msra.mxu2 %v1858_v8 }
  0x47   :  { %557 = vmatpush.bf16.msra.mxu3 %v1870_v12 }
  0x48   :  { %519 = vmatpush.bf16.msra.mxu0 %v1883_v16 }
  0x49   :  { %532 = vmatpush.bf16.msra.mxu1 %v1885_v17 }
  0x4a   :  { %545 = vmatpush.bf16.msra.mxu2 %v1897_v21 }
  0x4b   :  { %558 = vmatpush.bf16.msra.mxu3 %v1908_v25 }
  0x4c   :  { %520 = vmatpush.bf16.msra.mxu0 %v1920_v29 }
  0x4d   :  { %533 = vmatpush.bf16.msra.mxu1 %v1933_v33 }
  0x4e   :  { %546 = vmatpush.bf16.msra.mxu2 %v1935_v34 }
  0x4f   :  { %559 = vmatpush.bf16.msra.mxu3 %v1947_v38 }
  0x50   :  { %521 = vmatpush.bf16.msra.mxu0 %v1965_v44 }
  0x51   :  { %534 = vmatpush.bf16.msra.mxu1 %v1969_v45 }
  0x52   :  { %547 = vmatpush.bf16.msra.mxu2 %v1971_v46 }
  0x53   :  { %560 = vmatpush.bf16.msra.mxu3 %v1983_v50 }
  0x54   :  { %522 = vmatpush.bf16.msra.mxu0 %v2001_v56 }
  0x55   :  { %535 = vmatpush.bf16.msra.mxu1 %v2005_v57 }
  0x56   :  { %548 = vmatpush.bf16.msra.mxu2 %v2007_v58 }
  0x57   :  { %561 = vmatpush.bf16.msra.mxu3 %v2019_v62 }
  0x58   :  { %523 = vmatpush.bf16.msra.mxu0 %v2037_v5 }
  0x59   :  { %536 = vmatpush.bf16.msra.mxu1 %v2041_v6 }
  0x5a   :  { %549 = vmatpush.bf16.msra.mxu2 %v2043_v9 }
  0x5b   :  { %562 = vmatpush.bf16.msra.mxu3 %v2055_v14 }
  0x5c   :  { %524 = vmatpush.bf16.msra.mxu0 %v2073_v23 }
  0x5d   :  { %537 = vmatpush.bf16.msra.mxu1 %v2077_v24 }
  0x5e   :  { %550 = vmatpush.bf16.msra.mxu2 %v2079_v26 }
  0x5f   :  { %563 = vmatpush.bf16.msra.mxu3 %v2091_v31 }
  0x60   :  { %525 = vmatpush.bf16.msra.mxu0 %v2109_v40 }
  0x61   :  { %538 = vmatpush.bf16.msra.mxu1 %v2113_v41 }
  0x62   :  { %551 = vmatpush.bf16.msra.mxu2 %v2115_v42 }
  0x63   :  { %564 = vmatpush.bf16.msra.mxu3 %v2118_v43 }
  0xa0   :  { %v221_v48 = vpop.f32.mrf.mxu0 }
  0xa1   :  { %v234_v49 = vpop.f32.mrf.mxu1 }
  0xa2   :  { %v268_v52 = vrot.slane %v234_v49, 4 }
  0xa4   :  { %v271_v53 = vsel %vm270_vm0, %v221_v48, %v268_v52 }
  0xa5   :  { %v275_v54 = vadd.f32 %v271_v53, %v50_v51 }
  0xa7   :  { %v1571_v55 = vmul.f32 -1.442695, %v275_v54  ;;  %v297_v59 = vrot.slane %v275_v54, 4 }
  0xa8   :  { %v247_v60 = vpop.f32.mrf.mxu2  ;;  %v223_v63 = vpop.f32.mrf.mxu0 }
  0xa9   :  { %v260_v61 = vpop.f32.mrf.mxu3  ;;  %1676 = vpow2.f32 %v1571_v55  ;;  %v1572_v0 = vmul.f32 -1.442695, %v297_v59  ;;  %v236_v4 = vpop.f32.mrf.mxu1 }
  0xaa   :  { %v269_v2 = vrot.slane %v260_v61, 4 }
  0xab   :  { %1678 = vpow2.f32 %v1572_v0 }
  0xac   :  { %v272_v10 = vsel %vm270_vm0, %v247_v60, %v269_v2 }
  0xad   :  { %v276_v11 = vadd.f32 %v272_v10, %v51_v1 }
  0xaf   :  { %v320_v13 = vrot.slane %v276_v11, 4  ;;  %v1677_v15 = vpop.eup %1676 }
  0xb0   :  { %v249_v18 = vpop.f32.mrf.mxu2  ;;  %v280_v19 = vadd.f32 1.0, %v1677_v15 }
  0xb1   :  { %v1573_v20 = vmul.f32 -1.442695, %v320_v13  ;;  %v262_v22 = vpop.f32.mrf.mxu3  ;;  %v1679_v27 = vpop.eup %1678 }
  0xb2   :  { %1680 = vrcp.f32 %v280_v19  ;;  %v302_v28 = vadd.f32 1.0, %v1679_v27  ;;  %v292_v48 = vand.u32 2147483648, %v280_v19  ;;  %v290_v51 = vand.u32 2147483647, %v280_v19 }
  0xb3   :  { %1682 = vpow2.f32 %v1573_v20  ;;  %vm286_vm2 = vweird.f32 %v280_v19 }
  0xb4   :  { %1684 = vrcp.f32 %v302_v28  ;;  %v314_v53 = vand.u32 2147483648, %v302_v28  ;;  %v312_v59 = vand.u32 2147483647, %v302_v28  ;;  %v293_v60 = vor.u32 1.1754944e-38, %v292_v48 }
  0xb5   :  { %vm291_vm5 = vcmp.eq.f32.partialorder %v290_v51, 8.507059e+37  ;;  %vm308_vm6 = vweird.f32 %v302_v28 }
  0xb6   :  { %v315_v2 = vor.u32 1.1754944e-38, %v314_v53  ;;  %vm313_vm8 = vcmp.eq.f32.partialorder %v312_v59, 8.507059e+37 }
  0xb8   :  { %v1681_v30 = vpop.eup %1680 }
  0xb9   :  { %v1683_v32 = vpop.eup %1682  ;;  %v282_v35 = vmul.f32 %v1681_v30, %v280_v19  ;;  %vm287_vm1 = vweird.f32 %v1681_v30 }
  0xba   :  { %v1685_v36 = vpop.eup %1684  ;;  %v325_v37 = vadd.f32 1.0, %v1683_v32  ;;  %vm288_vm4 = vmor %vm286_vm2, %vm287_vm1 }
  0xbb   :  { %v283_v39 = vsub.f32 1.0, %v282_v35  ;;  %v304_v47 = vmul.f32 %v1685_v36, %v302_v28  ;;  %vm309_vm3 = vweird.f32 %v1685_v36 }
  0xbc   :  { %1686 = vrcp.f32 %v325_v37  ;;  %vm310_vm7 = vmor %vm308_vm6, %vm309_vm3  ;;  %vm331_vm11 = vweird.f32 %v325_v37  ;;  %v335_v35 = vand.u32 2147483647, %v325_v37 }
  0xbd   :  { %v284_v49 = vmul.f32 %v1681_v30, %v283_v39  ;;  %v305_v52 = vsub.f32 1.0, %v304_v47  ;;  %1688 = vtanh.f32 %v276_v11  ;;  %v346_v11 = vld [vmem:[%s2589_s1] sm:$0xf] }
  0xbe   :  { %vm358_vm9 = vcmp.gt.f32.partialorder %v346_v11, 0.0  ;;  %vm336_vm13 = vcmp.eq.f32.partialorder %v335_v35, 8.507059e+37 }
  0xbf   :  { %v285_v54 = vadd.f32 %v1681_v30, %v284_v49  ;;  %v306_v55 = vmul.f32 %v1685_v36, %v305_v52  ;;  %vm1577_vm15 = vmpackc.low %vm358_vm9, %vm358_vm9 }
  0xc1   :  { %v289_v61 = vsel %vm288_vm4, %v1681_v30, %v285_v54  ;;  %v307_v63 = vadd.f32 %v1685_v36, %v306_v55  ;;  %v337_v30 = vand.u32 2147483648, %v325_v37 }
  0xc2   :  { %v1687_v0 = vpop.eup %1686  ;;  %v294_v1 = vsel %vm291_vm5, %v293_v60, %v289_v61  ;;  %v1575_v60 = vld [vmem:[%s2588_s0 + $0x10] sm:$0xff] }
  0xc3   :  { %v327_v4 = vmul.f32 %v1687_v0, %v325_v37  ;;  %v311_v10 = vsel %vm310_vm7, %v1685_v36, %v307_v63  ;;  %v1689_v13 = vpop.eup %1688  ;;  %vm332_vm10 = vweird.f32 %v1687_v0  ;;  %v338_v39 = vor.u32 1.1754944e-38, %v337_v30 }
  0xc4   :  { %v316_v15 = vsel %vm313_vm8, %v315_v2, %v311_v10  ;;  %v342_v20 = vmul.f32 %v1689_v13, %v294_v1  ;;  %vm333_vm12 = vmor %vm331_vm11, %vm332_vm10  ;;  %v1576_v13 = vld [vmem:[%s2588_s0 + $0x18] sm:$0xff] }
  0xc5   :  { %v328_v18 = vsub.f32 1.0, %v327_v4  ;;  %v341_v19 = vmul.f32 0.0, %v316_v15 }
  0xc7   :  { %v329_v22 = vmul.f32 %v1687_v0, %v328_v18  ;;  %v343_v27 = vadd.f32 %v342_v20, %v341_v19 }
  0xc9   :  { %v330_v28 = vadd.f32 %v1687_v0, %v329_v22  ;;  %1690 = vtanh.f32 %v343_v27  ;;  %v2200_v32 = vsel %vm358_vm9, %v343_v27, 0.0 }
  0xcb   :  { %v334_v36 = vsel %vm333_vm12, %v1687_v0, %v330_v28 }
  0xcc   :  { %v339_v48 = vsel %vm336_vm13, %v338_v39, %v334_v36 }
  0xcf   :  { %v1691_v47 = vpop.eup %1690 }
  0xd0   :  { %v345_v49 = vmul.f32 %v1691_v47, %v339_v48 }
  0xd2   :  { %v347_v51 = vmul.f32 %v346_v11, %v345_v49  ;;  %v2205_v52 = vsel %vm358_vm9, %v345_v49, 0.0  ;;  %v1578_v53 = vpack.c.bf16 %v345_v49, %v345_v49 }
  0xd4   :  { %349 = vst.msk [vmem:[%s2590_s3] sm:$0xf] %vm348_vm14, %v347_v51  ;;  %1579 = vmatmul.msk.bf16.vlgmr.msrb.gmra.mxu0 %vm1577_vm15, %v1578_v53  ;;  %1582 = vmatmul.msk.bf16.vlgmr.msrb.gmra.mxu1 %vm1577_vm15, %v1578_v53 }
  0xd5   :  { %351 = vst [vmem:[#allocation1] ss:$2 sm:$0xff] %v347_v51  ;;  %1585 = vmatmul.msk.bf16.vlgmr.msrb.gmra.mxu2 %vm1577_vm15, %v1578_v53  ;;  %1588 = vmatmul.msk.bf16.vlgmr.msrb.gmra.mxu3 %vm1577_vm15, %v1578_v53 }
  0xd6   :  { %671 = vmatpush.bf16.msrb.mxu0 %v1845_v3  ;;  %684 = vmatpush.bf16.msrb.mxu1 %v1856_v7 }
  0xd7   :  { %697 = vmatpush.bf16.msrb.mxu2 %v1858_v8  ;;  %710 = vmatpush.bf16.msrb.mxu3 %v1870_v12 }
  0xda   :  { %672 = vmatpush.bf16.msrb.mxu0 %v1883_v16  ;;  %685 = vmatpush.bf16.msrb.mxu1 %v1885_v17 }
  0xdb   :  { %698 = vmatpush.bf16.msrb.mxu2 %v1897_v21  ;;  %711 = vmatpush.bf16.msrb.mxu3 %v1908_v25 }
  0xdc   :  { %v352_v37 = vld.sshfl [vmem:[#allocation1] sm:$0xff pattern:$0x75316420] }
  0xdd   :  { %353 = vrot.lane.b32.xlu0 %v352_v37, %s1805_s28 }
  0xde   :  { %673 = vmatpush.bf16.msrb.mxu0 %v1920_v29  ;;  %686 = vmatpush.bf16.msrb.mxu1 %v1933_v33 }
  0xdf   :  { %699 = vmatpush.bf16.msrb.mxu2 %v1935_v34  ;;  %712 = vmatpush.bf16.msrb.mxu3 %v1947_v38 }
  0xe2   :  { %674 = vmatpush.bf16.msrb.mxu0 %v1965_v44  ;;  %687 = vmatpush.bf16.msrb.mxu1 %v1969_v45 }
  0xe3   :  { %700 = vmatpush.bf16.msrb.mxu2 %v1971_v46  ;;  %713 = vmatpush.bf16.msrb.mxu3 %v1983_v50 }
  0xe6   :  { %675 = vmatpush.bf16.msrb.mxu0 %v2001_v56  ;;  %688 = vmatpush.bf16.msrb.mxu1 %v2005_v57 }
  0xe7   :  { %701 = vmatpush.bf16.msrb.mxu2 %v2007_v58  ;;  %714 = vmatpush.bf16.msrb.mxu3 %v2019_v62 }
  0xea   :  { %676 = vmatpush.bf16.msrb.mxu0 %v2037_v5  ;;  %689 = vmatpush.bf16.msrb.mxu1 %v2041_v6 }
  0xeb   :  { %702 = vmatpush.bf16.msrb.mxu2 %v2043_v9  ;;  %715 = vmatpush.bf16.msrb.mxu3 %v2055_v14 }
  0xee   :  { %677 = vmatpush.bf16.msrb.mxu0 %v2073_v23  ;;  %690 = vmatpush.bf16.msrb.mxu1 %v2077_v24 }
  0xef   :  { %703 = vmatpush.bf16.msrb.mxu2 %v2079_v26  ;;  %716 = vmatpush.bf16.msrb.mxu3 %v2091_v31 }
  0xf2   :  { %678 = vmatpush.bf16.msrb.mxu0 %v2109_v40  ;;  %691 = vmatpush.bf16.msrb.mxu1 %v2113_v41 }
  0xf3   :  { %704 = vmatpush.bf16.msrb.mxu2 %v2115_v42  ;;  %717 = vmatpush.bf16.msrb.mxu3 %v2118_v43 }
 0x14f   :  { %v354_v54 = vpop.permute.xlu0 %353 }
 0x150   :  { %1574 = vst.msk [vmem:[%s2591_s4 + $0x1c] sm:$0xf] %vm348_vm14, %v354_v54 }
 0x151   :  { %v374_v55 = vpop.f32.mrf.mxu0  ;;  %v387_v59 = vpop.f32.mrf.mxu1 }
 0x152   :  { %v421_v61 = vrot.slane %v387_v59, 4 }
 0x154   :  { %v423_v63 = vsel %vm270_vm0, %v374_v55, %v421_v61 }
 0x155   :  { %v427_v0 = vadd.f32 %v1575_v60, %v423_v63 }
 0x157   :  { %v1589_v1 = vmul.f32 -1.442695, %v427_v0  ;;  %v449_v2 = vrot.slane %v427_v0, 4 }
 0x158   :  { %v400_v4 = vpop.f32.mrf.mxu2  ;;  %v413_v10 = vpop.f32.mrf.mxu3 }
 0x159   :  { %1692 = vpow2.f32 %v1589_v1  ;;  %v1590_v11 = vmul.f32 -1.442695, %v449_v2  ;;  %v422_v15 = vrot.slane %v413_v10, 4  ;;  %v376_v18 = vpop.f32.mrf.mxu0  ;;  %v389_v19 = vpop.f32.mrf.mxu1 }
 0x15b   :  { %1694 = vpow2.f32 %v1590_v11  ;;  %v424_v20 = vsel %vm270_vm0, %v400_v4, %v422_v15 }
 0x15c   :  { %v428_v22 = vadd.f32 %v1576_v13, %v424_v20 }
 0x15e   :  { %v472_v27 = vrot.slane %v428_v22, 4 }
 0x15f   :  { %v1693_v28 = vpop.eup %1692 }
 0x160   :  { %v432_v30 = vadd.f32 1.0, %v1693_v28  ;;  %v1591_v35 = vmul.f32 -1.442695, %v472_v27  ;;  %v402_v36 = vpop.f32.mrf.mxu2  ;;  %v415_v39 = vpop.f32.mrf.mxu3 }
 0x161   :  { %v1695_v47 = vpop.eup %1694 }
 0x162   :  { %1696 = vrcp.f32 %v432_v30  ;;  %v454_v48 = vadd.f32 1.0, %v1695_v47  ;;  %v444_v60 = vand.u32 2147483648, %v432_v30  ;;  %v442_v0 = vand.u32 2147483647, %v432_v30 }
 0x163   :  { %1698 = vpow2.f32 %v1591_v35  ;;  %vm438_vm2 = vweird.f32 %v432_v30 }
 0x164   :  { %1700 = vrcp.f32 %v454_v48  ;;  %v466_v1 = vand.u32 2147483648, %v454_v48  ;;  %v464_v10 = vand.u32 2147483647, %v454_v48  ;;  %v445_v11 = vor.u32 1.1754944e-38, %v444_v60 }
 0x165   :  { %vm460_vm5 = vweird.f32 %v454_v48  ;;  %vm443_vm6 = vcmp.eq.f32.partialorder %v442_v0, 8.507059e+37 }
 0x166   :  { %v467_v19 = vor.u32 1.1754944e-38, %v466_v1  ;;  %vm465_vm8 = vcmp.eq.f32.partialorder %v464_v10, 8.507059e+37 }
 0x168   :  { %v1697_v49 = vpop.eup %1696 }
 0x169   :  { %v1699_v51 = vpop.eup %1698  ;;  %v434_v53 = vmul.f32 %v1697_v49, %v432_v30  ;;  %vm439_vm1 = vweird.f32 %v1697_v49 }
 0x16a   :  { %v1701_v37 = vpop.eup %1700  ;;  %v477_v54 = vadd.f32 1.0, %v1699_v51  ;;  %vm440_vm4 = vmor %vm438_vm2, %vm439_vm1 }
 0x16b   :  { %v435_v55 = vsub.f32 1.0, %v434_v53  ;;  %v456_v59 = vmul.f32 %v1701_v37, %v454_v48  ;;  %vm461_vm3 = vweird.f32 %v1701_v37 }
 0x16c   :  { %1702 = vrcp.f32 %v477_v54  ;;  %vm462_vm7 = vmor %vm460_vm5, %vm461_vm3  ;;  %v489_v53 = vand.u32 2147483648, %v477_v54  ;;  %vm483_vm11 = vweird.f32 %v477_v54 }
 0x16d   :  { %v457_v61 = vsub.f32 1.0, %v456_v59  ;;  %v436_v63 = vmul.f32 %v1697_v49, %v435_v55  ;;  %1704 = vtanh.f32 %v428_v22  ;;  %v1592_v22 = vld [vmem:[%s2589_s1 + $0x4] sm:$0xf]  ;;  %v487_v55 = vand.u32 2147483647, %v477_v54 }
 0x16e   :  { %vm511_vm9 = vcmp.gt.f32.partialorder %v1592_v22, 0.0  ;;  %v490_v60 = vor.u32 1.1754944e-38, %v489_v53 }
 0x16f   :  { %v458_v2 = vmul.f32 %v1701_v37, %v457_v61  ;;  %v437_v4 = vadd.f32 %v1697_v49, %v436_v63  ;;  %vm488_vm13 = vcmp.eq.f32.partialorder %v487_v55, 8.507059e+37 }
 0x171   :  { %v441_v13 = vsel %vm440_vm4, %v1697_v49, %v437_v4  ;;  %v459_v15 = vadd.f32 %v1701_v37, %v458_v2 }
 0x172   :  { %v1703_v18 = vpop.eup %1702  ;;  %v446_v20 = vsel %vm443_vm6, %v445_v11, %v441_v13  ;;  %v1595_v11 = vld [vmem:[%s2588_s0 + $0x20] sm:$0xff] }
 0x173   :  { %v463_v27 = vsel %vm462_vm7, %v1701_v37, %v459_v15  ;;  %v479_v28 = vmul.f32 %v1703_v18, %v477_v54  ;;  %v1705_v30 = vpop.eup %1704  ;;  %vm484_vm10 = vweird.f32 %v1703_v18 }
 0x174   :  { %v468_v35 = vsel %vm465_vm8, %v467_v19, %v463_v27  ;;  %v494_v47 = vmul.f32 %v1705_v30, %v446_v20  ;;  %vm485_vm12 = vmor %vm483_vm11, %vm484_vm10  ;;  %v1596_v30 = vld [vmem:[%s2588_s0 + $0x28] sm:$0xff] }
 0x175   :  { %v480_v36 = vsub.f32 1.0, %v479_v28  ;;  %v493_v39 = vmul.f32 %v468_v35, %v2200_v32 }
 0x177   :  { %v495_v48 = vadd.f32 %v494_v47, %v493_v39  ;;  %v481_v49 = vmul.f32 %v1703_v18, %v480_v36 }
 0x179   :  { %1706 = vtanh.f32 %v495_v48  ;;  %v482_v51 = vadd.f32 %v1703_v18, %v481_v49  ;;  %v2262_v37 = vsel %vm511_vm9, %v495_v48, %v2200_v32 }
 0x17b   :  { %v486_v59 = vsel %vm485_vm12, %v1703_v18, %v482_v51 }
 0x17c   :  { %v491_v63 = vsel %vm488_vm13, %v490_v60, %v486_v59 }
 0x17f   :  { %v1707_v61 = vpop.eup %1706 }
 0x180   :  { %v497_v0 = vmul.f32 %v1707_v61, %v491_v63 }
 0x182   :  { %v500_v1 = vmul.f32 %v1592_v22, %v497_v0  ;;  %v2266_v2 = vsel %vm511_vm9, %v497_v0, %v2205_v52 }
 0x183   :  { %v517_v4 = vpack.c.bf16 %v2266_v2, %v2266_v2 }
 0x184   :  { %1593 = vst.msk [vmem:[%s2590_s3 + $0x4] sm:$0xf] %vm348_vm14, %v500_v1 }
 0x185   :  { %504 = vst [vmem:[#allocation1] ss:$2 sm:$0xff] %v500_v1  ;;  %526 = vmatmul.bf16.vlgmr.msra.gmra.mxu0 %v517_v4  ;;  %539 = vmatmul.bf16.vlgmr.msra.gmra.mxu1 %v517_v4 }
 0x186   :  { %552 = vmatmul.bf16.vlgmr.msra.gmra.mxu2 %v517_v4  ;;  %565 = vmatmul.bf16.vlgmr.msra.gmra.mxu3 %v517_v4 }
 0x187   :  { %824 = vmatpush.bf16.msra.mxu0 %v1845_v3  ;;  %837 = vmatpush.bf16.msra.mxu1 %v1856_v7 }
 0x188   :  { %850 = vmatpush.bf16.msra.mxu2 %v1858_v8  ;;  %863 = vmatpush.bf16.msra.mxu3 %v1870_v12 }
 0x18b   :  { %825 = vmatpush.bf16.msra.mxu0 %v1883_v16  ;;  %838 = vmatpush.bf16.msra.mxu1 %v1885_v17 }
 0x18c   :  { %v505_v32 = vld.sshfl [vmem:[#allocation1] sm:$0xff pattern:$0x75316420]  ;;  %851 = vmatpush.bf16.msra.mxu2 %v1897_v21  ;;  %864 = vmatpush.bf16.msra.mxu3 %v1908_v25 }
 0x18d   :  { %506 = vrot.lane.b32.xlu0 %v505_v32, %s1805_s28 }
 0x18f   :  { %826 = vmatpush.bf16.msra.mxu0 %v1920_v29  ;;  %839 = vmatpush.bf16.msra.mxu1 %v1933_v33 }
 0x190   :  { %852 = vmatpush.bf16.msra.mxu2 %v1935_v34  ;;  %865 = vmatpush.bf16.msra.mxu3 %v1947_v38 }
 0x193   :  { %827 = vmatpush.bf16.msra.mxu0 %v1965_v44  ;;  %840 = vmatpush.bf16.msra.mxu1 %v1969_v45 }
 0x194   :  { %853 = vmatpush.bf16.msra.mxu2 %v1971_v46  ;;  %866 = vmatpush.bf16.msra.mxu3 %v1983_v50 }
 0x197   :  { %828 = vmatpush.bf16.msra.mxu0 %v2001_v56  ;;  %841 = vmatpush.bf16.msra.mxu1 %v2005_v57 }
 0x198   :  { %854 = vmatpush.bf16.msra.mxu2 %v2007_v58  ;;  %867 = vmatpush.bf16.msra.mxu3 %v2019_v62 }
 0x19b   :  { %829 = vmatpush.bf16.msra.mxu0 %v2037_v5  ;;  %842 = vmatpush.bf16.msra.mxu1 %v2041_v6 }
 0x19c   :  { %855 = vmatpush.bf16.msra.mxu2 %v2043_v9  ;;  %868 = vmatpush.bf16.msra.mxu3 %v2055_v14 }
 0x19f   :  { %830 = vmatpush.bf16.msra.mxu0 %v2073_v23  ;;  %843 = vmatpush.bf16.msra.mxu1 %v2077_v24 }
 0x1a0   :  { %856 = vmatpush.bf16.msra.mxu2 %v2079_v26  ;;  %869 = vmatpush.bf16.msra.mxu3 %v2091_v31 }
 0x1a3   :  { %831 = vmatpush.bf16.msra.mxu0 %v2109_v40  ;;  %844 = vmatpush.bf16.msra.mxu1 %v2113_v41 }
 0x1a4   :  { %857 = vmatpush.bf16.msra.mxu2 %v2115_v42  ;;  %870 = vmatpush.bf16.msra.mxu3 %v2118_v43 }
 0x1ff   :  { %v507_v52 = vpop.permute.xlu0 %506 }
 0x200   :  { %1594 = vst.msk [vmem:[%s2591_s4 + $0x18] sm:$0xf] %vm348_vm14, %v507_v52 }
 0x202   :  { %v527_v54 = vpop.f32.mrf.mxu0  ;;  %v540_v10 = vpop.f32.mrf.mxu1 }
 0x203   :  { %v574_v13 = vrot.slane %v540_v10, 4 }
 0x205   :  { %v576_v15 = vsel %vm270_vm0, %v527_v54, %v574_v13 }
 0x206   :  { %v580_v18 = vadd.f32 %v1595_v11, %v576_v15 }
 0x208   :  { %v1597_v19 = vmul.f32 -1.442695, %v580_v18  ;;  %v602_v20 = vrot.slane %v580_v18, 4 }
 0x209   :  { %v553_v27 = vpop.f32.mrf.mxu2  ;;  %v566_v28 = vpop.f32.mrf.mxu3 }
 0x20a   :  { %1708 = vpow2.f32 %v1597_v19  ;;  %v1598_v22 = vmul.f32 -1.442695, %v602_v20  ;;  %v575_v35 = vrot.slane %v566_v28, 4  ;;  %v529_v36 = vpop.f32.mrf.mxu0  ;;  %v542_v39 = vpop.f32.mrf.mxu1 }
 0x20c   :  { %1710 = vpow2.f32 %v1598_v22  ;;  %v577_v47 = vsel %vm270_vm0, %v553_v27, %v575_v35 }
 0x20d   :  { %v581_v48 = vadd.f32 %v1596_v30, %v577_v47 }
 0x20f   :  { %v625_v49 = vrot.slane %v581_v48, 4 }
 0x210   :  { %v1709_v51 = vpop.eup %1708 }
 0x211   :  { %v585_v53 = vadd.f32 1.0, %v1709_v51  ;;  %v1599_v55 = vmul.f32 -1.442695, %v625_v49  ;;  %v555_v59 = vpop.f32.mrf.mxu2  ;;  %v568_v60 = vpop.f32.mrf.mxu3 }
 0x212   :  { %v1711_v61 = vpop.eup %1710 }
 0x213   :  { %1712 = vrcp.f32 %v585_v53  ;;  %v607_v63 = vadd.f32 1.0, %v1711_v61  ;;  %v597_v11 = vand.u32 2147483648, %v585_v53  ;;  %v595_v18 = vand.u32 2147483647, %v585_v53 }
 0x214   :  { %1714 = vpow2.f32 %v1599_v55  ;;  %vm591_vm1 = vweird.f32 %v585_v53 }
 0x215   :  { %1716 = vrcp.f32 %v607_v63  ;;  %v619_v19 = vand.u32 2147483648, %v607_v63  ;;  %v617_v28 = vand.u32 2147483647, %v607_v63  ;;  %v598_v22 = vor.u32 1.1754944e-38, %v597_v11 }
 0x216   :  { %vm613_vm4 = vweird.f32 %v607_v63  ;;  %vm596_vm5 = vcmp.eq.f32.partialorder %v595_v18, 8.507059e+37 }
 0x217   :  { %v620_v39 = vor.u32 1.1754944e-38, %v619_v19  ;;  %vm618_vm7 = vcmp.eq.f32.partialorder %v617_v28, 8.507059e+37 }
 0x219   :  { %v1713_v0 = vpop.eup %1712 }
 0x21a   :  { %v1715_v1 = vpop.eup %1714  ;;  %v587_v4 = vmul.f32 %v1713_v0, %v585_v53  ;;  %vm592_vm15 = vweird.f32 %v1713_v0 }
 0x21b   :  { %v1717_v32 = vpop.eup %1716  ;;  %v630_v52 = vadd.f32 1.0, %v1715_v1  ;;  %vm593_vm3 = vmor %vm591_vm1, %vm592_vm15 }
 0x21c   :  { %v588_v54 = vsub.f32 1.0, %v587_v4  ;;  %v609_v10 = vmul.f32 %v1717_v32, %v607_v63  ;;  %vm614_vm2 = vweird.f32 %v1717_v32 }
 0x21d   :  { %1718 = vrcp.f32 %v630_v52  ;;  %vm615_vm6 = vmor %vm613_vm4, %vm614_vm2  ;;  %v642_v4 = vand.u32 2147483648, %v630_v52  ;;  %vm636_vm10 = vweird.f32 %v630_v52 }
 0x21e   :  { %v610_v13 = vsub.f32 1.0, %v609_v10  ;;  %v589_v15 = vmul.f32 %v1713_v0, %v588_v54  ;;  %1720 = vtanh.f32 %v581_v48  ;;  %v1600_v48 = vld [vmem:[%s2589_s1 + $0x8] sm:$0xf]  ;;  %v640_v54 = vand.u32 2147483647, %v630_v52 }
 0x21f   :  { %vm664_vm8 = vcmp.gt.f32.partialorder %v1600_v48, 0.0  ;;  %v643_v11 = vor.u32 1.1754944e-38, %v642_v4 }
 0x220   :  { %v611_v20 = vmul.f32 %v1717_v32, %v610_v13  ;;  %v590_v27 = vadd.f32 %v1713_v0, %v589_v15  ;;  %vm641_vm12 = vcmp.eq.f32.partialorder %v640_v54, 8.507059e+37 }
 0x222   :  { %v594_v30 = vsel %vm593_vm3, %v1713_v0, %v590_v27  ;;  %v612_v35 = vadd.f32 %v1717_v32, %v611_v20 }
 0x223   :  { %v1719_v36 = vpop.eup %1718  ;;  %v599_v47 = vsel %vm596_vm5, %v598_v22, %v594_v30  ;;  %v1603_v22 = vld [vmem:[%s2588_s0 + $0x30] sm:$0xff] }
 0x224   :  { %v616_v49 = vsel %vm615_vm6, %v1717_v32, %v612_v35  ;;  %v632_v51 = vmul.f32 %v1719_v36, %v630_v52  ;;  %v1721_v53 = vpop.eup %1720  ;;  %vm637_vm9 = vweird.f32 %v1719_v36 }
 0x225   :  { %v621_v55 = vsel %vm618_vm7, %v620_v39, %v616_v49  ;;  %v647_v61 = vmul.f32 %v1721_v53, %v599_v47  ;;  %vm638_vm11 = vmor %vm636_vm10, %vm637_vm9  ;;  %v1604_v53 = vld [vmem:[%s2588_s0 + $0x38] sm:$0xff] }
 0x226   :  { %v633_v59 = vsub.f32 1.0, %v632_v51  ;;  %v646_v60 = vmul.f32 %v621_v55, %v2262_v37 }
 0x228   :  { %v648_v63 = vadd.f32 %v647_v61, %v646_v60  ;;  %v634_v0 = vmul.f32 %v1719_v36, %v633_v59 }
 0x22a   :  { %1722 = vtanh.f32 %v648_v63  ;;  %v635_v1 = vadd.f32 %v1719_v36, %v634_v0  ;;  %v2325_v32 = vsel %vm664_vm8, %v648_v63, %v2262_v37 }
 0x22c   :  { %v639_v10 = vsel %vm638_vm11, %v1719_v36, %v635_v1 }
 0x22d   :  { %v644_v15 = vsel %vm641_vm12, %v643_v11, %v639_v10 }
 0x230   :  { %v1723_v13 = vpop.eup %1722 }
 0x231   :  { %v650_v18 = vmul.f32 %v1723_v13, %v644_v15 }
 0x233   :  { %v653_v19 = vmul.f32 %v1600_v48, %v650_v18  ;;  %v2329_v20 = vsel %vm664_vm8, %v650_v18, %v2266_v2 }
 0x234   :  { %v670_v27 = vpack.c.bf16 %v2329_v20, %v2329_v20 }
 0x235   :  { %1601 = vst.msk [vmem:[%s2590_s3 + $0x8] sm:$0xf] %vm348_vm14, %v653_v19 }
 0x236   :  { %657 = vst [vmem:[#allocation1] ss:$2 sm:$0xff] %v653_v19  ;;  %679 = vmatmul.bf16.vlgmr.msrb.gmra.mxu0 %v670_v27  ;;  %692 = vmatmul.bf16.vlgmr.msrb.gmra.mxu1 %v670_v27 }
 0x237   :  { %705 = vmatmul.bf16.vlgmr.msrb.gmra.mxu2 %v670_v27  ;;  %718 = vmatmul.bf16.vlgmr.msrb.gmra.mxu3 %v670_v27 }
 0x238   :  { %977 = vmatpush.bf16.msrb.mxu0 %v1845_v3  ;;  %990 = vmatpush.bf16.msrb.mxu1 %v1856_v7 }
 0x239   :  { %1003 = vmatpush.bf16.msrb.mxu2 %v1858_v8  ;;  %1016 = vmatpush.bf16.msrb.mxu3 %v1870_v12 }
 0x23c   :  { %978 = vmatpush.bf16.msrb.mxu0 %v1883_v16  ;;  %991 = vmatpush.bf16.msrb.mxu1 %v1885_v17 }
 0x23d   :  { %v658_v37 = vld.sshfl [vmem:[#allocation1] sm:$0xff pattern:$0x75316420]  ;;  %1004 = vmatpush.bf16.msrb.mxu2 %v1897_v21  ;;  %1017 = vmatpush.bf16.msrb.mxu3 %v1908_v25 }
 0x23e   :  { %659 = vrot.lane.b32.xlu1 %v658_v37, %s1805_s28 }
 0x240   :  { %979 = vmatpush.bf16.msrb.mxu0 %v1920_v29  ;;  %992 = vmatpush.bf16.msrb.mxu1 %v1933_v33 }
 0x241   :  { %1005 = vmatpush.bf16.msrb.mxu2 %v1935_v34  ;;  %1018 = vmatpush.bf16.msrb.mxu3 %v1947_v38 }
 0x244   :  { %980 = vmatpush.bf16.msrb.mxu0 %v1965_v44  ;;  %993 = vmatpush.bf16.msrb.mxu1 %v1969_v45 }
 0x245   :  { %1006 = vmatpush.bf16.msrb.mxu2 %v1971_v46  ;;  %1019 = vmatpush.bf16.msrb.mxu3 %v1983_v50 }
 0x248   :  { %981 = vmatpush.bf16.msrb.mxu0 %v2001_v56  ;;  %994 = vmatpush.bf16.msrb.mxu1 %v2005_v57 }
 0x249   :  { %1007 = vmatpush.bf16.msrb.mxu2 %v2007_v58  ;;  %1020 = vmatpush.bf16.msrb.mxu3 %v2019_v62 }
 0x24c   :  { %982 = vmatpush.bf16.msrb.mxu0 %v2037_v5  ;;  %995 = vmatpush.bf16.msrb.mxu1 %v2041_v6 }
 0x24d   :  { %1008 = vmatpush.bf16.msrb.mxu2 %v2043_v9  ;;  %1021 = vmatpush.bf16.msrb.mxu3 %v2055_v14 }
 0x250   :  { %983 = vmatpush.bf16.msrb.mxu0 %v2073_v23  ;;  %996 = vmatpush.bf16.msrb.mxu1 %v2077_v24 }
 0x251   :  { %1009 = vmatpush.bf16.msrb.mxu2 %v2079_v26  ;;  %1022 = vmatpush.bf16.msrb.mxu3 %v2091_v31 }
 0x254   :  { %984 = vmatpush.bf16.msrb.mxu0 %v2109_v40  ;;  %997 = vmatpush.bf16.msrb.mxu1 %v2113_v41 }
 0x255   :  { %1010 = vmatpush.bf16.msrb.mxu2 %v2115_v42  ;;  %1023 = vmatpush.bf16.msrb.mxu3 %v2118_v43 }
 0x2b0   :  { %v660_v2 = vpop.permute.xlu1 %659 }
 0x2b1   :  { %1602 = vst.msk [vmem:[%s2591_s4 + $0x14] sm:$0xf] %vm348_vm14, %v660_v2 }
 0x2b3   :  { %v680_v52 = vpop.f32.mrf.mxu0  ;;  %v693_v28 = vpop.f32.mrf.mxu1 }
 0x2b4   :  { %v727_v30 = vrot.slane %v693_v28, 4 }
 0x2b6   :  { %v729_v35 = vsel %vm270_vm0, %v680_v52, %v727_v30 }
 0x2b7   :  { %v733_v36 = vadd.f32 %v1603_v22, %v729_v35 }
 0x2b9   :  { %v1605_v39 = vmul.f32 -1.442695, %v733_v36  ;;  %v755_v47 = vrot.slane %v733_v36, 4 }
 0x2ba   :  { %v706_v49 = vpop.f32.mrf.mxu2  ;;  %v719_v51 = vpop.f32.mrf.mxu3 }
 0x2bb   :  { %1724 = vpow2.f32 %v1605_v39  ;;  %v1606_v48 = vmul.f32 -1.442695, %v755_v47  ;;  %v728_v55 = vrot.slane %v719_v51, 4  ;;  %v682_v59 = vpop.f32.mrf.mxu0  ;;  %v695_v60 = vpop.f32.mrf.mxu1 }
 0x2bd   :  { %1726 = vpow2.f32 %v1606_v48  ;;  %v730_v61 = vsel %vm270_vm0, %v706_v49, %v728_v55 }
 0x2be   :  { %v734_v63 = vadd.f32 %v1604_v53, %v730_v61 }
 0x2c0   :  { %v778_v0 = vrot.slane %v734_v63, 4 }
 0x2c1   :  { %v1725_v1 = vpop.eup %1724 }
 0x2c2   :  { %v738_v4 = vadd.f32 1.0, %v1725_v1  ;;  %v1607_v54 = vmul.f32 -1.442695, %v778_v0  ;;  %v708_v10 = vpop.f32.mrf.mxu2  ;;  %v721_v11 = vpop.f32.mrf.mxu3 }
 0x2c3   :  { %v1727_v13 = vpop.eup %1726 }
 0x2c4   :  { %1728 = vrcp.f32 %v738_v4  ;;  %v760_v15 = vadd.f32 1.0, %v1727_v13  ;;  %v750_v22 = vand.u32 2147483648, %v738_v4  ;;  %v748_v36 = vand.u32 2147483647, %v738_v4 }
 0x2c5   :  { %1730 = vpow2.f32 %v1607_v54  ;;  %vm744_vm15 = vweird.f32 %v738_v4 }
 0x2c6   :  { %1732 = vrcp.f32 %v760_v15  ;;  %v772_v39 = vand.u32 2147483648, %v760_v15  ;;  %v770_v51 = vand.u32 2147483647, %v760_v15  ;;  %v751_v48 = vor.u32 1.1754944e-38, %v750_v22 }
 0x2c7   :  { %vm766_vm3 = vweird.f32 %v760_v15  ;;  %vm749_vm4 = vcmp.eq.f32.partialorder %v748_v36, 8.507059e+37 }
 0x2c8   :  { %v773_v60 = vor.u32 1.1754944e-38, %v772_v39  ;;  %vm771_vm6 = vcmp.eq.f32.partialorder %v770_v51, 8.507059e+37 }
 0x2ca   :  { %v1729_v18 = vpop.eup %1728 }
 0x2cb   :  { %v1731_v19 = vpop.eup %1730  ;;  %v740_v27 = vmul.f32 %v1729_v18, %v738_v4  ;;  %vm745_vm13 = vweird.f32 %v1729_v18 }
 0x2cc   :  { %v1733_v37 = vpop.eup %1732  ;;  %v783_v2 = vadd.f32 1.0, %v1731_v19  ;;  %vm746_vm2 = vmor %vm744_vm15, %vm745_vm13 }
 0x2cd   :  { %v741_v52 = vsub.f32 1.0, %v740_v27  ;;  %v762_v28 = vmul.f32 %v1733_v37, %v760_v15  ;;  %vm767_vm1 = vweird.f32 %v1733_v37 }
 0x2ce   :  { %1734 = vrcp.f32 %v783_v2  ;;  %vm768_vm5 = vmor %vm766_vm3, %vm767_vm1  ;;  %v795_v27 = vand.u32 2147483648, %v783_v2  ;;  %vm789_vm9 = vweird.f32 %v783_v2 }
 0x2cf   :  { %v763_v30 = vsub.f32 1.0, %v762_v28  ;;  %v742_v35 = vmul.f32 %v1729_v18, %v741_v52  ;;  %1736 = vtanh.f32 %v734_v63  ;;  %v1608_v63 = vld [vmem:[%s2589_s1 + $0xc] sm:$0xf]  ;;  %v793_v52 = vand.u32 2147483647, %v783_v2 }
 0x2d0   :  { %vm817_vm7 = vcmp.gt.f32.partialorder %v1608_v63, 0.0  ;;  %v796_v22 = vor.u32 1.1754944e-38, %v795_v27 }
 0x2d1   :  { %v764_v47 = vmul.f32 %v1733_v37, %v763_v30  ;;  %v743_v49 = vadd.f32 %v1729_v18, %v742_v35  ;;  %vm794_vm11 = vcmp.eq.f32.partialorder %v793_v52, 8.507059e+37 }
 0x2d3   :  { %v747_v53 = vsel %vm746_vm2, %v1729_v18, %v743_v49  ;;  %v765_v55 = vadd.f32 %v1733_v37, %v764_v47 }
 0x2d4   :  { %v1735_v59 = vpop.eup %1734  ;;  %v752_v61 = vsel %vm749_vm4, %v751_v48, %v747_v53  ;;  %v1611_v48 = vld [vmem:[%s2588_s0 + $0x40] sm:$0xff] }
 0x2d5   :  { %v769_v0 = vsel %vm768_vm5, %v1733_v37, %v765_v55  ;;  %v785_v1 = vmul.f32 %v1735_v59, %v783_v2  ;;  %v1737_v4 = vpop.eup %1736  ;;  %vm790_vm8 = vweird.f32 %v1735_v59 }
 0x2d6   :  { %v774_v54 = vsel %vm771_vm6, %v773_v60, %v769_v0  ;;  %v800_v13 = vmul.f32 %v1737_v4, %v752_v61  ;;  %vm791_vm10 = vmor %vm789_vm9, %vm790_vm8  ;;  %v1612_v4 = vld [vmem:[%s2588_s0 + $0x48] sm:$0xff] }
 0x2d7   :  { %v786_v10 = vsub.f32 1.0, %v785_v1  ;;  %v799_v11 = vmul.f32 %v774_v54, %v2325_v32 }
 0x2d9   :  { %v801_v15 = vadd.f32 %v800_v13, %v799_v11  ;;  %v787_v18 = vmul.f32 %v1735_v59, %v786_v10 }
 0x2db   :  { %1738 = vtanh.f32 %v801_v15  ;;  %v788_v19 = vadd.f32 %v1735_v59, %v787_v18  ;;  %v2388_v37 = vsel %vm817_vm7, %v801_v15, %v2325_v32 }
 0x2dd   :  { %v792_v28 = vsel %vm791_vm10, %v1735_v59, %v788_v19 }
 0x2de   :  { %v797_v35 = vsel %vm794_vm11, %v796_v22, %v792_v28 }
 0x2e1   :  { %v1739_v30 = vpop.eup %1738 }
 0x2e2   :  { %v803_v36 = vmul.f32 %v1739_v30, %v797_v35 }
 0x2e4   :  { %v806_v39 = vmul.f32 %v1608_v63, %v803_v36  ;;  %v2392_v47 = vsel %vm817_vm7, %v803_v36, %v2329_v20 }
 0x2e5   :  { %v823_v49 = vpack.c.bf16 %v2392_v47, %v2392_v47 }
 0x2e6   :  { %1609 = vst.msk [vmem:[%s2590_s3 + $0xc] sm:$0xf] %vm348_vm14, %v806_v39 }
 0x2e7   :  { %810 = vst [vmem:[#allocation1] ss:$2 sm:$0xff] %v806_v39  ;;  %832 = vmatmul.bf16.vlgmr.msra.gmra.mxu0 %v823_v49  ;;  %845 = vmatmul.bf16.vlgmr.msra.gmra.mxu1 %v823_v49 }
 0x2e8   :  { %858 = vmatmul.bf16.vlgmr.msra.gmra.mxu2 %v823_v49  ;;  %871 = vmatmul.bf16.vlgmr.msra.gmra.mxu3 %v823_v49 }
 0x2e9   :  { %1130 = vmatpush.bf16.msra.mxu0 %v1845_v3  ;;  %1143 = vmatpush.bf16.msra.mxu1 %v1856_v7 }
 0x2ea   :  { %1156 = vmatpush.bf16.msra.mxu2 %v1858_v8  ;;  %1169 = vmatpush.bf16.msra.mxu3 %v1870_v12 }
 0x2ed   :  { %1131 = vmatpush.bf16.msra.mxu0 %v1883_v16  ;;  %1144 = vmatpush.bf16.msra.mxu1 %v1885_v17 }
 0x2ee   :  { %v811_v32 = vld.sshfl [vmem:[#allocation1] sm:$0xff pattern:$0x75316420]  ;;  %1157 = vmatpush.bf16.msra.mxu2 %v1897_v21  ;;  %1170 = vmatpush.bf16.msra.mxu3 %v1908_v25 }
 0x2ef   :  { %812 = vrot.lane.b32.xlu1 %v811_v32, %s1805_s28 }
 0x2f1   :  { %1132 = vmatpush.bf16.msra.mxu0 %v1920_v29  ;;  %1145 = vmatpush.bf16.msra.mxu1 %v1933_v33 }
 0x2f2   :  { %1158 = vmatpush.bf16.msra.mxu2 %v1935_v34  ;;  %1171 = vmatpush.bf16.msra.mxu3 %v1947_v38 }
 0x2f5   :  { %1133 = vmatpush.bf16.msra.mxu0 %v1965_v44  ;;  %1146 = vmatpush.bf16.msra.mxu1 %v1969_v45 }
 0x2f6   :  { %1159 = vmatpush.bf16.msra.mxu2 %v1971_v46  ;;  %1172 = vmatpush.bf16.msra.mxu3 %v1983_v50 }
 0x2f9   :  { %1134 = vmatpush.bf16.msra.mxu0 %v2001_v56  ;;  %1147 = vmatpush.bf16.msra.mxu1 %v2005_v57 }
 0x2fa   :  { %1160 = vmatpush.bf16.msra.mxu2 %v2007_v58  ;;  %1173 = vmatpush.bf16.msra.mxu3 %v2019_v62 }
 0x2fd   :  { %1135 = vmatpush.bf16.msra.mxu0 %v2037_v5  ;;  %1148 = vmatpush.bf16.msra.mxu1 %v2041_v6 }
 0x2fe   :  { %1161 = vmatpush.bf16.msra.mxu2 %v2043_v9  ;;  %1174 = vmatpush.bf16.msra.mxu3 %v2055_v14 }
 0x301   :  { %1136 = vmatpush.bf16.msra.mxu0 %v2073_v23  ;;  %1149 = vmatpush.bf16.msra.mxu1 %v2077_v24 }
 0x302   :  { %1162 = vmatpush.bf16.msra.mxu2 %v2079_v26  ;;  %1175 = vmatpush.bf16.msra.mxu3 %v2091_v31 }
 0x305   :  { %1137 = vmatpush.bf16.msra.mxu0 %v2109_v40  ;;  %1150 = vmatpush.bf16.msra.mxu1 %v2113_v41 }
 0x306   :  { %1163 = vmatpush.bf16.msra.mxu2 %v2115_v42  ;;  %1176 = vmatpush.bf16.msra.mxu3 %v2118_v43 }
 0x361   :  { %v813_v20 = vpop.permute.xlu1 %812 }
 0x362   :  { %1610 = vst.msk [vmem:[%s2591_s4 + $0x10] sm:$0xf] %vm348_vm14, %v813_v20 }
 0x364   :  { %v833_v2 = vpop.f32.mrf.mxu0  ;;  %v846_v51 = vpop.f32.mrf.mxu1 }
 0x365   :  { %v880_v53 = vrot.slane %v846_v51, 4 }
 0x367   :  { %v882_v55 = vsel %vm270_vm0, %v833_v2, %v880_v53 }
 0x368   :  { %v886_v59 = vadd.f32 %v1611_v48, %v882_v55 }
 0x36a   :  { %v1613_v60 = vmul.f32 -1.442695, %v886_v59  ;;  %v908_v61 = vrot.slane %v886_v59, 4 }
 0x36b   :  { %v859_v0 = vpop.f32.mrf.mxu2  ;;  %v872_v1 = vpop.f32.mrf.mxu3 }
 0x36c   :  { %1740 = vpow2.f32 %v1613_v60  ;;  %v1614_v63 = vmul.f32 -1.442695, %v908_v61  ;;  %v881_v54 = vrot.slane %v872_v1, 4  ;;  %v835_v10 = vpop.f32.mrf.mxu0  ;;  %v848_v11 = vpop.f32.mrf.mxu1 }
 0x36e   :  { %1742 = vpow2.f32 %v1614_v63  ;;  %v883_v13 = vsel %vm270_vm0, %v859_v0, %v881_v54 }
 0x36f   :  { %v887_v15 = vadd.f32 %v1612_v4, %v883_v13 }
 0x371   :  { %v931_v18 = vrot.slane %v887_v15, 4 }
 0x372   :  { %v1741_v19 = vpop.eup %1740 }
 0x373   :  { %v891_v27 = vadd.f32 1.0, %v1741_v19  ;;  %v1615_v52 = vmul.f32 -1.442695, %v931_v18  ;;  %v861_v28 = vpop.f32.mrf.mxu2  ;;  %v874_v22 = vpop.f32.mrf.mxu3 }
 0x374   :  { %v1743_v30 = vpop.eup %1742 }
 0x375   :  { %1744 = vrcp.f32 %v891_v27  ;;  %v913_v35 = vadd.f32 1.0, %v1743_v30  ;;  %v903_v48 = vand.u32 2147483648, %v891_v27  ;;  %v901_v59 = vand.u32 2147483647, %v891_v27 }
 0x376   :  { %1746 = vpow2.f32 %v1615_v52  ;;  %vm897_vm13 = vweird.f32 %v891_v27 }
 0x377   :  { %1748 = vrcp.f32 %v913_v35  ;;  %v925_v60 = vand.u32 2147483648, %v913_v35  ;;  %v923_v1 = vand.u32 2147483647, %v913_v35  ;;  %v904_v63 = vor.u32 1.1754944e-38, %v903_v48 }
 0x378   :  { %vm919_vm2 = vweird.f32 %v913_v35  ;;  %vm902_vm3 = vcmp.eq.f32.partialorder %v901_v59, 8.507059e+37 }
 0x379   :  { %v926_v11 = vor.u32 1.1754944e-38, %v925_v60  ;;  %vm924_vm5 = vcmp.eq.f32.partialorder %v923_v1, 8.507059e+37 }
 0x37b   :  { %v1745_v36 = vpop.eup %1744 }
 0x37c   :  { %v1747_v39 = vpop.eup %1746  ;;  %v893_v49 = vmul.f32 %v1745_v36, %v891_v27  ;;  %vm898_vm12 = vweird.f32 %v1745_v36 }
 0x37d   :  { %v1749_v32 = vpop.eup %1748  ;;  %v936_v20 = vadd.f32 1.0, %v1747_v39  ;;  %vm899_vm1 = vmor %vm897_vm13, %vm898_vm12 }
 0x37e   :  { %v894_v2 = vsub.f32 1.0, %v893_v49  ;;  %v915_v51 = vmul.f32 %v1749_v32, %v913_v35  ;;  %vm920_vm15 = vweird.f32 %v1749_v32 }
 0x37f   :  { %1750 = vrcp.f32 %v936_v20  ;;  %vm921_vm4 = vmor %vm919_vm2, %vm920_vm15  ;;  %v948_v49 = vand.u32 2147483648, %v936_v20  ;;  %vm942_vm8 = vweird.f32 %v936_v20 }
 0x380   :  { %v916_v53 = vsub.f32 1.0, %v915_v51  ;;  %v895_v55 = vmul.f32 %v1745_v36, %v894_v2  ;;  %1752 = vtanh.f32 %v887_v15  ;;  %v1616_v15 = vld [vmem:[%s2589_s1 + $0x10] sm:$0xf]  ;;  %v946_v2 = vand.u32 2147483647, %v936_v20 }
 0x381   :  { %vm970_vm6 = vcmp.gt.f32.partialorder %v1616_v15, 0.0  ;;  %v949_v48 = vor.u32 1.1754944e-38, %v948_v49 }
 0x382   :  { %v917_v61 = vmul.f32 %v1749_v32, %v916_v53  ;;  %v896_v0 = vadd.f32 %v1745_v36, %v895_v55  ;;  %vm947_vm10 = vcmp.eq.f32.partialorder %v946_v2, 8.507059e+37 }
 0x384   :  { %v900_v4 = vsel %vm899_vm1, %v1745_v36, %v896_v0  ;;  %v918_v54 = vadd.f32 %v1749_v32, %v917_v61 }
 0x385   :  { %v1751_v10 = vpop.eup %1750  ;;  %v905_v13 = vsel %vm902_vm3, %v904_v63, %v900_v4 }
 0x386   :  { %v922_v18 = vsel %vm921_vm4, %v1749_v32, %v918_v54  ;;  %v938_v19 = vmul.f32 %v1751_v10, %v936_v20  ;;  %v1753_v27 = vpop.eup %1752  ;;  %vm943_vm7 = vweird.f32 %v1751_v10 }
 0x387   :  { %v927_v52 = vsel %vm924_vm5, %v926_v11, %v922_v18  ;;  %v953_v30 = vmul.f32 %v1753_v27, %v905_v13  ;;  %vm944_vm9 = vmor %vm942_vm8, %vm943_vm7 }
 0x388   :  { %v939_v28 = vsub.f32 1.0, %v938_v19  ;;  %v952_v22 = vmul.f32 %v927_v52, %v2388_v37 }
 0x38a   :  { %v954_v35 = vadd.f32 %v953_v30, %v952_v22  ;;  %v940_v36 = vmul.f32 %v1751_v10, %v939_v28 }
 0x38c   :  { %1754 = vtanh.f32 %v954_v35  ;;  %v941_v39 = vadd.f32 %v1751_v10, %v940_v36  ;;  %v2451_v32 = vsel %vm970_vm6, %v954_v35, %v2388_v37  ;;  %v1624_v35 = vld [vmem:[%s2589_s1 + $0x14] sm:$0xf] }
 0x38d   :  { %vm1123_vm5 = vcmp.gt.f32.partialorder %v1624_v35, 0.0 }
 0x38e   :  { %v945_v51 = vsel %vm944_vm9, %v1751_v10, %v941_v39 }
 0x38f   :  { %v950_v55 = vsel %vm947_vm10, %v949_v48, %v945_v51 }
 0x392   :  { %v1755_v53 = vpop.eup %1754 }
 0x393   :  { %v956_v59 = vmul.f32 %v1755_v53, %v950_v55 }
 0x395   :  { %v959_v60 = vmul.f32 %v1616_v15, %v956_v59  ;;  %v2455_v61 = vsel %vm970_vm6, %v956_v59, %v2392_v47 }
 0x396   :  { %v976_v0 = vpack.c.bf16 %v2455_v61, %v2455_v61 }
 0x397   :  { %1617 = vst.msk [vmem:[%s2590_s3 + $0x10] sm:$0xf] %vm348_vm14, %v959_v60 }
 0x398   :  { %963 = vst [vmem:[#allocation1] ss:$2 sm:$0xff] %v959_v60  ;;  %985 = vmatmul.bf16.vlgmr.msrb.gmra.mxu0 %v976_v0  ;;  %998 = vmatmul.bf16.vlgmr.msrb.gmra.mxu1 %v976_v0 }
 0x399   :  { %1011 = vmatmul.bf16.vlgmr.msrb.gmra.mxu2 %v976_v0  ;;  %1024 = vmatmul.bf16.vlgmr.msrb.gmra.mxu3 %v976_v0 }
 0x39a   :  { %1283 = vmatpush.bf16.msrb.mxu0 %v1845_v3  ;;  %1296 = vmatpush.bf16.msrb.mxu1 %v1856_v7 }
 0x39b   :  { %1309 = vmatpush.bf16.msrb.mxu2 %v1858_v8  ;;  %1322 = vmatpush.bf16.msrb.mxu3 %v1870_v12  ;;  %v1619_v12 = vld [vmem:[%s2588_s0 + $0x50] sm:$0xff] }
 0x39e   :  { %1284 = vmatpush.bf16.msrb.mxu0 %v1883_v16  ;;  %1297 = vmatpush.bf16.msrb.mxu1 %v1885_v17 }
 0x39f   :  { %v964_v37 = vld.sshfl [vmem:[#allocation1] sm:$0xff pattern:$0x75316420]  ;;  %1310 = vmatpush.bf16.msrb.mxu2 %v1897_v21  ;;  %1323 = vmatpush.bf16.msrb.mxu3 %v1908_v25 }
 0x3a0   :  { %965 = vrot.lane.b32.xlu2 %v964_v37, %s1805_s28 }
 0x3a2   :  { %1285 = vmatpush.bf16.msrb.mxu0 %v1920_v29  ;;  %1298 = vmatpush.bf16.msrb.mxu1 %v1933_v33 }
 0x3a3   :  { %1311 = vmatpush.bf16.msrb.mxu2 %v1935_v34  ;;  %1324 = vmatpush.bf16.msrb.mxu3 %v1947_v38 }
 0x3a6   :  { %1286 = vmatpush.bf16.msrb.mxu0 %v1965_v44  ;;  %1299 = vmatpush.bf16.msrb.mxu1 %v1969_v45  ;;  %v1620_v44 = vld [vmem:[%s2588_s0 + $0x58] sm:$0xff] }
 0x3a7   :  { %1312 = vmatpush.bf16.msrb.mxu2 %v1971_v46  ;;  %1325 = vmatpush.bf16.msrb.mxu3 %v1983_v50 }
 0x3aa   :  { %1287 = vmatpush.bf16.msrb.mxu0 %v2001_v56  ;;  %1300 = vmatpush.bf16.msrb.mxu1 %v2005_v57 }
 0x3ab   :  { %1313 = vmatpush.bf16.msrb.mxu2 %v2007_v58  ;;  %1326 = vmatpush.bf16.msrb.mxu3 %v2019_v62 }
 0x3ae   :  { %1288 = vmatpush.bf16.msrb.mxu0 %v2037_v5  ;;  %1301 = vmatpush.bf16.msrb.mxu1 %v2041_v6 }
 0x3af   :  { %1314 = vmatpush.bf16.msrb.mxu2 %v2043_v9  ;;  %1327 = vmatpush.bf16.msrb.mxu3 %v2055_v14 }
 0x3b2   :  { %1289 = vmatpush.bf16.msrb.mxu0 %v2073_v23  ;;  %1302 = vmatpush.bf16.msrb.mxu1 %v2077_v24 }
 0x3b3   :  { %1315 = vmatpush.bf16.msrb.mxu2 %v2079_v26  ;;  %1328 = vmatpush.bf16.msrb.mxu3 %v2091_v31 }
 0x3b6   :  { %1290 = vmatpush.bf16.msrb.mxu0 %v2109_v40  ;;  %1303 = vmatpush.bf16.msrb.mxu1 %v2113_v41 }
 0x3b7   :  { %1316 = vmatpush.bf16.msrb.mxu2 %v2115_v42  ;;  %1329 = vmatpush.bf16.msrb.mxu3 %v2118_v43 }
 0x3fa   :  { %v966_v3 = vpop.permute.xlu2 %965 }
 0x3fb   :  { %1618 = vst.msk [vmem:[%s2591_s4 + $0xc] sm:$0xf] %vm348_vm14, %v966_v3 }
 0x415   :  { %v986_v7 = vpop.f32.mrf.mxu0  ;;  %v999_v8 = vpop.f32.mrf.mxu1 }
 0x416   :  { %v1033_v16 = vrot.slane %v999_v8, 4 }
 0x418   :  { %v1035_v17 = vsel %vm270_vm0, %v986_v7, %v1033_v16 }
 0x419   :  { %v1039_v21 = vadd.f32 %v1619_v12, %v1035_v17 }
 0x41b   :  { %v1621_v25 = vmul.f32 -1.442695, %v1039_v21  ;;  %v1061_v29 = vrot.slane %v1039_v21, 4 }
 0x41c   :  { %v1012_v33 = vpop.f32.mrf.mxu2  ;;  %v1025_v34 = vpop.f32.mrf.mxu3 }
 0x41d   :  { %1756 = vpow2.f32 %v1621_v25  ;;  %v1622_v38 = vmul.f32 -1.442695, %v1061_v29  ;;  %v1034_v45 = vrot.slane %v1025_v34, 4  ;;  %v988_v46 = vpop.f32.mrf.mxu0  ;;  %v1001_v50 = vpop.f32.mrf.mxu1 }
 0x41f   :  { %1758 = vpow2.f32 %v1622_v38  ;;  %v1036_v56 = vsel %vm270_vm0, %v1012_v33, %v1034_v45  ;;  %v1627_v33 = vld [vmem:[%s2588_s0 + $0x60] sm:$0xff] }
 0x420   :  { %v1040_v57 = vadd.f32 %v1620_v44, %v1036_v56 }
 0x422   :  { %v1084_v58 = vrot.slane %v1040_v57, 4 }
 0x423   :  { %v1757_v62 = vpop.eup %1756 }
 0x424   :  { %v1044_v5 = vadd.f32 1.0, %v1757_v62  ;;  %v1623_v6 = vmul.f32 -1.442695, %v1084_v58  ;;  %v1014_v9 = vpop.f32.mrf.mxu2  ;;  %v1027_v14 = vpop.f32.mrf.mxu3  ;;  %v1628_v58 = vld [vmem:[%s2588_s0 + $0x68] sm:$0xff] }
 0x425   :  { %v1759_v23 = vpop.eup %1758 }
 0x426   :  { %1760 = vrcp.f32 %v1044_v5  ;;  %v1066_v24 = vadd.f32 1.0, %v1759_v23  ;;  %v1056_v20 = vand.u32 2147483648, %v1044_v5  ;;  %v1054_v4 = vand.u32 2147483647, %v1044_v5 }
 0x427   :  { %1762 = vpow2.f32 %v1623_v6  ;;  %vm1050_vm12 = vweird.f32 %v1044_v5 }
 0x428   :  { %1764 = vrcp.f32 %v1066_v24  ;;  %v1078_v54 = vand.u32 2147483648, %v1066_v24  ;;  %v1076_v13 = vand.u32 2147483647, %v1066_v24  ;;  %v1057_v18 = vor.u32 1.1754944e-38, %v1056_v20 }
 0x429   :  { %vm1072_vm1 = vweird.f32 %v1066_v24  ;;  %vm1055_vm2 = vcmp.eq.f32.partialorder %v1054_v4, 8.507059e+37 }
 0x42a   :  { %v1079_v52 = vor.u32 1.1754944e-38, %v1078_v54  ;;  %vm1077_vm4 = vcmp.eq.f32.partialorder %v1076_v13, 8.507059e+37 }
 0x42c   :  { %v1761_v26 = vpop.eup %1760 }
 0x42d   :  { %v1763_v31 = vpop.eup %1762  ;;  %v1046_v40 = vmul.f32 %v1761_v26, %v1044_v5  ;;  %vm1051_vm11 = vweird.f32 %v1761_v26 }
 0x42e   :  { %v1765_v41 = vpop.eup %1764  ;;  %v1089_v42 = vadd.f32 1.0, %v1763_v31  ;;  %vm1052_vm15 = vmor %vm1050_vm12, %vm1051_vm11 }
 0x42f   :  { %v1047_v43 = vsub.f32 1.0, %v1046_v40  ;;  %v1068_v47 = vmul.f32 %v1765_v41, %v1066_v24  ;;  %vm1073_vm13 = vweird.f32 %v1765_v41 }
 0x430   :  { %1766 = vrcp.f32 %v1089_v42  ;;  %vm1074_vm3 = vmor %vm1072_vm1, %vm1073_vm13  ;;  %v1101_v59 = vand.u32 2147483648, %v1089_v42  ;;  %vm1095_vm7 = vweird.f32 %v1089_v42  ;;  %v1099_v0 = vand.u32 2147483647, %v1089_v42 }
 0x431   :  { %v1069_v1 = vsub.f32 1.0, %v1068_v47  ;;  %v1048_v63 = vmul.f32 %v1761_v26, %v1047_v43  ;;  %1768 = vtanh.f32 %v1040_v57 }
 0x432   :  { %v1102_v3 = vor.u32 1.1754944e-38, %v1101_v59  ;;  %vm1100_vm9 = vcmp.eq.f32.partialorder %v1099_v0, 8.507059e+37 }
 0x433   :  { %v1070_v10 = vmul.f32 %v1765_v41, %v1069_v1  ;;  %v1049_v11 = vadd.f32 %v1761_v26, %v1048_v63 }
 0x435   :  { %v1053_v19 = vsel %vm1052_vm15, %v1761_v26, %v1049_v11  ;;  %v1071_v15 = vadd.f32 %v1765_v41, %v1070_v10 }
 0x436   :  { %v1767_v27 = vpop.eup %1766  ;;  %v1058_v28 = vsel %vm1055_vm2, %v1057_v18, %v1053_v19 }
 0x437   :  { %v1075_v22 = vsel %vm1074_vm3, %v1765_v41, %v1071_v15  ;;  %v1091_v30 = vmul.f32 %v1767_v27, %v1089_v42  ;;  %v1769_v36 = vpop.eup %1768  ;;  %vm1096_vm6 = vweird.f32 %v1767_v27 }
 0x438   :  { %v1080_v39 = vsel %vm1077_vm4, %v1079_v52, %v1075_v22  ;;  %v1106_v51 = vmul.f32 %v1769_v36, %v1058_v28  ;;  %vm1097_vm8 = vmor %vm1095_vm7, %vm1096_vm6 }
 0x439   :  { %v1092_v49 = vsub.f32 1.0, %v1091_v30  ;;  %v1105_v2 = vmul.f32 %v1080_v39, %v2451_v32 }
 0x43b   :  { %v1107_v48 = vadd.f32 %v1106_v51, %v1105_v2  ;;  %v1093_v53 = vmul.f32 %v1767_v27, %v1092_v49 }
 0x43d   :  { %1770 = vtanh.f32 %v1107_v48  ;;  %v1094_v55 = vadd.f32 %v1767_v27, %v1093_v53  ;;  %v2514_v60 = vsel %vm1123_vm5, %v1107_v48, %v2451_v32  ;;  %v1632_v48 = vld [vmem:[%s2589_s1 + $0x18] sm:$0xf] }
 0x43e   :  { %vm1276_vm4 = vcmp.gt.f32.partialorder %v1632_v48, 0.0 }
 0x43f   :  { %v1098_v37 = vsel %vm1097_vm8, %v1767_v27, %v1094_v55 }
 0x440   :  { %v1103_v8 = vsel %vm1100_vm9, %v1102_v3, %v1098_v37 }
 0x443   :  { %v1771_v7 = vpop.eup %1770 }
 0x444   :  { %v1109_v12 = vmul.f32 %v1771_v7, %v1103_v8 }
 0x446   :  { %v1112_v16 = vmul.f32 %v1624_v35, %v1109_v12  ;;  %v2518_v17 = vsel %vm1123_vm5, %v1109_v12, %v2455_v61 }
 0x447   :  { %v1129_v21 = vpack.c.bf16 %v2518_v17, %v2518_v17 }
 0x448   :  { %1625 = vst.msk [vmem:[%s2590_s3 + $0x14] sm:$0xf] %vm348_vm14, %v1112_v16 }
 0x449   :  { %1138 = vmatmul.bf16.vlgmr.msra.gmra.mxu0 %v1129_v21  ;;  %1116 = vst [vmem:[#allocation1] ss:$2 sm:$0xff] %v1112_v16  ;;  %1151 = vmatmul.bf16.vlgmr.msra.gmra.mxu1 %v1129_v21 }
 0x44a   :  { %1164 = vmatmul.bf16.vlgmr.msra.gmra.mxu2 %v1129_v21  ;;  %1177 = vmatmul.bf16.vlgmr.msra.gmra.mxu3 %v1129_v21 }
 0x450   :  { %v1117_v32 = vld.sshfl [vmem:[#allocation1] sm:$0xff pattern:$0x75316420] }
 0x451   :  { %1118 = vrot.lane.b32.xlu2 %v1117_v32, %s1805_s28 }
 0x4ab   :  { %v1119_v25 = vpop.permute.xlu2 %1118 }
 0x4ac   :  { %1626 = vst.msk [vmem:[%s2591_s4 + $0x8] sm:$0xf] %vm348_vm14, %v1119_v25 }
 0x4c6   :  { %v1139_v61 = vpop.f32.mrf.mxu0  ;;  %v1152_v29 = vpop.f32.mrf.mxu1 }
 0x4c7   :  { %v1186_v34 = vrot.slane %v1152_v29, 4 }
 0x4c9   :  { %v1188_v38 = vsel %vm270_vm0, %v1139_v61, %v1186_v34 }
 0x4ca   :  { %v1192_v44 = vadd.f32 %v1627_v33, %v1188_v38 }
 0x4cc   :  { %v1629_v45 = vmul.f32 -1.442695, %v1192_v44  ;;  %v1214_v46 = vrot.slane %v1192_v44, 4 }
 0x4cd   :  { %v1165_v50 = vpop.f32.mrf.mxu2  ;;  %v1178_v56 = vpop.f32.mrf.mxu3 }
 0x4ce   :  { %1772 = vpow2.f32 %v1629_v45  ;;  %v1630_v57 = vmul.f32 -1.442695, %v1214_v46  ;;  %v1187_v62 = vrot.slane %v1178_v56, 4  ;;  %v1141_v5 = vpop.f32.mrf.mxu0  ;;  %v1154_v6 = vpop.f32.mrf.mxu1 }
 0x4d0   :  { %1774 = vpow2.f32 %v1630_v57  ;;  %v1189_v9 = vsel %vm270_vm0, %v1165_v50, %v1187_v62  ;;  %v1635_v50 = vld [vmem:[%s2588_s0 + $0x70] sm:$0xff] }
 0x4d1   :  { %v1193_v14 = vadd.f32 %v1628_v58, %v1189_v9 }
 0x4d3   :  { %v1237_v23 = vrot.slane %v1193_v14, 4 }
 0x4d4   :  { %v1773_v24 = vpop.eup %1772 }
 0x4d5   :  { %v1197_v26 = vadd.f32 1.0, %v1773_v24  ;;  %v1631_v31 = vmul.f32 -1.442695, %v1237_v23  ;;  %v1167_v40 = vpop.f32.mrf.mxu2  ;;  %v1180_v41 = vpop.f32.mrf.mxu3  ;;  %v1636_v23 = vld [vmem:[%s2588_s0 + $0x78] sm:$0xff] }
 0x4d6   :  { %v1775_v42 = vpop.eup %1774 }
 0x4d7   :  { %1776 = vrcp.f32 %v1197_v26  ;;  %v1219_v43 = vadd.f32 1.0, %v1775_v42  ;;  %v1209_v11 = vand.u32 2147483648, %v1197_v26  ;;  %v1207_v19 = vand.u32 2147483647, %v1197_v26 }
 0x4d8   :  { %1778 = vpow2.f32 %v1631_v31  ;;  %vm1203_vm11 = vweird.f32 %v1197_v26 }
 0x4d9   :  { %1780 = vrcp.f32 %v1219_v43  ;;  %v1231_v15 = vand.u32 2147483648, %v1219_v43  ;;  %v1229_v28 = vand.u32 2147483647, %v1219_v43  ;;  %v1210_v22 = vor.u32 1.1754944e-38, %v1209_v11 }
 0x4da   :  { %vm1225_vm15 = vweird.f32 %v1219_v43  ;;  %vm1208_vm1 = vcmp.eq.f32.partialorder %v1207_v19, 8.507059e+37 }
 0x4db   :  { %v1232_v39 = vor.u32 1.1754944e-38, %v1231_v15  ;;  %vm1230_vm3 = vcmp.eq.f32.partialorder %v1229_v28, 8.507059e+37 }
 0x4dd   :  { %v1777_v47 = vpop.eup %1776 }
 0x4de   :  { %v1779_v20 = vpop.eup %1778  ;;  %v1199_v1 = vmul.f32 %v1777_v47, %v1197_v26  ;;  %vm1204_vm10 = vweird.f32 %v1777_v47 }
 0x4df   :  { %v1781_v63 = vpop.eup %1780  ;;  %v1242_v4 = vadd.f32 1.0, %v1779_v20  ;;  %vm1205_vm13 = vmor %vm1203_vm11, %vm1204_vm10 }
 0x4e0   :  { %v1200_v54 = vsub.f32 1.0, %v1199_v1  ;;  %v1221_v10 = vmul.f32 %v1781_v63, %v1219_v43  ;;  %vm1226_vm12 = vweird.f32 %v1781_v63 }
 0x4e1   :  { %1782 = vrcp.f32 %v1242_v4  ;;  %vm1227_vm2 = vmor %vm1225_vm15, %vm1226_vm12  ;;  %v1254_v12 = vand.u32 2147483648, %v1242_v4  ;;  %vm1248_vm6 = vweird.f32 %v1242_v4  ;;  %v1252_v21 = vand.u32 2147483647, %v1242_v4 }
 0x4e2   :  { %v1222_v13 = vsub.f32 1.0, %v1221_v10  ;;  %v1201_v18 = vmul.f32 %v1777_v47, %v1200_v54  ;;  %1784 = vtanh.f32 %v1193_v14 }
 0x4e3   :  { %v1255_v25 = vor.u32 1.1754944e-38, %v1254_v12  ;;  %vm1253_vm8 = vcmp.eq.f32.partialorder %v1252_v21, 8.507059e+37 }
 0x4e4   :  { %v1223_v27 = vmul.f32 %v1781_v63, %v1222_v13  ;;  %v1202_v52 = vadd.f32 %v1777_v47, %v1201_v18 }
 0x4e6   :  { %v1206_v30 = vsel %vm1205_vm13, %v1777_v47, %v1202_v52  ;;  %v1224_v35 = vadd.f32 %v1781_v63, %v1223_v27 }
 0x4e7   :  { %v1783_v36 = vpop.eup %1782  ;;  %v1211_v49 = vsel %vm1208_vm1, %v1210_v22, %v1206_v30 }
 0x4e8   :  { %v1228_v2 = vsel %vm1227_vm2, %v1781_v63, %v1224_v35  ;;  %v1244_v51 = vmul.f32 %v1783_v36, %v1242_v4  ;;  %v1785_v53 = vpop.eup %1784  ;;  %vm1249_vm5 = vweird.f32 %v1783_v36 }
 0x4e9   :  { %v1233_v55 = vsel %vm1230_vm3, %v1232_v39, %v1228_v2  ;;  %v1259_v37 = vmul.f32 %v1785_v53, %v1211_v49  ;;  %vm1250_vm7 = vmor %vm1248_vm6, %vm1249_vm5 }
 0x4ea   :  { %v1245_v59 = vsub.f32 1.0, %v1244_v51  ;;  %v1258_v0 = vmul.f32 %v1233_v55, %v2514_v60 }
 0x4ec   :  { %v1260_v3 = vadd.f32 %v1259_v37, %v1258_v0  ;;  %v1246_v7 = vmul.f32 %v1783_v36, %v1245_v59 }
 0x4ee   :  { %1786 = vtanh.f32 %v1260_v3  ;;  %v1247_v8 = vadd.f32 %v1783_v36, %v1246_v7  ;;  %v2545_v16 = vsel %vm1276_vm4, %v1260_v3, %v2514_v60 }
 0x4f0   :  { %v1251_v32 = vsel %vm1250_vm7, %v1783_v36, %v1247_v8 }
 0x4f1   :  { %v1256_v29 = vsel %vm1253_vm8, %v1255_v25, %v1251_v32 }
 0x4f4   :  { %v1787_v61 = vpop.eup %1786 }
 0x4f5   :  { %v1262_v33 = vmul.f32 %v1787_v61, %v1256_v29 }
 0x4f7   :  { %v1265_v34 = vmul.f32 %v1632_v48, %v1262_v33  ;;  %v2549_v38 = vsel %vm1276_vm4, %v1262_v33, %v2518_v17 }
 0x4f8   :  { %v1282_v44 = vpack.c.bf16 %v2549_v38, %v2549_v38 }
 0x4f9   :  { %1633 = vst.msk [vmem:[%s2590_s3 + $0x18] sm:$0xf] %vm348_vm14, %v1265_v34 }
 0x4fa   :  { %1291 = vmatmul.bf16.vlgmr.msrb.gmra.mxu0 %v1282_v44  ;;  %1269 = vst [vmem:[#allocation1] ss:$2 sm:$0xff] %v1265_v34  ;;  %1304 = vmatmul.bf16.vlgmr.msrb.gmra.mxu1 %v1282_v44 }
 0x4fb   :  { %1317 = vmatmul.bf16.vlgmr.msrb.gmra.mxu2 %v1282_v44  ;;  %1330 = vmatmul.bf16.vlgmr.msrb.gmra.mxu3 %v1282_v44  ;;  %v1640_v44 = vld [vmem:[%s2589_s1 + $0x1c] sm:$0xf] }
 0x4fc   :  { %vm1428_vm6 = vcmp.gt.f32.partialorder %v1640_v44, 0.0 }
 0x501   :  { %v1270_v60 = vld.sshfl [vmem:[#allocation1] sm:$0xff pattern:$0x75316420] }
 0x502   :  { %1271 = vrot.lane.b32.xlu0 %v1270_v60, %s1805_s28 }
 0x574   :  { %v1272_v45 = vpop.permute.xlu0 %1271 }
 0x575   :  { %1634 = vst.msk [vmem:[%s2591_s4 + $0x4] sm:$0xf] %vm348_vm14, %v1272_v45 }
 0x577   :  { %v1292_v17 = vpop.f32.mrf.mxu0  ;;  %v1305_v46 = vpop.f32.mrf.mxu1 }
 0x578   :  { %v1339_v56 = vrot.slane %v1305_v46, 4 }
 0x57a   :  { %v1341_v57 = vsel %vm270_vm0, %v1292_v17, %v1339_v56 }
 0x57b   :  { %v1345_v58 = vadd.f32 %v1635_v50, %v1341_v57 }
 0x57d   :  { %v1637_v62 = vmul.f32 -1.442695, %v1345_v58  ;;  %v1367_v5 = vrot.slane %v1345_v58, 4 }
 0x57e   :  { %v1318_v6 = vpop.f32.mrf.mxu2  ;;  %v1331_v9 = vpop.f32.mrf.mxu3 }
 0x57f   :  { %1788 = vpow2.f32 %v1637_v62  ;;  %v1638_v14 = vmul.f32 -1.442695, %v1367_v5  ;;  %v1340_v24 = vrot.slane %v1331_v9, 4  ;;  %v1294_v26 = vpop.f32.mrf.mxu0  ;;  %v1307_v31 = vpop.f32.mrf.mxu1 }
 0x581   :  { %1790 = vpow2.f32 %v1638_v14  ;;  %v1342_v40 = vsel %vm270_vm0, %v1318_v6, %v1340_v24 }
 0x582   :  { %v1346_v41 = vadd.f32 %v1636_v23, %v1342_v40 }
 0x584   :  { %v1390_v42 = vrot.slane %v1346_v41, 4 }
 0x585   :  { %v1789_v43 = vpop.eup %1788 }
 0x586   :  { %v1350_v47 = vadd.f32 1.0, %v1789_v43  ;;  %v1639_v20 = vmul.f32 -1.442695, %v1390_v42  ;;  %v1320_v1 = vpop.f32.mrf.mxu2  ;;  %v1333_v63 = vpop.f32.mrf.mxu3 }
 0x587   :  { %v1791_v4 = vpop.eup %1790 }
 0x588   :  { %1792 = vrcp.f32 %v1350_v47  ;;  %v1372_v54 = vadd.f32 1.0, %v1791_v4  ;;  %v1362_v52 = vand.u32 2147483648, %v1350_v47  ;;  %v1360_v30 = vand.u32 2147483647, %v1350_v47 }
 0x589   :  { %1794 = vpow2.f32 %v1639_v20  ;;  %vm1356_vm9 = vweird.f32 %v1350_v47 }
 0x58a   :  { %1796 = vrcp.f32 %v1372_v54  ;;  %v1384_v35 = vand.u32 2147483648, %v1372_v54  ;;  %v1382_v49 = vand.u32 2147483647, %v1372_v54  ;;  %v1363_v2 = vor.u32 1.1754944e-38, %v1362_v52 }
 0x58b   :  { %vm1378_vm12 = vweird.f32 %v1372_v54  ;;  %vm1361_vm13 = vcmp.eq.f32.partialorder %v1360_v30, 8.507059e+37 }
 0x58c   :  { %v1385_v55 = vor.u32 1.1754944e-38, %v1384_v35  ;;  %vm1383_vm1 = vcmp.eq.f32.partialorder %v1382_v49, 8.507059e+37 }
 0x58e   :  { %v1793_v10 = vpop.eup %1792 }
 0x58f   :  { %v1795_v11 = vpop.eup %1794  ;;  %v1352_v13 = vmul.f32 %v1793_v10, %v1350_v47  ;;  %vm1357_vm0 = vweird.f32 %v1793_v10 }
 0x590   :  { %v1797_v18 = vpop.eup %1796  ;;  %v1395_v19 = vadd.f32 1.0, %v1795_v11  ;;  %vm1358_vm11 = vmor %vm1356_vm9, %vm1357_vm0 }
 0x591   :  { %v1353_v15 = vsub.f32 1.0, %v1352_v13  ;;  %v1374_v27 = vmul.f32 %v1797_v18, %v1372_v54  ;;  %vm1379_vm10 = vweird.f32 %v1797_v18 }
 0x592   :  { %1798 = vrcp.f32 %v1395_v19  ;;  %vm1380_vm15 = vmor %vm1378_vm12, %vm1379_vm10  ;;  %v1407_v29 = vand.u32 2147483648, %v1395_v19  ;;  %vm1401_vm3 = vweird.f32 %v1395_v19  ;;  %v1405_v33 = vand.u32 2147483647, %v1395_v19 }
 0x593   :  { %v1375_v28 = vsub.f32 1.0, %v1374_v27  ;;  %v1354_v22 = vmul.f32 %v1793_v10, %v1353_v15  ;;  %1800 = vtanh.f32 %v1346_v41 }
 0x594   :  { %v1408_v60 = vor.u32 1.1754944e-38, %v1407_v29  ;;  %vm1406_vm5 = vcmp.eq.f32.partialorder %v1405_v33, 8.507059e+37 }
 0x595   :  { %v1376_v36 = vmul.f32 %v1797_v18, %v1375_v28  ;;  %v1355_v39 = vadd.f32 %v1793_v10, %v1354_v22 }
 0x597   :  { %v1359_v51 = vsel %vm1358_vm11, %v1793_v10, %v1355_v39  ;;  %v1377_v48 = vadd.f32 %v1797_v18, %v1376_v36 }
 0x598   :  { %v1799_v53 = vpop.eup %1798  ;;  %v1364_v59 = vsel %vm1361_vm13, %v1363_v2, %v1359_v51 }
 0x599   :  { %v1381_v0 = vsel %vm1380_vm15, %v1797_v18, %v1377_v48  ;;  %v1397_v37 = vmul.f32 %v1799_v53, %v1395_v19  ;;  %v1801_v3 = vpop.eup %1800  ;;  %vm1402_vm2 = vweird.f32 %v1799_v53 }
 0x59a   :  { %v1386_v7 = vsel %vm1383_vm1, %v1385_v55, %v1381_v0  ;;  %v1412_v21 = vmul.f32 %v1801_v3, %v1364_v59  ;;  %vm1403_vm4 = vmor %vm1401_vm3, %vm1402_vm2 }
 0x59b   :  { %v1398_v8 = vsub.f32 1.0, %v1397_v37  ;;  %v1411_v12 = vmul.f32 %v1386_v7, %v2545_v16 }
 0x59d   :  { %v1399_v32 = vmul.f32 %v1799_v53, %v1398_v8  ;;  %v1413_v25 = vadd.f32 %v1412_v21, %v1411_v12 }
 0x59f   :  { %v1400_v61 = vadd.f32 %v1799_v53, %v1399_v32  ;;  %1802 = vtanh.f32 %v1413_v25 }
 0x5a1   :  { %v1404_v34 = vsel %vm1403_vm4, %v1799_v53, %v1400_v61 }
 0x5a2   :  { %v1409_v17 = vsel %vm1406_vm5, %v1408_v60, %v1404_v34 }
 0x5a5   :  { %v1803_v45 = vpop.eup %1802 }
 0x5a6   :  { %v1415_v16 = vmul.f32 %v1803_v45, %v1409_v17 }
 0x5a8   :  { %v1418_v46 = vmul.f32 %v1640_v44, %v1415_v16  ;;  %v1429_v50 = vsel %vm1428_vm6, %v1415_v16, %v2549_v38 }
 0x5a9   :  { %1430 = vst [vmem:[%s2592_s5] sm:$0xf] %v1429_v50 }
 0x5aa   :  { %1641 = vst.msk [vmem:[%s2590_s3 + $0x1c] sm:$0xf] %vm348_vm14, %v1418_v46 }
 0x5ab   :  { %1422 = vst [vmem:[#allocation1] ss:$2 sm:$0xff] %v1418_v46 }
 0x5b2   :  { %v1423_v56 = vld.sshfl [vmem:[#allocation1] sm:$0xff pattern:$0x75316420] }
 0x5b3   :  { %1424 = vrot.lane.b32.xlu1 %v1423_v56, %s1805_s28 }
 0x625   :  { %v1425_v57 = vpop.permute.xlu1 %1424 }
 0x626   :  { %1427 = vst.msk [vmem:[%s2591_s4] sm:$0xf] %vm348_vm14, %v1425_v57 }

// kernel: mirror_lstm_forward.3
= control target key start
LH: loop header
LB: loop body
LE: loop exit
PB: predicated region body
PF: predicated region fallthrough
CT: control target
= control target key end

     0   :  { %s2628_s0 = inlined_call_operand.vmem [shape: f32[8,4,512], index: 0, kind: input, shape index: {}]   ;;  %s2629_s1 = inlined_call_operand.vmem [shape: f32[8,4,128], index: 1, kind: input, shape index: {}]   ;;  %s2630_s2 = inlined_call_operand.vmem [shape: bf16[128,512], index: 2, kind: input, shape index: {}]   ;;  %s2631_s3 = inlined_call_operand.vmem [shape: f32[8,4,64], index: 3, kind: output, shape index: {0}]   ;;  %s2632_s4 = inlined_call_operand.vmem [shape: f32[8,4,64], index: 4, kind: output, shape index: {1}]   ;;  %s2633_s5 = inlined_call_operand.hbm [shape: f32[4,128], index: 5, kind: output, shape index: {2}]  }
   0x1   :  { %v1570_v0 = vld [vmem:[%s2630_s2 + $0xe0] sm:$0xf]  ;;  %v1685_v1 = vld [vmem:[%s2630_s2 + $0xec] sm:$0xf0]  ;;  %v1683_v2 = vld [vmem:[%s2630_s2 + $0xe4] sm:$0xf] }
   0x2   :  { %v1886_v3 = vor.u32 %v1685_v1, %v1570_v0  ;;  %v1572_v4 = vld [vmem:[%s2630_s2 + $0xf0] sm:$0xf0]  ;;  %v1578_v5 = vld [vmem:[%s2630_s2 + $0xe8] sm:$0xf]  ;;  %v1686_v6 = vld [vmem:[%s2630_s2 + $0xf4] sm:$0xf0] }
   0x3   :  { %v1897_v7 = vor.u32 %v1683_v2, %v1572_v4  ;;  %v1899_v8 = vor.u32 %v1686_v6, %v1578_v5  ;;  %v1684_v9 = vld [vmem:[%s2630_s2 + $0xec] sm:$0xf]  ;;  %v1580_v10 = vld [vmem:[%s2630_s2 + $0xf8] sm:$0xf0]  ;;  %v1554_v11 = vld [vmem:[%s2630_s2 + $0xc0] sm:$0xf] }
   0x4   :  { %213 = vmatpush.bf16.msra.mxu0 %v1886_v3  ;;  %v1911_v12 = vor.u32 %v1684_v9, %v1580_v10  ;;  %v1681_v13 = vld [vmem:[%s2630_s2 + $0xcc] sm:$0xf0]  ;;  %v1679_v14 = vld [vmem:[%s2630_s2 + $0xc4] sm:$0xf]  ;;  %v1556_v15 = vld [vmem:[%s2630_s2 + $0xd0] sm:$0xf0] }
   0x5   :  { %226 = vmatpush.bf16.msra.mxu1 %v1897_v7  ;;  %239 = vmatpush.bf16.msra.mxu2 %v1899_v8  ;;  %v1924_v16 = vor.u32 %v1681_v13, %v1554_v11  ;;  %v1926_v17 = vor.u32 %v1679_v14, %v1556_v15  ;;  %v1562_v18 = vld [vmem:[%s2630_s2 + $0xc8] sm:$0xf]  ;;  %v1682_v19 = vld [vmem:[%s2630_s2 + $0xd4] sm:$0xf0]  ;;  %v1680_v20 = vld [vmem:[%s2630_s2 + $0xcc] sm:$0xf] }
   0x6   :  { %252 = vmatpush.bf16.msra.mxu3 %v1911_v12  ;;  %v1938_v21 = vor.u32 %v1682_v19, %v1562_v18  ;;  %v1564_v22 = vld [vmem:[%s2630_s2 + $0xd8] sm:$0xf0]  ;;  %v1538_v23 = vld [vmem:[%s2630_s2 + $0xa0] sm:$0xf]  ;;  %v1677_v24 = vld [vmem:[%s2630_s2 + $0xac] sm:$0xf0] }
   0x7   :  { %v1949_v25 = vor.u32 %v1680_v20, %v1564_v22  ;;  %v1675_v26 = vld [vmem:[%s2630_s2 + $0xa4] sm:$0xf]  ;;  %v1540_v27 = vld [vmem:[%s2630_s2 + $0xb0] sm:$0xf0]  ;;  %v1546_v28 = vld [vmem:[%s2630_s2 + $0xa8] sm:$0xf]  ;;  %v1961_v29 = vor.u32 %v1677_v24, %v1538_v23 }
   0x8   :  { %214 = vmatpush.bf16.msra.mxu0 %v1924_v16  ;;  %v1678_v30 = vld [vmem:[%s2630_s2 + $0xb4] sm:$0xf0]  ;;  %v1676_v31 = vld [vmem:[%s2630_s2 + $0xac] sm:$0xf]  ;;  %v1548_v32 = vld [vmem:[%s2630_s2 + $0xb8] sm:$0xf0]  ;;  %v1974_v33 = vor.u32 %v1675_v26, %v1540_v27 }
   0x9   :  { %227 = vmatpush.bf16.msra.mxu1 %v1926_v17  ;;  %240 = vmatpush.bf16.msra.mxu2 %v1938_v21  ;;  %v1976_v34 = vor.u32 %v1678_v30, %v1546_v28  ;;  %v1522_v35 = vld [vmem:[%s2630_s2 + $0x80] sm:$0xf]  ;;  %v1673_v36 = vld [vmem:[%s2630_s2 + $0x8c] sm:$0xf0]  ;;  %v1671_v37 = vld [vmem:[%s2630_s2 + $0x84] sm:$0xf]  ;;  %v1988_v38 = vor.u32 %v1676_v31, %v1548_v32 }
   0xa   :  { %253 = vmatpush.bf16.msra.mxu3 %v1949_v25  ;;  %v1524_v39 = vld [vmem:[%s2630_s2 + $0x90] sm:$0xf0]  ;;  %v1530_v40 = vld [vmem:[%s2630_s2 + $0x88] sm:$0xf]  ;;  %v1674_v41 = vld [vmem:[%s2630_s2 + $0x94] sm:$0xf0]  ;;  %v2006_v44 = vor.u32 %v1673_v36, %v1522_v35 }
   0xb   :  { %v1672_v42 = vld [vmem:[%s2630_s2 + $0x8c] sm:$0xf]  ;;  %v1532_v43 = vld [vmem:[%s2630_s2 + $0x98] sm:$0xf0]  ;;  %v2010_v45 = vor.u32 %v1671_v37, %v1524_v39  ;;  %v2012_v46 = vor.u32 %v1674_v41, %v1530_v40  ;;  %v1506_v47 = vld [vmem:[%s2630_s2 + $0x60] sm:$0xf] }
   0xc   :  { %215 = vmatpush.bf16.msra.mxu0 %v1961_v29  ;;  %v1669_v48 = vld [vmem:[%s2630_s2 + $0x6c] sm:$0xf0]  ;;  %v1667_v49 = vld [vmem:[%s2630_s2 + $0x64] sm:$0xf]  ;;  %v2024_v50 = vor.u32 %v1672_v42, %v1532_v43  ;;  %v1508_v51 = vld [vmem:[%s2630_s2 + $0x70] sm:$0xf0] }
   0xd   :  { %228 = vmatpush.bf16.msra.mxu1 %v1974_v33  ;;  %241 = vmatpush.bf16.msra.mxu2 %v1976_v34  ;;  %v1514_v52 = vld [vmem:[%s2630_s2 + $0x68] sm:$0xf]  ;;  %v1670_v53 = vld [vmem:[%s2630_s2 + $0x74] sm:$0xf0]  ;;  %v1668_v54 = vld [vmem:[%s2630_s2 + $0x6c] sm:$0xf]  ;;  %v2042_v56 = vor.u32 %v1669_v48, %v1506_v47  ;;  %v2046_v57 = vor.u32 %v1667_v49, %v1508_v51 }
   0xe   :  { %254 = vmatpush.bf16.msra.mxu3 %v1988_v38  ;;  %v1516_v55 = vld [vmem:[%s2630_s2 + $0x78] sm:$0xf0]  ;;  %v2048_v58 = vor.u32 %v1670_v53, %v1514_v52  ;;  %v1490_v59 = vld [vmem:[%s2630_s2 + $0x40] sm:$0xf]  ;;  %v1665_v60 = vld [vmem:[%s2630_s2 + $0x4c] sm:$0xf0] }
   0xf   :  { %v1663_v61 = vld [vmem:[%s2630_s2 + $0x44] sm:$0xf]  ;;  %v2060_v62 = vor.u32 %v1668_v54, %v1516_v55  ;;  %v1492_v63 = vld [vmem:[%s2630_s2 + $0x50] sm:$0xf0]  ;;  %v1498_v0 = vld [vmem:[%s2630_s2 + $0x48] sm:$0xf]  ;;  %v2078_v5 = vor.u32 %v1665_v60, %v1490_v59 }
  0x10   :  { %216 = vmatpush.bf16.msra.mxu0 %v2006_v44  ;;  %v1666_v1 = vld [vmem:[%s2630_s2 + $0x54] sm:$0xf0]  ;;  %v1664_v2 = vld [vmem:[%s2630_s2 + $0x4c] sm:$0xf]  ;;  %v1500_v4 = vld [vmem:[%s2630_s2 + $0x58] sm:$0xf0]  ;;  %v2085_v9 = vor.u32 %v1663_v61, %v1492_v63 }
  0x11   :  { %229 = vmatpush.bf16.msra.mxu1 %v2010_v45  ;;  %242 = vmatpush.bf16.msra.mxu2 %v2012_v46  ;;  %v1474_v6 = vld [vmem:[%s2630_s2 + $0x20] sm:$0xf]  ;;  %v2087_v10 = vor.u32 %v1666_v1, %v1498_v0  ;;  %v1661_v11 = vld [vmem:[%s2630_s2 + $0x2c] sm:$0xf0]  ;;  %v1659_v13 = vld [vmem:[%s2630_s2 + $0x24] sm:$0xf]  ;;  %v2099_v15 = vor.u32 %v1664_v2, %v1500_v4 }
  0x12   :  { %255 = vmatpush.bf16.msra.mxu3 %v2024_v50  ;;  %v1476_v14 = vld [vmem:[%s2630_s2 + $0x30] sm:$0xf0]  ;;  %v1482_v18 = vld [vmem:[%s2630_s2 + $0x28] sm:$0xf]  ;;  %v1662_v19 = vld [vmem:[%s2630_s2 + $0x34] sm:$0xf0] }
  0x14   :  { %217 = vmatpush.bf16.msra.mxu0 %v2042_v56 }
  0x15   :  { %230 = vmatpush.bf16.msra.mxu1 %v2046_v57  ;;  %243 = vmatpush.bf16.msra.mxu2 %v2048_v58 }
  0x16   :  { %256 = vmatpush.bf16.msra.mxu3 %v2060_v62 }
  0x17   :  { %11 = vsyncpa [#allocation3], 0  ;;  %v1660_v20 = vld [vmem:[%s2630_s2 + $0x2c] sm:$0xf]  ;;  %v1484_v22 = vld [vmem:[%s2630_s2 + $0x38] sm:$0xf0]  ;;  %v2114_v23 = vor.u32 %v1661_v11, %v1474_v6  ;;  %v2118_v24 = vor.u32 %v1659_v13, %v1476_v14  ;;  %v2120_v26 = vor.u32 %v1662_v19, %v1482_v18 }
  0x18   :  { %218 = vmatpush.bf16.msra.mxu0 %v2078_v5  ;;  %v1458_v27 = vld [vmem:[%s2630_s2] sm:$0xf]  ;;  %v1657_v28 = vld [vmem:[%s2630_s2 + $0xc] sm:$0xf0]  ;;  %v1655_v30 = vld [vmem:[%s2630_s2 + $0x4] sm:$0xf]  ;;  %v2132_v31 = vor.u32 %v1660_v20, %v1484_v22 }
  0x19   :  { %231 = vmatpush.bf16.msra.mxu1 %v2085_v9  ;;  %244 = vmatpush.bf16.msra.mxu2 %v2087_v10  ;;  %v1460_v32 = vld [vmem:[%s2630_s2 + $0x10] sm:$0xf0]  ;;  %v1466_v35 = vld [vmem:[%s2630_s2 + $0x8] sm:$0xf]  ;;  %v1658_v36 = vld [vmem:[%s2630_s2 + $0x14] sm:$0xf0]  ;;  %v2150_v40 = vor.u32 %v1657_v28, %v1458_v27 }
  0x1a   :  { %257 = vmatpush.bf16.msra.mxu3 %v2099_v15  ;;  %v1656_v37 = vld [vmem:[%s2630_s2 + $0xc] sm:$0xf]  ;;  %v1468_v39 = vld [vmem:[%s2630_s2 + $0x18] sm:$0xf0]  ;;  %v2154_v41 = vor.u32 %v1655_v30, %v1460_v32  ;;  %v2156_v42 = vor.u32 %v1658_v36, %v1466_v35  ;;  %v1844_v47 = vmov 0   ;;  %vm271_vm0 = vcmask 1043456  }
  0x1b   :  { %v2159_v43 = vor.u32 %v1656_v37, %v1468_v39  ;;  %v51_v51 = vld [vmem:[%s2628_s0] sm:$0xff]  ;;  %v52_v1 = vld [vmem:[%s2628_s0 + $0x8] sm:$0xff]  ;;  %vm349_vm14 = vcmask 519168   ;;  %s1845_s28 = smov 64   ;;  %s1846_s2 = smov [#allocation2]  }
  0x1c   :  { %219 = vmatpush.bf16.msra.mxu0 %v2114_v23  ;;  %s1441_s21 = sshll.u32 %s1846_s2, 4  ;;  %s1443_s24 = sshll.u32 %s2633_s5, 4  ;;  %s1442_s21 = int_to_ptr.vmem [resolvable:$true] %s1441_s21  ;;  %s1444_s24 = int_to_ptr.hbm [resolvable:$true] %s1443_s24 }
  0x1d   :  { %232 = vmatpush.bf16.msra.mxu1 %v2118_v24  ;;  %245 = vmatpush.bf16.msra.mxu2 %v2120_v26 }
  0x1e   :  { %258 = vmatpush.bf16.msra.mxu3 %v2132_v31 }
  0x20   :  { %220 = vmatpush.bf16.msra.mxu0 %v2150_v40 }
  0x21   :  { %233 = vmatpush.bf16.msra.mxu1 %v2154_v41  ;;  %246 = vmatpush.bf16.msra.mxu2 %v2156_v42 }
  0x22   :  { %259 = vmatpush.bf16.msra.mxu3 %v2159_v43 }
  0x23   :  { %221 = vmatmul.bf16.vlgmr.msra.gmra.mxu0 %v1844_v47 }
  0x24   :  { %366 = vmatpush.bf16.msrb.mxu0 %v1886_v3  ;;  %234 = vmatmul.bf16.vlgmr.msra.gmra.mxu1 %v1844_v47 }
  0x25   :  { %379 = vmatpush.bf16.msrb.mxu1 %v1897_v7  ;;  %247 = vmatmul.bf16.vlgmr.msra.gmra.mxu2 %v1844_v47 }
  0x26   :  { %260 = vmatmul.bf16.vlgmr.msra.gmra.mxu3 %v1844_v47  ;;  %392 = vmatpush.bf16.msrb.mxu2 %v1899_v8 }
  0x27   :  { %405 = vmatpush.bf16.msrb.mxu3 %v1911_v12 }
  0x28   :  { %367 = vmatpush.bf16.msrb.mxu0 %v1924_v16 }
  0x29   :  { %380 = vmatpush.bf16.msrb.mxu1 %v1926_v17 }
  0x2a   :  { %393 = vmatpush.bf16.msrb.mxu2 %v1938_v21 }
  0x2b   :  { %406 = vmatpush.bf16.msrb.mxu3 %v1949_v25 }
  0x2c   :  { %368 = vmatpush.bf16.msrb.mxu0 %v1961_v29 }
  0x2d   :  { %381 = vmatpush.bf16.msrb.mxu1 %v1974_v33 }
  0x2e   :  { %394 = vmatpush.bf16.msrb.mxu2 %v1976_v34 }
  0x2f   :  { %407 = vmatpush.bf16.msrb.mxu3 %v1988_v38 }
  0x30   :  { %369 = vmatpush.bf16.msrb.mxu0 %v2006_v44 }
  0x31   :  { %382 = vmatpush.bf16.msrb.mxu1 %v2010_v45 }
  0x32   :  { %395 = vmatpush.bf16.msrb.mxu2 %v2012_v46 }
  0x33   :  { %408 = vmatpush.bf16.msrb.mxu3 %v2024_v50 }
  0x34   :  { %370 = vmatpush.bf16.msrb.mxu0 %v2042_v56 }
  0x35   :  { %383 = vmatpush.bf16.msrb.mxu1 %v2046_v57 }
  0x36   :  { %396 = vmatpush.bf16.msrb.mxu2 %v2048_v58 }
  0x37   :  { %409 = vmatpush.bf16.msrb.mxu3 %v2060_v62 }
  0x38   :  { %371 = vmatpush.bf16.msrb.mxu0 %v2078_v5 }
  0x39   :  { %384 = vmatpush.bf16.msrb.mxu1 %v2085_v9 }
  0x3a   :  { %397 = vmatpush.bf16.msrb.mxu2 %v2087_v10 }
  0x3b   :  { %410 = vmatpush.bf16.msrb.mxu3 %v2099_v15 }
  0x3c   :  { %372 = vmatpush.bf16.msrb.mxu0 %v2114_v23 }
  0x3d   :  { %385 = vmatpush.bf16.msrb.mxu1 %v2118_v24 }
  0x3e   :  { %398 = vmatpush.bf16.msrb.mxu2 %v2120_v26 }
  0x3f   :  { %411 = vmatpush.bf16.msrb.mxu3 %v2132_v31 }
  0x40   :  { %373 = vmatpush.bf16.msrb.mxu0 %v2150_v40 }
  0x41   :  { %386 = vmatpush.bf16.msrb.mxu1 %v2154_v41 }
  0x42   :  { %399 = vmatpush.bf16.msrb.mxu2 %v2156_v42 }
  0x43   :  { %412 = vmatpush.bf16.msrb.mxu3 %v2159_v43 }
  0x44   :  { %519 = vmatpush.bf16.msra.mxu0 %v1886_v3 }
  0x45   :  { %532 = vmatpush.bf16.msra.mxu1 %v1897_v7 }
  0x46   :  { %545 = vmatpush.bf16.msra.mxu2 %v1899_v8 }
  0x47   :  { %558 = vmatpush.bf16.msra.mxu3 %v1911_v12 }
  0x48   :  { %520 = vmatpush.bf16.msra.mxu0 %v1924_v16 }
  0x49   :  { %533 = vmatpush.bf16.msra.mxu1 %v1926_v17 }
  0x4a   :  { %546 = vmatpush.bf16.msra.mxu2 %v1938_v21 }
  0x4b   :  { %559 = vmatpush.bf16.msra.mxu3 %v1949_v25 }
  0x4c   :  { %521 = vmatpush.bf16.msra.mxu0 %v1961_v29 }
  0x4d   :  { %534 = vmatpush.bf16.msra.mxu1 %v1974_v33 }
  0x4e   :  { %547 = vmatpush.bf16.msra.mxu2 %v1976_v34 }
  0x4f   :  { %560 = vmatpush.bf16.msra.mxu3 %v1988_v38 }
  0x50   :  { %522 = vmatpush.bf16.msra.mxu0 %v2006_v44 }
  0x51   :  { %535 = vmatpush.bf16.msra.mxu1 %v2010_v45 }
  0x52   :  { %548 = vmatpush.bf16.msra.mxu2 %v2012_v46 }
  0x53   :  { %561 = vmatpush.bf16.msra.mxu3 %v2024_v50 }
  0x54   :  { %523 = vmatpush.bf16.msra.mxu0 %v2042_v56 }
  0x55   :  { %536 = vmatpush.bf16.msra.mxu1 %v2046_v57 }
  0x56   :  { %549 = vmatpush.bf16.msra.mxu2 %v2048_v58 }
  0x57   :  { %562 = vmatpush.bf16.msra.mxu3 %v2060_v62 }
  0x58   :  { %524 = vmatpush.bf16.msra.mxu0 %v2078_v5 }
  0x59   :  { %537 = vmatpush.bf16.msra.mxu1 %v2085_v9 }
  0x5a   :  { %550 = vmatpush.bf16.msra.mxu2 %v2087_v10 }
  0x5b   :  { %563 = vmatpush.bf16.msra.mxu3 %v2099_v15 }
  0x5c   :  { %525 = vmatpush.bf16.msra.mxu0 %v2114_v23 }
  0x5d   :  { %538 = vmatpush.bf16.msra.mxu1 %v2118_v24 }
  0x5e   :  { %551 = vmatpush.bf16.msra.mxu2 %v2120_v26 }
  0x5f   :  { %564 = vmatpush.bf16.msra.mxu3 %v2132_v31 }
  0x60   :  { %526 = vmatpush.bf16.msra.mxu0 %v2150_v40 }
  0x61   :  { %539 = vmatpush.bf16.msra.mxu1 %v2154_v41 }
  0x62   :  { %552 = vmatpush.bf16.msra.mxu2 %v2156_v42 }
  0x63   :  { %565 = vmatpush.bf16.msra.mxu3 %v2159_v43 }
  0xa0   :  { %v222_v48 = vpop.f32.mrf.mxu0 }
  0xa1   :  { %v235_v49 = vpop.f32.mrf.mxu1 }
  0xa2   :  { %v269_v52 = vrot.slane %v235_v49, 4 }
  0xa4   :  { %v272_v53 = vsel %vm271_vm0, %v222_v48, %v269_v52 }
  0xa5   :  { %v276_v54 = vadd.f32 %v272_v53, %v51_v51 }
  0xa7   :  { %v1584_v55 = vmul.f32 -1.442695, %v276_v54  ;;  %v298_v59 = vrot.slane %v276_v54, 4 }
  0xa8   :  { %v248_v60 = vpop.f32.mrf.mxu2  ;;  %v224_v63 = vpop.f32.mrf.mxu0 }
  0xa9   :  { %v261_v61 = vpop.f32.mrf.mxu3  ;;  %1690 = vpow2.f32 %v1584_v55  ;;  %v1585_v0 = vmul.f32 -1.442695, %v298_v59  ;;  %v237_v4 = vpop.f32.mrf.mxu1 }
  0xaa   :  { %v270_v2 = vrot.slane %v261_v61, 4 }
  0xab   :  { %1692 = vpow2.f32 %v1585_v0 }
  0xac   :  { %v273_v6 = vsel %vm271_vm0, %v248_v60, %v270_v2 }
  0xad   :  { %v277_v11 = vadd.f32 %v273_v6, %v52_v1 }
  0xaf   :  { %v321_v13 = vrot.slane %v277_v11, 4  ;;  %v1691_v14 = vpop.eup %1690 }
  0xb0   :  { %v250_v18 = vpop.f32.mrf.mxu2  ;;  %v281_v19 = vadd.f32 1.0, %v1691_v14 }
  0xb1   :  { %v1586_v20 = vmul.f32 -1.442695, %v321_v13  ;;  %v263_v22 = vpop.f32.mrf.mxu3  ;;  %v1693_v27 = vpop.eup %1692 }
  0xb2   :  { %1694 = vrcp.f32 %v281_v19  ;;  %v303_v28 = vadd.f32 1.0, %v1693_v27  ;;  %v293_v48 = vand.u32 2147483648, %v281_v19  ;;  %v291_v51 = vand.u32 2147483647, %v281_v19 }
  0xb3   :  { %1696 = vpow2.f32 %v1586_v20  ;;  %vm287_vm2 = vweird.f32 %v281_v19 }
  0xb4   :  { %1698 = vrcp.f32 %v303_v28  ;;  %v315_v53 = vand.u32 2147483648, %v303_v28  ;;  %v313_v59 = vand.u32 2147483647, %v303_v28  ;;  %v294_v60 = vor.u32 1.1754944e-38, %v293_v48 }
  0xb5   :  { %vm292_vm5 = vcmp.eq.f32.partialorder %v291_v51, 8.507059e+37  ;;  %vm309_vm6 = vweird.f32 %v303_v28 }
  0xb6   :  { %v316_v2 = vor.u32 1.1754944e-38, %v315_v53  ;;  %vm314_vm8 = vcmp.eq.f32.partialorder %v313_v59, 8.507059e+37 }
  0xb8   :  { %v1695_v30 = vpop.eup %1694 }
  0xb9   :  { %v1697_v32 = vpop.eup %1696  ;;  %v283_v35 = vmul.f32 %v1695_v30, %v281_v19  ;;  %vm288_vm1 = vweird.f32 %v1695_v30 }
  0xba   :  { %v1699_v36 = vpop.eup %1698  ;;  %v326_v37 = vadd.f32 1.0, %v1697_v32  ;;  %vm289_vm4 = vmor %vm287_vm2, %vm288_vm1 }
  0xbb   :  { %v284_v39 = vsub.f32 1.0, %v283_v35  ;;  %v305_v47 = vmul.f32 %v1699_v36, %v303_v28  ;;  %vm310_vm3 = vweird.f32 %v1699_v36 }
  0xbc   :  { %1700 = vrcp.f32 %v326_v37  ;;  %vm311_vm7 = vmor %vm309_vm6, %vm310_vm3  ;;  %vm332_vm11 = vweird.f32 %v326_v37  ;;  %v336_v35 = vand.u32 2147483647, %v326_v37 }
  0xbd   :  { %v285_v49 = vmul.f32 %v1695_v30, %v284_v39  ;;  %v306_v52 = vsub.f32 1.0, %v305_v47  ;;  %1702 = vtanh.f32 %v277_v11  ;;  %v347_v11 = vld [vmem:[%s2629_s1] sm:$0xf] }
  0xbe   :  { %vm359_vm9 = vcmp.gt.f32.partialorder %v347_v11, 0.0  ;;  %vm337_vm13 = vcmp.eq.f32.partialorder %v336_v35, 8.507059e+37 }
  0xbf   :  { %v286_v54 = vadd.f32 %v1695_v30, %v285_v49  ;;  %v307_v55 = vmul.f32 %v1699_v36, %v306_v52  ;;  %vm1590_vm15 = vmpackc.low %vm359_vm9, %vm359_vm9 }
  0xc1   :  { %v290_v61 = vsel %vm289_vm4, %v1695_v30, %v286_v54  ;;  %v308_v63 = vadd.f32 %v1699_v36, %v307_v55  ;;  %v338_v30 = vand.u32 2147483648, %v326_v37 }
  0xc2   :  { %v1701_v0 = vpop.eup %1700  ;;  %v295_v1 = vsel %vm292_vm5, %v294_v60, %v290_v61  ;;  %v1588_v60 = vld [vmem:[%s2628_s0 + $0x10] sm:$0xff] }
  0xc3   :  { %v328_v4 = vmul.f32 %v1701_v0, %v326_v37  ;;  %v312_v6 = vsel %vm311_vm7, %v1699_v36, %v308_v63  ;;  %v1703_v13 = vpop.eup %1702  ;;  %vm333_vm10 = vweird.f32 %v1701_v0  ;;  %v339_v39 = vor.u32 1.1754944e-38, %v338_v30 }
  0xc4   :  { %v317_v14 = vsel %vm314_vm8, %v316_v2, %v312_v6  ;;  %v343_v20 = vmul.f32 %v1703_v13, %v295_v1  ;;  %vm334_vm12 = vmor %vm332_vm11, %vm333_vm10  ;;  %v1589_v13 = vld [vmem:[%s2628_s0 + $0x18] sm:$0xff] }
  0xc5   :  { %v329_v18 = vsub.f32 1.0, %v328_v4  ;;  %v342_v19 = vmul.f32 0.0, %v317_v14 }
  0xc7   :  { %v330_v22 = vmul.f32 %v1701_v0, %v329_v18  ;;  %v344_v27 = vadd.f32 %v343_v20, %v342_v19 }
  0xc9   :  { %v331_v28 = vadd.f32 %v1701_v0, %v330_v22  ;;  %1704 = vtanh.f32 %v344_v27  ;;  %v2241_v32 = vsel %vm359_vm9, %v344_v27, 0.0 }
  0xcb   :  { %v335_v36 = vsel %vm334_vm12, %v1701_v0, %v331_v28 }
  0xcc   :  { %v340_v48 = vsel %vm337_vm13, %v339_v39, %v335_v36 }
  0xcf   :  { %v1705_v47 = vpop.eup %1704 }
  0xd0   :  { %v346_v49 = vmul.f32 %v1705_v47, %v340_v48 }
  0xd2   :  { %v348_v51 = vmul.f32 %v347_v11, %v346_v49  ;;  %v2246_v52 = vsel %vm359_vm9, %v346_v49, 0.0  ;;  %v1591_v53 = vpack.c.bf16 %v346_v49, %v346_v49 }
  0xd4   :  { %350 = vst.msk [vmem:[%s2631_s3] sm:$0xf] %vm349_vm14, %v348_v51  ;;  %1592 = vmatmul.msk.bf16.vlgmr.msrb.gmra.mxu0 %vm1590_vm15, %v1591_v53  ;;  %1595 = vmatmul.msk.bf16.vlgmr.msrb.gmra.mxu1 %vm1590_vm15, %v1591_v53 }
  0xd5   :  { %352 = vst [vmem:[#allocation1] ss:$2 sm:$0xff] %v348_v51  ;;  %1598 = vmatmul.msk.bf16.vlgmr.msrb.gmra.mxu2 %vm1590_vm15, %v1591_v53  ;;  %1601 = vmatmul.msk.bf16.vlgmr.msrb.gmra.mxu3 %vm1590_vm15, %v1591_v53 }
  0xd6   :  { %672 = vmatpush.bf16.msrb.mxu0 %v1886_v3  ;;  %685 = vmatpush.bf16.msrb.mxu1 %v1897_v7 }
  0xd7   :  { %698 = vmatpush.bf16.msrb.mxu2 %v1899_v8  ;;  %711 = vmatpush.bf16.msrb.mxu3 %v1911_v12 }
  0xda   :  { %673 = vmatpush.bf16.msrb.mxu0 %v1924_v16  ;;  %686 = vmatpush.bf16.msrb.mxu1 %v1926_v17 }
  0xdb   :  { %699 = vmatpush.bf16.msrb.mxu2 %v1938_v21  ;;  %712 = vmatpush.bf16.msrb.mxu3 %v1949_v25 }
  0xdc   :  { %v353_v37 = vld.sshfl [vmem:[#allocation1] sm:$0xff pattern:$0x75316420] }
  0xdd   :  { %354 = vrot.lane.b32.xlu0 %v353_v37, %s1845_s28 }
  0xde   :  { %674 = vmatpush.bf16.msrb.mxu0 %v1961_v29  ;;  %687 = vmatpush.bf16.msrb.mxu1 %v1974_v33 }
  0xdf   :  { %700 = vmatpush.bf16.msrb.mxu2 %v1976_v34  ;;  %713 = vmatpush.bf16.msrb.mxu3 %v1988_v38 }
  0xe2   :  { %675 = vmatpush.bf16.msrb.mxu0 %v2006_v44  ;;  %688 = vmatpush.bf16.msrb.mxu1 %v2010_v45 }
  0xe3   :  { %701 = vmatpush.bf16.msrb.mxu2 %v2012_v46  ;;  %714 = vmatpush.bf16.msrb.mxu3 %v2024_v50 }
  0xe6   :  { %676 = vmatpush.bf16.msrb.mxu0 %v2042_v56  ;;  %689 = vmatpush.bf16.msrb.mxu1 %v2046_v57 }
  0xe7   :  { %702 = vmatpush.bf16.msrb.mxu2 %v2048_v58  ;;  %715 = vmatpush.bf16.msrb.mxu3 %v2060_v62 }
  0xea   :  { %677 = vmatpush.bf16.msrb.mxu0 %v2078_v5  ;;  %690 = vmatpush.bf16.msrb.mxu1 %v2085_v9 }
  0xeb   :  { %703 = vmatpush.bf16.msrb.mxu2 %v2087_v10  ;;  %716 = vmatpush.bf16.msrb.mxu3 %v2099_v15 }
  0xee   :  { %678 = vmatpush.bf16.msrb.mxu0 %v2114_v23  ;;  %691 = vmatpush.bf16.msrb.mxu1 %v2118_v24 }
  0xef   :  { %704 = vmatpush.bf16.msrb.mxu2 %v2120_v26  ;;  %717 = vmatpush.bf16.msrb.mxu3 %v2132_v31 }
  0xf2   :  { %679 = vmatpush.bf16.msrb.mxu0 %v2150_v40  ;;  %692 = vmatpush.bf16.msrb.mxu1 %v2154_v41 }
  0xf3   :  { %705 = vmatpush.bf16.msrb.mxu2 %v2156_v42  ;;  %718 = vmatpush.bf16.msrb.mxu3 %v2159_v43 }
 0x14f   :  { %v355_v54 = vpop.permute.xlu0 %354 }
 0x150   :  { %1587 = vst.msk [vmem:[%s2632_s4 + $0x1c] sm:$0xf] %vm349_vm14, %v355_v54 }
 0x151   :  { %v375_v55 = vpop.f32.mrf.mxu0  ;;  %v388_v59 = vpop.f32.mrf.mxu1 }
 0x152   :  { %v422_v61 = vrot.slane %v388_v59, 4 }
 0x154   :  { %v424_v63 = vsel %vm271_vm0, %v375_v55, %v422_v61 }
 0x155   :  { %v428_v0 = vadd.f32 %v1588_v60, %v424_v63 }
 0x157   :  { %v1602_v1 = vmul.f32 -1.442695, %v428_v0  ;;  %v450_v2 = vrot.slane %v428_v0, 4 }
 0x158   :  { %v401_v4 = vpop.f32.mrf.mxu2  ;;  %v414_v6 = vpop.f32.mrf.mxu3 }
 0x159   :  { %1706 = vpow2.f32 %v1602_v1  ;;  %v1603_v11 = vmul.f32 -1.442695, %v450_v2  ;;  %v423_v14 = vrot.slane %v414_v6, 4  ;;  %v377_v18 = vpop.f32.mrf.mxu0  ;;  %v390_v19 = vpop.f32.mrf.mxu1 }
 0x15b   :  { %1708 = vpow2.f32 %v1603_v11  ;;  %v425_v20 = vsel %vm271_vm0, %v401_v4, %v423_v14 }
 0x15c   :  { %v429_v22 = vadd.f32 %v1589_v13, %v425_v20 }
 0x15e   :  { %v473_v27 = vrot.slane %v429_v22, 4 }
 0x15f   :  { %v1707_v28 = vpop.eup %1706 }
 0x160   :  { %v433_v30 = vadd.f32 1.0, %v1707_v28  ;;  %v1604_v35 = vmul.f32 -1.442695, %v473_v27  ;;  %v403_v36 = vpop.f32.mrf.mxu2  ;;  %v416_v39 = vpop.f32.mrf.mxu3 }
 0x161   :  { %v1709_v47 = vpop.eup %1708 }
 0x162   :  { %1710 = vrcp.f32 %v433_v30  ;;  %v455_v48 = vadd.f32 1.0, %v1709_v47  ;;  %v445_v60 = vand.u32 2147483648, %v433_v30  ;;  %v443_v0 = vand.u32 2147483647, %v433_v30 }
 0x163   :  { %1712 = vpow2.f32 %v1604_v35  ;;  %vm439_vm2 = vweird.f32 %v433_v30 }
 0x164   :  { %1714 = vrcp.f32 %v455_v48  ;;  %v467_v1 = vand.u32 2147483648, %v455_v48  ;;  %v465_v6 = vand.u32 2147483647, %v455_v48  ;;  %v446_v11 = vor.u32 1.1754944e-38, %v445_v60 }
 0x165   :  { %vm461_vm5 = vweird.f32 %v455_v48  ;;  %vm444_vm6 = vcmp.eq.f32.partialorder %v443_v0, 8.507059e+37 }
 0x166   :  { %v468_v19 = vor.u32 1.1754944e-38, %v467_v1  ;;  %vm466_vm8 = vcmp.eq.f32.partialorder %v465_v6, 8.507059e+37 }
 0x168   :  { %v1711_v49 = vpop.eup %1710 }
 0x169   :  { %v1713_v51 = vpop.eup %1712  ;;  %v435_v53 = vmul.f32 %v1711_v49, %v433_v30  ;;  %vm440_vm1 = vweird.f32 %v1711_v49 }
 0x16a   :  { %v1715_v37 = vpop.eup %1714  ;;  %v478_v54 = vadd.f32 1.0, %v1713_v51  ;;  %vm441_vm4 = vmor %vm439_vm2, %vm440_vm1 }
 0x16b   :  { %v436_v55 = vsub.f32 1.0, %v435_v53  ;;  %v457_v59 = vmul.f32 %v1715_v37, %v455_v48  ;;  %vm462_vm3 = vweird.f32 %v1715_v37 }
 0x16c   :  { %1716 = vrcp.f32 %v478_v54  ;;  %vm463_vm7 = vmor %vm461_vm5, %vm462_vm3  ;;  %v490_v53 = vand.u32 2147483648, %v478_v54  ;;  %vm484_vm11 = vweird.f32 %v478_v54 }
 0x16d   :  { %v458_v61 = vsub.f32 1.0, %v457_v59  ;;  %v437_v63 = vmul.f32 %v1711_v49, %v436_v55  ;;  %1718 = vtanh.f32 %v429_v22  ;;  %v1605_v22 = vld [vmem:[%s2629_s1 + $0x4] sm:$0xf]  ;;  %v488_v55 = vand.u32 2147483647, %v478_v54 }
 0x16e   :  { %vm512_vm9 = vcmp.gt.f32.partialorder %v1605_v22, 0.0  ;;  %v491_v60 = vor.u32 1.1754944e-38, %v490_v53 }
 0x16f   :  { %v459_v2 = vmul.f32 %v1715_v37, %v458_v61  ;;  %v438_v4 = vadd.f32 %v1711_v49, %v437_v63  ;;  %vm489_vm13 = vcmp.eq.f32.partialorder %v488_v55, 8.507059e+37 }
 0x171   :  { %v442_v13 = vsel %vm441_vm4, %v1711_v49, %v438_v4  ;;  %v460_v14 = vadd.f32 %v1715_v37, %v459_v2 }
 0x172   :  { %v1717_v18 = vpop.eup %1716  ;;  %v447_v20 = vsel %vm444_vm6, %v446_v11, %v442_v13  ;;  %v1608_v11 = vld [vmem:[%s2628_s0 + $0x20] sm:$0xff] }
 0x173   :  { %v464_v27 = vsel %vm463_vm7, %v1715_v37, %v460_v14  ;;  %v480_v28 = vmul.f32 %v1717_v18, %v478_v54  ;;  %v1719_v30 = vpop.eup %1718  ;;  %vm485_vm10 = vweird.f32 %v1717_v18 }
 0x174   :  { %v469_v35 = vsel %vm466_vm8, %v468_v19, %v464_v27  ;;  %v495_v47 = vmul.f32 %v1719_v30, %v447_v20  ;;  %vm486_vm12 = vmor %vm484_vm11, %vm485_vm10  ;;  %v1609_v30 = vld [vmem:[%s2628_s0 + $0x28] sm:$0xff] }
 0x175   :  { %v481_v36 = vsub.f32 1.0, %v480_v28  ;;  %v494_v39 = vmul.f32 %v469_v35, %v2241_v32 }
 0x177   :  { %v496_v48 = vadd.f32 %v495_v47, %v494_v39  ;;  %v482_v49 = vmul.f32 %v1717_v18, %v481_v36 }
 0x179   :  { %1720 = vtanh.f32 %v496_v48  ;;  %v483_v51 = vadd.f32 %v1717_v18, %v482_v49  ;;  %v2303_v37 = vsel %vm512_vm9, %v496_v48, %v2241_v32 }
 0x17b   :  { %v487_v59 = vsel %vm486_vm12, %v1717_v18, %v483_v51 }
 0x17c   :  { %v492_v63 = vsel %vm489_vm13, %v491_v60, %v487_v59 }
 0x17f   :  { %v1721_v61 = vpop.eup %1720 }
 0x180   :  { %v498_v0 = vmul.f32 %v1721_v61, %v492_v63 }
 0x182   :  { %v501_v1 = vmul.f32 %v1605_v22, %v498_v0  ;;  %v2307_v2 = vsel %vm512_vm9, %v498_v0, %v2246_v52 }
 0x183   :  { %v518_v4 = vpack.c.bf16 %v2307_v2, %v2307_v2 }
 0x184   :  { %1606 = vst.msk [vmem:[%s2631_s3 + $0x4] sm:$0xf] %vm349_vm14, %v501_v1 }
 0x185   :  { %505 = vst [vmem:[#allocation1] ss:$2 sm:$0xff] %v501_v1  ;;  %527 = vmatmul.bf16.vlgmr.msra.gmra.mxu0 %v518_v4  ;;  %540 = vmatmul.bf16.vlgmr.msra.gmra.mxu1 %v518_v4 }
 0x186   :  { %553 = vmatmul.bf16.vlgmr.msra.gmra.mxu2 %v518_v4  ;;  %566 = vmatmul.bf16.vlgmr.msra.gmra.mxu3 %v518_v4 }
 0x187   :  { %825 = vmatpush.bf16.msra.mxu0 %v1886_v3  ;;  %838 = vmatpush.bf16.msra.mxu1 %v1897_v7 }
 0x188   :  { %851 = vmatpush.bf16.msra.mxu2 %v1899_v8  ;;  %864 = vmatpush.bf16.msra.mxu3 %v1911_v12 }
 0x18b   :  { %826 = vmatpush.bf16.msra.mxu0 %v1924_v16  ;;  %839 = vmatpush.bf16.msra.mxu1 %v1926_v17 }
 0x18c   :  { %v506_v32 = vld.sshfl [vmem:[#allocation1] sm:$0xff pattern:$0x75316420]  ;;  %852 = vmatpush.bf16.msra.mxu2 %v1938_v21  ;;  %865 = vmatpush.bf16.msra.mxu3 %v1949_v25 }
 0x18d   :  { %507 = vrot.lane.b32.xlu0 %v506_v32, %s1845_s28 }
 0x18f   :  { %827 = vmatpush.bf16.msra.mxu0 %v1961_v29  ;;  %840 = vmatpush.bf16.msra.mxu1 %v1974_v33 }
 0x190   :  { %853 = vmatpush.bf16.msra.mxu2 %v1976_v34  ;;  %866 = vmatpush.bf16.msra.mxu3 %v1988_v38 }
 0x193   :  { %828 = vmatpush.bf16.msra.mxu0 %v2006_v44  ;;  %841 = vmatpush.bf16.msra.mxu1 %v2010_v45 }
 0x194   :  { %854 = vmatpush.bf16.msra.mxu2 %v2012_v46  ;;  %867 = vmatpush.bf16.msra.mxu3 %v2024_v50 }
 0x197   :  { %829 = vmatpush.bf16.msra.mxu0 %v2042_v56  ;;  %842 = vmatpush.bf16.msra.mxu1 %v2046_v57 }
 0x198   :  { %855 = vmatpush.bf16.msra.mxu2 %v2048_v58  ;;  %868 = vmatpush.bf16.msra.mxu3 %v2060_v62 }
 0x19b   :  { %830 = vmatpush.bf16.msra.mxu0 %v2078_v5  ;;  %843 = vmatpush.bf16.msra.mxu1 %v2085_v9 }
 0x19c   :  { %856 = vmatpush.bf16.msra.mxu2 %v2087_v10  ;;  %869 = vmatpush.bf16.msra.mxu3 %v2099_v15 }
 0x19f   :  { %831 = vmatpush.bf16.msra.mxu0 %v2114_v23  ;;  %844 = vmatpush.bf16.msra.mxu1 %v2118_v24 }
 0x1a0   :  { %857 = vmatpush.bf16.msra.mxu2 %v2120_v26  ;;  %870 = vmatpush.bf16.msra.mxu3 %v2132_v31 }
 0x1a3   :  { %832 = vmatpush.bf16.msra.mxu0 %v2150_v40  ;;  %845 = vmatpush.bf16.msra.mxu1 %v2154_v41 }
 0x1a4   :  { %858 = vmatpush.bf16.msra.mxu2 %v2156_v42  ;;  %871 = vmatpush.bf16.msra.mxu3 %v2159_v43 }
 0x1ff   :  { %v508_v52 = vpop.permute.xlu0 %507 }
 0x200   :  { %1607 = vst.msk [vmem:[%s2632_s4 + $0x18] sm:$0xf] %vm349_vm14, %v508_v52 }
 0x202   :  { %v528_v54 = vpop.f32.mrf.mxu0  ;;  %v541_v6 = vpop.f32.mrf.mxu1 }
 0x203   :  { %v575_v13 = vrot.slane %v541_v6, 4 }
 0x205   :  { %v577_v14 = vsel %vm271_vm0, %v528_v54, %v575_v13 }
 0x206   :  { %v581_v18 = vadd.f32 %v1608_v11, %v577_v14 }
 0x208   :  { %v1610_v19 = vmul.f32 -1.442695, %v581_v18  ;;  %v603_v20 = vrot.slane %v581_v18, 4 }
 0x209   :  { %v554_v27 = vpop.f32.mrf.mxu2  ;;  %v567_v28 = vpop.f32.mrf.mxu3 }
 0x20a   :  { %1722 = vpow2.f32 %v1610_v19  ;;  %v1611_v22 = vmul.f32 -1.442695, %v603_v20  ;;  %v576_v35 = vrot.slane %v567_v28, 4  ;;  %v530_v36 = vpop.f32.mrf.mxu0  ;;  %v543_v39 = vpop.f32.mrf.mxu1 }
 0x20c   :  { %1724 = vpow2.f32 %v1611_v22  ;;  %v578_v47 = vsel %vm271_vm0, %v554_v27, %v576_v35 }
 0x20d   :  { %v582_v48 = vadd.f32 %v1609_v30, %v578_v47 }
 0x20f   :  { %v626_v49 = vrot.slane %v582_v48, 4 }
 0x210   :  { %v1723_v51 = vpop.eup %1722 }
 0x211   :  { %v586_v53 = vadd.f32 1.0, %v1723_v51  ;;  %v1612_v55 = vmul.f32 -1.442695, %v626_v49  ;;  %v556_v59 = vpop.f32.mrf.mxu2  ;;  %v569_v60 = vpop.f32.mrf.mxu3 }
 0x212   :  { %v1725_v61 = vpop.eup %1724 }
 0x213   :  { %1726 = vrcp.f32 %v586_v53  ;;  %v608_v63 = vadd.f32 1.0, %v1725_v61  ;;  %v598_v11 = vand.u32 2147483648, %v586_v53  ;;  %v596_v18 = vand.u32 2147483647, %v586_v53 }
 0x214   :  { %1728 = vpow2.f32 %v1612_v55  ;;  %vm592_vm1 = vweird.f32 %v586_v53 }
 0x215   :  { %1730 = vrcp.f32 %v608_v63  ;;  %v620_v19 = vand.u32 2147483648, %v608_v63  ;;  %v618_v28 = vand.u32 2147483647, %v608_v63  ;;  %v599_v22 = vor.u32 1.1754944e-38, %v598_v11 }
 0x216   :  { %vm614_vm4 = vweird.f32 %v608_v63  ;;  %vm597_vm5 = vcmp.eq.f32.partialorder %v596_v18, 8.507059e+37 }
 0x217   :  { %v621_v39 = vor.u32 1.1754944e-38, %v620_v19  ;;  %vm619_vm7 = vcmp.eq.f32.partialorder %v618_v28, 8.507059e+37 }
 0x219   :  { %v1727_v0 = vpop.eup %1726 }
 0x21a   :  { %v1729_v1 = vpop.eup %1728  ;;  %v588_v4 = vmul.f32 %v1727_v0, %v586_v53  ;;  %vm593_vm15 = vweird.f32 %v1727_v0 }
 0x21b   :  { %v1731_v32 = vpop.eup %1730  ;;  %v631_v52 = vadd.f32 1.0, %v1729_v1  ;;  %vm594_vm3 = vmor %vm592_vm1, %vm593_vm15 }
 0x21c   :  { %v589_v54 = vsub.f32 1.0, %v588_v4  ;;  %v610_v6 = vmul.f32 %v1731_v32, %v608_v63  ;;  %vm615_vm2 = vweird.f32 %v1731_v32 }
 0x21d   :  { %1732 = vrcp.f32 %v631_v52  ;;  %vm616_vm6 = vmor %vm614_vm4, %vm615_vm2  ;;  %v643_v4 = vand.u32 2147483648, %v631_v52  ;;  %vm637_vm10 = vweird.f32 %v631_v52 }
 0x21e   :  { %v611_v13 = vsub.f32 1.0, %v610_v6  ;;  %v590_v14 = vmul.f32 %v1727_v0, %v589_v54  ;;  %1734 = vtanh.f32 %v582_v48  ;;  %v1613_v48 = vld [vmem:[%s2629_s1 + $0x8] sm:$0xf]  ;;  %v641_v54 = vand.u32 2147483647, %v631_v52 }
 0x21f   :  { %vm665_vm8 = vcmp.gt.f32.partialorder %v1613_v48, 0.0  ;;  %v644_v11 = vor.u32 1.1754944e-38, %v643_v4 }
 0x220   :  { %v612_v20 = vmul.f32 %v1731_v32, %v611_v13  ;;  %v591_v27 = vadd.f32 %v1727_v0, %v590_v14  ;;  %vm642_vm12 = vcmp.eq.f32.partialorder %v641_v54, 8.507059e+37 }
 0x222   :  { %v595_v30 = vsel %vm594_vm3, %v1727_v0, %v591_v27  ;;  %v613_v35 = vadd.f32 %v1731_v32, %v612_v20 }
 0x223   :  { %v1733_v36 = vpop.eup %1732  ;;  %v600_v47 = vsel %vm597_vm5, %v599_v22, %v595_v30  ;;  %v1616_v22 = vld [vmem:[%s2628_s0 + $0x30] sm:$0xff] }
 0x224   :  { %v617_v49 = vsel %vm616_vm6, %v1731_v32, %v613_v35  ;;  %v633_v51 = vmul.f32 %v1733_v36, %v631_v52  ;;  %v1735_v53 = vpop.eup %1734  ;;  %vm638_vm9 = vweird.f32 %v1733_v36 }
 0x225   :  { %v622_v55 = vsel %vm619_vm7, %v621_v39, %v617_v49  ;;  %v648_v61 = vmul.f32 %v1735_v53, %v600_v47  ;;  %vm639_vm11 = vmor %vm637_vm10, %vm638_vm9  ;;  %v1617_v53 = vld [vmem:[%s2628_s0 + $0x38] sm:$0xff] }
 0x226   :  { %v634_v59 = vsub.f32 1.0, %v633_v51  ;;  %v647_v60 = vmul.f32 %v622_v55, %v2303_v37 }
 0x228   :  { %v649_v63 = vadd.f32 %v648_v61, %v647_v60  ;;  %v635_v0 = vmul.f32 %v1733_v36, %v634_v59 }
 0x22a   :  { %1736 = vtanh.f32 %v649_v63  ;;  %v636_v1 = vadd.f32 %v1733_v36, %v635_v0  ;;  %v2366_v32 = vsel %vm665_vm8, %v649_v63, %v2303_v37 }
 0x22c   :  { %v640_v6 = vsel %vm639_vm11, %v1733_v36, %v636_v1 }
 0x22d   :  { %v645_v14 = vsel %vm642_vm12, %v644_v11, %v640_v6 }
 0x230   :  { %v1737_v13 = vpop.eup %1736 }
 0x231   :  { %v651_v18 = vmul.f32 %v1737_v13, %v645_v14 }
 0x233   :  { %v654_v19 = vmul.f32 %v1613_v48, %v651_v18  ;;  %v2370_v20 = vsel %vm665_vm8, %v651_v18, %v2307_v2 }
 0x234   :  { %v671_v27 = vpack.c.bf16 %v2370_v20, %v2370_v20 }
 0x235   :  { %1614 = vst.msk [vmem:[%s2631_s3 + $0x8] sm:$0xf] %vm349_vm14, %v654_v19 }
 0x236   :  { %658 = vst [vmem:[#allocation1] ss:$2 sm:$0xff] %v654_v19  ;;  %680 = vmatmul.bf16.vlgmr.msrb.gmra.mxu0 %v671_v27  ;;  %693 = vmatmul.bf16.vlgmr.msrb.gmra.mxu1 %v671_v27 }
 0x237   :  { %706 = vmatmul.bf16.vlgmr.msrb.gmra.mxu2 %v671_v27  ;;  %719 = vmatmul.bf16.vlgmr.msrb.gmra.mxu3 %v671_v27 }
 0x238   :  { %978 = vmatpush.bf16.msrb.mxu0 %v1886_v3  ;;  %991 = vmatpush.bf16.msrb.mxu1 %v1897_v7 }
 0x239   :  { %1004 = vmatpush.bf16.msrb.mxu2 %v1899_v8  ;;  %1017 = vmatpush.bf16.msrb.mxu3 %v1911_v12 }
 0x23c   :  { %979 = vmatpush.bf16.msrb.mxu0 %v1924_v16  ;;  %992 = vmatpush.bf16.msrb.mxu1 %v1926_v17 }
 0x23d   :  { %v659_v37 = vld.sshfl [vmem:[#allocation1] sm:$0xff pattern:$0x75316420]  ;;  %1005 = vmatpush.bf16.msrb.mxu2 %v1938_v21  ;;  %1018 = vmatpush.bf16.msrb.mxu3 %v1949_v25 }
 0x23e   :  { %660 = vrot.lane.b32.xlu1 %v659_v37, %s1845_s28 }
 0x240   :  { %980 = vmatpush.bf16.msrb.mxu0 %v1961_v29  ;;  %993 = vmatpush.bf16.msrb.mxu1 %v1974_v33 }
 0x241   :  { %1006 = vmatpush.bf16.msrb.mxu2 %v1976_v34  ;;  %1019 = vmatpush.bf16.msrb.mxu3 %v1988_v38 }
 0x244   :  { %981 = vmatpush.bf16.msrb.mxu0 %v2006_v44  ;;  %994 = vmatpush.bf16.msrb.mxu1 %v2010_v45 }
 0x245   :  { %1007 = vmatpush.bf16.msrb.mxu2 %v2012_v46  ;;  %1020 = vmatpush.bf16.msrb.mxu3 %v2024_v50 }
 0x248   :  { %982 = vmatpush.bf16.msrb.mxu0 %v2042_v56  ;;  %995 = vmatpush.bf16.msrb.mxu1 %v2046_v57 }
 0x249   :  { %1008 = vmatpush.bf16.msrb.mxu2 %v2048_v58  ;;  %1021 = vmatpush.bf16.msrb.mxu3 %v2060_v62 }
 0x24c   :  { %983 = vmatpush.bf16.msrb.mxu0 %v2078_v5  ;;  %996 = vmatpush.bf16.msrb.mxu1 %v2085_v9 }
 0x24d   :  { %1009 = vmatpush.bf16.msrb.mxu2 %v2087_v10  ;;  %1022 = vmatpush.bf16.msrb.mxu3 %v2099_v15 }
 0x250   :  { %984 = vmatpush.bf16.msrb.mxu0 %v2114_v23  ;;  %997 = vmatpush.bf16.msrb.mxu1 %v2118_v24 }
 0x251   :  { %1010 = vmatpush.bf16.msrb.mxu2 %v2120_v26  ;;  %1023 = vmatpush.bf16.msrb.mxu3 %v2132_v31 }
 0x254   :  { %985 = vmatpush.bf16.msrb.mxu0 %v2150_v40  ;;  %998 = vmatpush.bf16.msrb.mxu1 %v2154_v41 }
 0x255   :  { %1011 = vmatpush.bf16.msrb.mxu2 %v2156_v42  ;;  %1024 = vmatpush.bf16.msrb.mxu3 %v2159_v43 }
 0x2b0   :  { %v661_v2 = vpop.permute.xlu1 %660 }
 0x2b1   :  { %1615 = vst.msk [vmem:[%s2632_s4 + $0x14] sm:$0xf] %vm349_vm14, %v661_v2 }
 0x2b3   :  { %v681_v52 = vpop.f32.mrf.mxu0  ;;  %v694_v28 = vpop.f32.mrf.mxu1 }
 0x2b4   :  { %v728_v30 = vrot.slane %v694_v28, 4 }
 0x2b6   :  { %v730_v35 = vsel %vm271_vm0, %v681_v52, %v728_v30 }
 0x2b7   :  { %v734_v36 = vadd.f32 %v1616_v22, %v730_v35 }
 0x2b9   :  { %v1618_v39 = vmul.f32 -1.442695, %v734_v36  ;;  %v756_v47 = vrot.slane %v734_v36, 4 }
 0x2ba   :  { %v707_v49 = vpop.f32.mrf.mxu2  ;;  %v720_v51 = vpop.f32.mrf.mxu3 }
 0x2bb   :  { %1738 = vpow2.f32 %v1618_v39  ;;  %v1619_v48 = vmul.f32 -1.442695, %v756_v47  ;;  %v729_v55 = vrot.slane %v720_v51, 4  ;;  %v683_v59 = vpop.f32.mrf.mxu0  ;;  %v696_v60 = vpop.f32.mrf.mxu1 }
 0x2bd   :  { %1740 = vpow2.f32 %v1619_v48  ;;  %v731_v61 = vsel %vm271_vm0, %v707_v49, %v729_v55 }
 0x2be   :  { %v735_v63 = vadd.f32 %v1617_v53, %v731_v61 }
 0x2c0   :  { %v779_v0 = vrot.slane %v735_v63, 4 }
 0x2c1   :  { %v1739_v1 = vpop.eup %1738 }
 0x2c2   :  { %v739_v4 = vadd.f32 1.0, %v1739_v1  ;;  %v1620_v54 = vmul.f32 -1.442695, %v779_v0  ;;  %v709_v6 = vpop.f32.mrf.mxu2  ;;  %v722_v11 = vpop.f32.mrf.mxu3 }
 0x2c3   :  { %v1741_v13 = vpop.eup %1740 }
 0x2c4   :  { %1742 = vrcp.f32 %v739_v4  ;;  %v761_v14 = vadd.f32 1.0, %v1741_v13  ;;  %v751_v22 = vand.u32 2147483648, %v739_v4  ;;  %v749_v36 = vand.u32 2147483647, %v739_v4 }
 0x2c5   :  { %1744 = vpow2.f32 %v1620_v54  ;;  %vm745_vm15 = vweird.f32 %v739_v4 }
 0x2c6   :  { %1746 = vrcp.f32 %v761_v14  ;;  %v773_v39 = vand.u32 2147483648, %v761_v14  ;;  %v771_v51 = vand.u32 2147483647, %v761_v14  ;;  %v752_v48 = vor.u32 1.1754944e-38, %v751_v22 }
 0x2c7   :  { %vm767_vm3 = vweird.f32 %v761_v14  ;;  %vm750_vm4 = vcmp.eq.f32.partialorder %v749_v36, 8.507059e+37 }
 0x2c8   :  { %v774_v60 = vor.u32 1.1754944e-38, %v773_v39  ;;  %vm772_vm6 = vcmp.eq.f32.partialorder %v771_v51, 8.507059e+37 }
 0x2ca   :  { %v1743_v18 = vpop.eup %1742 }
 0x2cb   :  { %v1745_v19 = vpop.eup %1744  ;;  %v741_v27 = vmul.f32 %v1743_v18, %v739_v4  ;;  %vm746_vm13 = vweird.f32 %v1743_v18 }
 0x2cc   :  { %v1747_v37 = vpop.eup %1746  ;;  %v784_v2 = vadd.f32 1.0, %v1745_v19  ;;  %vm747_vm2 = vmor %vm745_vm15, %vm746_vm13 }
 0x2cd   :  { %v742_v52 = vsub.f32 1.0, %v741_v27  ;;  %v763_v28 = vmul.f32 %v1747_v37, %v761_v14  ;;  %vm768_vm1 = vweird.f32 %v1747_v37 }
 0x2ce   :  { %1748 = vrcp.f32 %v784_v2  ;;  %vm769_vm5 = vmor %vm767_vm3, %vm768_vm1  ;;  %v796_v27 = vand.u32 2147483648, %v784_v2  ;;  %vm790_vm9 = vweird.f32 %v784_v2 }
 0x2cf   :  { %v764_v30 = vsub.f32 1.0, %v763_v28  ;;  %v743_v35 = vmul.f32 %v1743_v18, %v742_v52  ;;  %1750 = vtanh.f32 %v735_v63  ;;  %v1621_v63 = vld [vmem:[%s2629_s1 + $0xc] sm:$0xf]  ;;  %v794_v52 = vand.u32 2147483647, %v784_v2 }
 0x2d0   :  { %vm818_vm7 = vcmp.gt.f32.partialorder %v1621_v63, 0.0  ;;  %v797_v22 = vor.u32 1.1754944e-38, %v796_v27 }
 0x2d1   :  { %v765_v47 = vmul.f32 %v1747_v37, %v764_v30  ;;  %v744_v49 = vadd.f32 %v1743_v18, %v743_v35  ;;  %vm795_vm11 = vcmp.eq.f32.partialorder %v794_v52, 8.507059e+37 }
 0x2d3   :  { %v748_v53 = vsel %vm747_vm2, %v1743_v18, %v744_v49  ;;  %v766_v55 = vadd.f32 %v1747_v37, %v765_v47 }
 0x2d4   :  { %v1749_v59 = vpop.eup %1748  ;;  %v753_v61 = vsel %vm750_vm4, %v752_v48, %v748_v53  ;;  %v1624_v48 = vld [vmem:[%s2628_s0 + $0x40] sm:$0xff] }
 0x2d5   :  { %v770_v0 = vsel %vm769_vm5, %v1747_v37, %v766_v55  ;;  %v786_v1 = vmul.f32 %v1749_v59, %v784_v2  ;;  %v1751_v4 = vpop.eup %1750  ;;  %vm791_vm8 = vweird.f32 %v1749_v59 }
 0x2d6   :  { %v775_v54 = vsel %vm772_vm6, %v774_v60, %v770_v0  ;;  %v801_v13 = vmul.f32 %v1751_v4, %v753_v61  ;;  %vm792_vm10 = vmor %vm790_vm9, %vm791_vm8  ;;  %v1625_v4 = vld [vmem:[%s2628_s0 + $0x48] sm:$0xff] }
 0x2d7   :  { %v787_v6 = vsub.f32 1.0, %v786_v1  ;;  %v800_v11 = vmul.f32 %v775_v54, %v2366_v32 }
 0x2d9   :  { %v802_v14 = vadd.f32 %v801_v13, %v800_v11  ;;  %v788_v18 = vmul.f32 %v1749_v59, %v787_v6 }
 0x2db   :  { %1752 = vtanh.f32 %v802_v14  ;;  %v789_v19 = vadd.f32 %v1749_v59, %v788_v18  ;;  %v2429_v37 = vsel %vm818_vm7, %v802_v14, %v2366_v32 }
 0x2dd   :  { %v793_v28 = vsel %vm792_vm10, %v1749_v59, %v789_v19 }
 0x2de   :  { %v798_v35 = vsel %vm795_vm11, %v797_v22, %v793_v28 }
 0x2e1   :  { %v1753_v30 = vpop.eup %1752 }
 0x2e2   :  { %v804_v36 = vmul.f32 %v1753_v30, %v798_v35 }
 0x2e4   :  { %v807_v39 = vmul.f32 %v1621_v63, %v804_v36  ;;  %v2433_v47 = vsel %vm818_vm7, %v804_v36, %v2370_v20 }
 0x2e5   :  { %v824_v49 = vpack.c.bf16 %v2433_v47, %v2433_v47 }
 0x2e6   :  { %1622 = vst.msk [vmem:[%s2631_s3 + $0xc] sm:$0xf] %vm349_vm14, %v807_v39 }
 0x2e7   :  { %811 = vst [vmem:[#allocation1] ss:$2 sm:$0xff] %v807_v39  ;;  %833 = vmatmul.bf16.vlgmr.msra.gmra.mxu0 %v824_v49  ;;  %846 = vmatmul.bf16.vlgmr.msra.gmra.mxu1 %v824_v49 }
 0x2e8   :  { %859 = vmatmul.bf16.vlgmr.msra.gmra.mxu2 %v824_v49  ;;  %872 = vmatmul.bf16.vlgmr.msra.gmra.mxu3 %v824_v49 }
 0x2e9   :  { %1131 = vmatpush.bf16.msra.mxu0 %v1886_v3  ;;  %1144 = vmatpush.bf16.msra.mxu1 %v1897_v7 }
 0x2ea   :  { %1157 = vmatpush.bf16.msra.mxu2 %v1899_v8  ;;  %1170 = vmatpush.bf16.msra.mxu3 %v1911_v12 }
 0x2ed   :  { %1132 = vmatpush.bf16.msra.mxu0 %v1924_v16  ;;  %1145 = vmatpush.bf16.msra.mxu1 %v1926_v17 }
 0x2ee   :  { %v812_v32 = vld.sshfl [vmem:[#allocation1] sm:$0xff pattern:$0x75316420]  ;;  %1158 = vmatpush.bf16.msra.mxu2 %v1938_v21  ;;  %1171 = vmatpush.bf16.msra.mxu3 %v1949_v25 }
 0x2ef   :  { %813 = vrot.lane.b32.xlu1 %v812_v32, %s1845_s28 }
 0x2f1   :  { %1133 = vmatpush.bf16.msra.mxu0 %v1961_v29  ;;  %1146 = vmatpush.bf16.msra.mxu1 %v1974_v33 }
 0x2f2   :  { %1159 = vmatpush.bf16.msra.mxu2 %v1976_v34  ;;  %1172 = vmatpush.bf16.msra.mxu3 %v1988_v38 }
 0x2f5   :  { %1134 = vmatpush.bf16.msra.mxu0 %v2006_v44  ;;  %1147 = vmatpush.bf16.msra.mxu1 %v2010_v45 }
 0x2f6   :  { %1160 = vmatpush.bf16.msra.mxu2 %v2012_v46  ;;  %1173 = vmatpush.bf16.msra.mxu3 %v2024_v50 }
 0x2f9   :  { %1135 = vmatpush.bf16.msra.mxu0 %v2042_v56  ;;  %1148 = vmatpush.bf16.msra.mxu1 %v2046_v57 }
 0x2fa   :  { %1161 = vmatpush.bf16.msra.mxu2 %v2048_v58  ;;  %1174 = vmatpush.bf16.msra.mxu3 %v2060_v62 }
 0x2fd   :  { %1136 = vmatpush.bf16.msra.mxu0 %v2078_v5  ;;  %1149 = vmatpush.bf16.msra.mxu1 %v2085_v9 }
 0x2fe   :  { %1162 = vmatpush.bf16.msra.mxu2 %v2087_v10  ;;  %1175 = vmatpush.bf16.msra.mxu3 %v2099_v15 }
 0x301   :  { %1137 = vmatpush.bf16.msra.mxu0 %v2114_v23  ;;  %1150 = vmatpush.bf16.msra.mxu1 %v2118_v24 }
 0x302   :  { %1163 = vmatpush.bf16.msra.mxu2 %v2120_v26  ;;  %1176 = vmatpush.bf16.msra.mxu3 %v2132_v31 }
 0x305   :  { %1138 = vmatpush.bf16.msra.mxu0 %v2150_v40  ;;  %1151 = vmatpush.bf16.msra.mxu1 %v2154_v41 }
 0x306   :  { %1164 = vmatpush.bf16.msra.mxu2 %v2156_v42  ;;  %1177 = vmatpush.bf16.msra.mxu3 %v2159_v43 }
 0x361   :  { %v814_v20 = vpop.permute.xlu1 %813 }
 0x362   :  { %1623 = vst.msk [vmem:[%s2632_s4 + $0x10] sm:$0xf] %vm349_vm14, %v814_v20 }
 0x364   :  { %v834_v2 = vpop.f32.mrf.mxu0  ;;  %v847_v51 = vpop.f32.mrf.mxu1 }
 0x365   :  { %v881_v53 = vrot.slane %v847_v51, 4 }
 0x367   :  { %v883_v55 = vsel %vm271_vm0, %v834_v2, %v881_v53 }
 0x368   :  { %v887_v59 = vadd.f32 %v1624_v48, %v883_v55 }
 0x36a   :  { %v1626_v60 = vmul.f32 -1.442695, %v887_v59  ;;  %v909_v61 = vrot.slane %v887_v59, 4 }
 0x36b   :  { %v860_v0 = vpop.f32.mrf.mxu2  ;;  %v873_v1 = vpop.f32.mrf.mxu3 }
 0x36c   :  { %1754 = vpow2.f32 %v1626_v60  ;;  %v1627_v63 = vmul.f32 -1.442695, %v909_v61  ;;  %v882_v54 = vrot.slane %v873_v1, 4  ;;  %v836_v6 = vpop.f32.mrf.mxu0  ;;  %v849_v11 = vpop.f32.mrf.mxu1 }
 0x36e   :  { %1756 = vpow2.f32 %v1627_v63  ;;  %v884_v13 = vsel %vm271_vm0, %v860_v0, %v882_v54 }
 0x36f   :  { %v888_v14 = vadd.f32 %v1625_v4, %v884_v13 }
 0x371   :  { %v932_v18 = vrot.slane %v888_v14, 4 }
 0x372   :  { %v1755_v19 = vpop.eup %1754 }
 0x373   :  { %v892_v27 = vadd.f32 1.0, %v1755_v19  ;;  %v1628_v52 = vmul.f32 -1.442695, %v932_v18  ;;  %v862_v28 = vpop.f32.mrf.mxu2  ;;  %v875_v22 = vpop.f32.mrf.mxu3 }
 0x374   :  { %v1757_v30 = vpop.eup %1756 }
 0x375   :  { %1758 = vrcp.f32 %v892_v27  ;;  %v914_v35 = vadd.f32 1.0, %v1757_v30  ;;  %v904_v48 = vand.u32 2147483648, %v892_v27  ;;  %v902_v59 = vand.u32 2147483647, %v892_v27 }
 0x376   :  { %1760 = vpow2.f32 %v1628_v52  ;;  %vm898_vm13 = vweird.f32 %v892_v27 }
 0x377   :  { %1762 = vrcp.f32 %v914_v35  ;;  %v926_v60 = vand.u32 2147483648, %v914_v35  ;;  %v924_v1 = vand.u32 2147483647, %v914_v35  ;;  %v905_v63 = vor.u32 1.1754944e-38, %v904_v48 }
 0x378   :  { %vm920_vm2 = vweird.f32 %v914_v35  ;;  %vm903_vm3 = vcmp.eq.f32.partialorder %v902_v59, 8.507059e+37 }
 0x379   :  { %v927_v11 = vor.u32 1.1754944e-38, %v926_v60  ;;  %vm925_vm5 = vcmp.eq.f32.partialorder %v924_v1, 8.507059e+37 }
 0x37b   :  { %v1759_v36 = vpop.eup %1758 }
 0x37c   :  { %v1761_v39 = vpop.eup %1760  ;;  %v894_v49 = vmul.f32 %v1759_v36, %v892_v27  ;;  %vm899_vm12 = vweird.f32 %v1759_v36 }
 0x37d   :  { %v1763_v32 = vpop.eup %1762  ;;  %v937_v20 = vadd.f32 1.0, %v1761_v39  ;;  %vm900_vm1 = vmor %vm898_vm13, %vm899_vm12 }
 0x37e   :  { %v895_v2 = vsub.f32 1.0, %v894_v49  ;;  %v916_v51 = vmul.f32 %v1763_v32, %v914_v35  ;;  %vm921_vm15 = vweird.f32 %v1763_v32 }
 0x37f   :  { %1764 = vrcp.f32 %v937_v20  ;;  %vm922_vm4 = vmor %vm920_vm2, %vm921_vm15  ;;  %v949_v49 = vand.u32 2147483648, %v937_v20  ;;  %vm943_vm8 = vweird.f32 %v937_v20 }
 0x380   :  { %v917_v53 = vsub.f32 1.0, %v916_v51  ;;  %v896_v55 = vmul.f32 %v1759_v36, %v895_v2  ;;  %1766 = vtanh.f32 %v888_v14  ;;  %v1629_v14 = vld [vmem:[%s2629_s1 + $0x10] sm:$0xf]  ;;  %v947_v2 = vand.u32 2147483647, %v937_v20 }
 0x381   :  { %vm971_vm6 = vcmp.gt.f32.partialorder %v1629_v14, 0.0  ;;  %v950_v48 = vor.u32 1.1754944e-38, %v949_v49 }
 0x382   :  { %v918_v61 = vmul.f32 %v1763_v32, %v917_v53  ;;  %v897_v0 = vadd.f32 %v1759_v36, %v896_v55  ;;  %vm948_vm10 = vcmp.eq.f32.partialorder %v947_v2, 8.507059e+37 }
 0x384   :  { %v901_v4 = vsel %vm900_vm1, %v1759_v36, %v897_v0  ;;  %v919_v54 = vadd.f32 %v1763_v32, %v918_v61 }
 0x385   :  { %v1765_v6 = vpop.eup %1764  ;;  %v906_v13 = vsel %vm903_vm3, %v905_v63, %v901_v4 }
 0x386   :  { %v923_v18 = vsel %vm922_vm4, %v1763_v32, %v919_v54  ;;  %v939_v19 = vmul.f32 %v1765_v6, %v937_v20  ;;  %v1767_v27 = vpop.eup %1766  ;;  %vm944_vm7 = vweird.f32 %v1765_v6 }
 0x387   :  { %v928_v52 = vsel %vm925_vm5, %v927_v11, %v923_v18  ;;  %v954_v30 = vmul.f32 %v1767_v27, %v906_v13  ;;  %vm945_vm9 = vmor %vm943_vm8, %vm944_vm7 }
 0x388   :  { %v940_v28 = vsub.f32 1.0, %v939_v19  ;;  %v953_v22 = vmul.f32 %v928_v52, %v2429_v37 }
 0x38a   :  { %v955_v35 = vadd.f32 %v954_v30, %v953_v22  ;;  %v941_v36 = vmul.f32 %v1765_v6, %v940_v28 }
 0x38c   :  { %1768 = vtanh.f32 %v955_v35  ;;  %v942_v39 = vadd.f32 %v1765_v6, %v941_v36  ;;  %v2492_v32 = vsel %vm971_vm6, %v955_v35, %v2429_v37  ;;  %v1637_v35 = vld [vmem:[%s2629_s1 + $0x14] sm:$0xf] }
 0x38d   :  { %vm1124_vm5 = vcmp.gt.f32.partialorder %v1637_v35, 0.0 }
 0x38e   :  { %v946_v51 = vsel %vm945_vm9, %v1765_v6, %v942_v39 }
 0x38f   :  { %v951_v55 = vsel %vm948_vm10, %v950_v48, %v946_v51 }
 0x392   :  { %v1769_v53 = vpop.eup %1768 }
 0x393   :  { %v957_v59 = vmul.f32 %v1769_v53, %v951_v55 }
 0x395   :  { %v960_v60 = vmul.f32 %v1629_v14, %v957_v59  ;;  %v2496_v61 = vsel %vm971_vm6, %v957_v59, %v2433_v47 }
 0x396   :  { %v977_v0 = vpack.c.bf16 %v2496_v61, %v2496_v61 }
 0x397   :  { %1630 = vst.msk [vmem:[%s2631_s3 + $0x10] sm:$0xf] %vm349_vm14, %v960_v60 }
 0x398   :  { %964 = vst [vmem:[#allocation1] ss:$2 sm:$0xff] %v960_v60  ;;  %986 = vmatmul.bf16.vlgmr.msrb.gmra.mxu0 %v977_v0  ;;  %999 = vmatmul.bf16.vlgmr.msrb.gmra.mxu1 %v977_v0 }
 0x399   :  { %1012 = vmatmul.bf16.vlgmr.msrb.gmra.mxu2 %v977_v0  ;;  %1025 = vmatmul.bf16.vlgmr.msrb.gmra.mxu3 %v977_v0 }
 0x39a   :  { %1284 = vmatpush.bf16.msrb.mxu0 %v1886_v3  ;;  %1297 = vmatpush.bf16.msrb.mxu1 %v1897_v7 }
 0x39b   :  { %1310 = vmatpush.bf16.msrb.mxu2 %v1899_v8  ;;  %1323 = vmatpush.bf16.msrb.mxu3 %v1911_v12  ;;  %v1632_v12 = vld [vmem:[%s2628_s0 + $0x50] sm:$0xff] }
 0x39e   :  { %1285 = vmatpush.bf16.msrb.mxu0 %v1924_v16  ;;  %1298 = vmatpush.bf16.msrb.mxu1 %v1926_v17 }
 0x39f   :  { %v965_v37 = vld.sshfl [vmem:[#allocation1] sm:$0xff pattern:$0x75316420]  ;;  %1311 = vmatpush.bf16.msrb.mxu2 %v1938_v21  ;;  %1324 = vmatpush.bf16.msrb.mxu3 %v1949_v25 }
 0x3a0   :  { %966 = vrot.lane.b32.xlu2 %v965_v37, %s1845_s28 }
 0x3a2   :  { %1286 = vmatpush.bf16.msrb.mxu0 %v1961_v29  ;;  %1299 = vmatpush.bf16.msrb.mxu1 %v1974_v33 }
 0x3a3   :  { %1312 = vmatpush.bf16.msrb.mxu2 %v1976_v34  ;;  %1325 = vmatpush.bf16.msrb.mxu3 %v1988_v38 }
 0x3a6   :  { %1287 = vmatpush.bf16.msrb.mxu0 %v2006_v44  ;;  %1300 = vmatpush.bf16.msrb.mxu1 %v2010_v45  ;;  %v1633_v44 = vld [vmem:[%s2628_s0 + $0x58] sm:$0xff] }
 0x3a7   :  { %1313 = vmatpush.bf16.msrb.mxu2 %v2012_v46  ;;  %1326 = vmatpush.bf16.msrb.mxu3 %v2024_v50 }
 0x3aa   :  { %1288 = vmatpush.bf16.msrb.mxu0 %v2042_v56  ;;  %1301 = vmatpush.bf16.msrb.mxu1 %v2046_v57 }
 0x3ab   :  { %1314 = vmatpush.bf16.msrb.mxu2 %v2048_v58  ;;  %1327 = vmatpush.bf16.msrb.mxu3 %v2060_v62 }
 0x3ae   :  { %1289 = vmatpush.bf16.msrb.mxu0 %v2078_v5  ;;  %1302 = vmatpush.bf16.msrb.mxu1 %v2085_v9 }
 0x3af   :  { %1315 = vmatpush.bf16.msrb.mxu2 %v2087_v10  ;;  %1328 = vmatpush.bf16.msrb.mxu3 %v2099_v15 }
 0x3b2   :  { %1290 = vmatpush.bf16.msrb.mxu0 %v2114_v23  ;;  %1303 = vmatpush.bf16.msrb.mxu1 %v2118_v24 }
 0x3b3   :  { %1316 = vmatpush.bf16.msrb.mxu2 %v2120_v26  ;;  %1329 = vmatpush.bf16.msrb.mxu3 %v2132_v31 }
 0x3b6   :  { %1291 = vmatpush.bf16.msrb.mxu0 %v2150_v40  ;;  %1304 = vmatpush.bf16.msrb.mxu1 %v2154_v41 }
 0x3b7   :  { %1317 = vmatpush.bf16.msrb.mxu2 %v2156_v42  ;;  %1330 = vmatpush.bf16.msrb.mxu3 %v2159_v43 }
 0x3fa   :  { %v967_v3 = vpop.permute.xlu2 %966 }
 0x3fb   :  { %1631 = vst.msk [vmem:[%s2632_s4 + $0xc] sm:$0xf] %vm349_vm14, %v967_v3 }
 0x415   :  { %v987_v7 = vpop.f32.mrf.mxu0  ;;  %v1000_v8 = vpop.f32.mrf.mxu1 }
 0x416   :  { %v1034_v16 = vrot.slane %v1000_v8, 4 }
 0x418   :  { %v1036_v17 = vsel %vm271_vm0, %v987_v7, %v1034_v16 }
 0x419   :  { %v1040_v21 = vadd.f32 %v1632_v12, %v1036_v17 }
 0x41b   :  { %v1634_v25 = vmul.f32 -1.442695, %v1040_v21  ;;  %v1062_v29 = vrot.slane %v1040_v21, 4 }
 0x41c   :  { %v1013_v33 = vpop.f32.mrf.mxu2  ;;  %v1026_v34 = vpop.f32.mrf.mxu3 }
 0x41d   :  { %1770 = vpow2.f32 %v1634_v25  ;;  %v1635_v38 = vmul.f32 -1.442695, %v1062_v29  ;;  %v1035_v45 = vrot.slane %v1026_v34, 4  ;;  %v989_v46 = vpop.f32.mrf.mxu0  ;;  %v1002_v50 = vpop.f32.mrf.mxu1 }
 0x41f   :  { %1772 = vpow2.f32 %v1635_v38  ;;  %v1037_v56 = vsel %vm271_vm0, %v1013_v33, %v1035_v45  ;;  %v1640_v33 = vld [vmem:[%s2628_s0 + $0x60] sm:$0xff] }
 0x420   :  { %v1041_v57 = vadd.f32 %v1633_v44, %v1037_v56 }
 0x422   :  { %v1085_v58 = vrot.slane %v1041_v57, 4 }
 0x423   :  { %v1771_v62 = vpop.eup %1770 }
 0x424   :  { %v1045_v5 = vadd.f32 1.0, %v1771_v62  ;;  %v1636_v9 = vmul.f32 -1.442695, %v1085_v58  ;;  %v1015_v10 = vpop.f32.mrf.mxu2  ;;  %v1028_v15 = vpop.f32.mrf.mxu3  ;;  %v1641_v58 = vld [vmem:[%s2628_s0 + $0x68] sm:$0xff] }
 0x425   :  { %v1773_v23 = vpop.eup %1772 }
 0x426   :  { %1774 = vrcp.f32 %v1045_v5  ;;  %v1067_v24 = vadd.f32 1.0, %v1773_v23  ;;  %v1057_v20 = vand.u32 2147483648, %v1045_v5  ;;  %v1055_v4 = vand.u32 2147483647, %v1045_v5 }
 0x427   :  { %1776 = vpow2.f32 %v1636_v9  ;;  %vm1051_vm12 = vweird.f32 %v1045_v5 }
 0x428   :  { %1778 = vrcp.f32 %v1067_v24  ;;  %v1079_v54 = vand.u32 2147483648, %v1067_v24  ;;  %v1077_v13 = vand.u32 2147483647, %v1067_v24  ;;  %v1058_v18 = vor.u32 1.1754944e-38, %v1057_v20 }
 0x429   :  { %vm1073_vm1 = vweird.f32 %v1067_v24  ;;  %vm1056_vm2 = vcmp.eq.f32.partialorder %v1055_v4, 8.507059e+37 }
 0x42a   :  { %v1080_v52 = vor.u32 1.1754944e-38, %v1079_v54  ;;  %vm1078_vm4 = vcmp.eq.f32.partialorder %v1077_v13, 8.507059e+37 }
 0x42c   :  { %v1775_v26 = vpop.eup %1774 }
 0x42d   :  { %v1777_v31 = vpop.eup %1776  ;;  %v1047_v40 = vmul.f32 %v1775_v26, %v1045_v5  ;;  %vm1052_vm11 = vweird.f32 %v1775_v26 }
 0x42e   :  { %v1779_v41 = vpop.eup %1778  ;;  %v1090_v42 = vadd.f32 1.0, %v1777_v31  ;;  %vm1053_vm15 = vmor %vm1051_vm12, %vm1052_vm11 }
 0x42f   :  { %v1048_v43 = vsub.f32 1.0, %v1047_v40  ;;  %v1069_v47 = vmul.f32 %v1779_v41, %v1067_v24  ;;  %vm1074_vm13 = vweird.f32 %v1779_v41 }
 0x430   :  { %1780 = vrcp.f32 %v1090_v42  ;;  %vm1075_vm3 = vmor %vm1073_vm1, %vm1074_vm13  ;;  %v1102_v59 = vand.u32 2147483648, %v1090_v42  ;;  %vm1096_vm7 = vweird.f32 %v1090_v42  ;;  %v1100_v0 = vand.u32 2147483647, %v1090_v42 }
 0x431   :  { %v1070_v1 = vsub.f32 1.0, %v1069_v47  ;;  %v1049_v63 = vmul.f32 %v1775_v26, %v1048_v43  ;;  %1782 = vtanh.f32 %v1041_v57 }
 0x432   :  { %v1103_v3 = vor.u32 1.1754944e-38, %v1102_v59  ;;  %vm1101_vm9 = vcmp.eq.f32.partialorder %v1100_v0, 8.507059e+37 }
 0x433   :  { %v1071_v6 = vmul.f32 %v1779_v41, %v1070_v1  ;;  %v1050_v11 = vadd.f32 %v1775_v26, %v1049_v63 }
 0x435   :  { %v1054_v19 = vsel %vm1053_vm15, %v1775_v26, %v1050_v11  ;;  %v1072_v14 = vadd.f32 %v1779_v41, %v1071_v6 }
 0x436   :  { %v1781_v27 = vpop.eup %1780  ;;  %v1059_v28 = vsel %vm1056_vm2, %v1058_v18, %v1054_v19 }
 0x437   :  { %v1076_v22 = vsel %vm1075_vm3, %v1779_v41, %v1072_v14  ;;  %v1092_v30 = vmul.f32 %v1781_v27, %v1090_v42  ;;  %v1783_v36 = vpop.eup %1782  ;;  %vm1097_vm6 = vweird.f32 %v1781_v27 }
 0x438   :  { %v1081_v39 = vsel %vm1078_vm4, %v1080_v52, %v1076_v22  ;;  %v1107_v51 = vmul.f32 %v1783_v36, %v1059_v28  ;;  %vm1098_vm8 = vmor %vm1096_vm7, %vm1097_vm6 }
 0x439   :  { %v1093_v49 = vsub.f32 1.0, %v1092_v30  ;;  %v1106_v2 = vmul.f32 %v1081_v39, %v2492_v32 }
 0x43b   :  { %v1108_v48 = vadd.f32 %v1107_v51, %v1106_v2  ;;  %v1094_v53 = vmul.f32 %v1781_v27, %v1093_v49 }
 0x43d   :  { %1784 = vtanh.f32 %v1108_v48  ;;  %v1095_v55 = vadd.f32 %v1781_v27, %v1094_v53  ;;  %v2555_v60 = vsel %vm1124_vm5, %v1108_v48, %v2492_v32  ;;  %v1645_v48 = vld [vmem:[%s2629_s1 + $0x18] sm:$0xf] }
 0x43e   :  { %vm1277_vm4 = vcmp.gt.f32.partialorder %v1645_v48, 0.0 }
 0x43f   :  { %v1099_v37 = vsel %vm1098_vm8, %v1781_v27, %v1095_v55 }
 0x440   :  { %v1104_v8 = vsel %vm1101_vm9, %v1103_v3, %v1099_v37 }
 0x443   :  { %v1785_v7 = vpop.eup %1784 }
 0x444   :  { %v1110_v12 = vmul.f32 %v1785_v7, %v1104_v8 }
 0x446   :  { %v1113_v16 = vmul.f32 %v1637_v35, %v1110_v12  ;;  %v2559_v17 = vsel %vm1124_vm5, %v1110_v12, %v2496_v61 }
 0x447   :  { %v1130_v21 = vpack.c.bf16 %v2559_v17, %v2559_v17 }
 0x448   :  { %1638 = vst.msk [vmem:[%s2631_s3 + $0x14] sm:$0xf] %vm349_vm14, %v1113_v16 }
 0x449   :  { %1139 = vmatmul.bf16.vlgmr.msra.gmra.mxu0 %v1130_v21  ;;  %1117 = vst [vmem:[#allocation1] ss:$2 sm:$0xff] %v1113_v16  ;;  %1152 = vmatmul.bf16.vlgmr.msra.gmra.mxu1 %v1130_v21 }
 0x44a   :  { %1165 = vmatmul.bf16.vlgmr.msra.gmra.mxu2 %v1130_v21  ;;  %1178 = vmatmul.bf16.vlgmr.msra.gmra.mxu3 %v1130_v21 }
 0x450   :  { %v1118_v32 = vld.sshfl [vmem:[#allocation1] sm:$0xff pattern:$0x75316420] }
 0x451   :  { %1119 = vrot.lane.b32.xlu2 %v1118_v32, %s1845_s28 }
 0x4ab   :  { %v1120_v25 = vpop.permute.xlu2 %1119 }
 0x4ac   :  { %1639 = vst.msk [vmem:[%s2632_s4 + $0x8] sm:$0xf] %vm349_vm14, %v1120_v25 }
 0x4c6   :  { %v1140_v61 = vpop.f32.mrf.mxu0  ;;  %v1153_v29 = vpop.f32.mrf.mxu1 }
 0x4c7   :  { %v1187_v34 = vrot.slane %v1153_v29, 4 }
 0x4c9   :  { %v1189_v38 = vsel %vm271_vm0, %v1140_v61, %v1187_v34 }
 0x4ca   :  { %v1193_v44 = vadd.f32 %v1640_v33, %v1189_v38 }
 0x4cc   :  { %v1642_v45 = vmul.f32 -1.442695, %v1193_v44  ;;  %v1215_v46 = vrot.slane %v1193_v44, 4 }
 0x4cd   :  { %v1166_v50 = vpop.f32.mrf.mxu2  ;;  %v1179_v56 = vpop.f32.mrf.mxu3 }
 0x4ce   :  { %1786 = vpow2.f32 %v1642_v45  ;;  %v1643_v57 = vmul.f32 -1.442695, %v1215_v46  ;;  %v1188_v62 = vrot.slane %v1179_v56, 4  ;;  %v1142_v5 = vpop.f32.mrf.mxu0  ;;  %v1155_v9 = vpop.f32.mrf.mxu1 }
 0x4d0   :  { %1788 = vpow2.f32 %v1643_v57  ;;  %v1190_v10 = vsel %vm271_vm0, %v1166_v50, %v1188_v62  ;;  %v1648_v50 = vld [vmem:[%s2628_s0 + $0x70] sm:$0xff] }
 0x4d1   :  { %v1194_v15 = vadd.f32 %v1641_v58, %v1190_v10 }
 0x4d3   :  { %v1238_v23 = vrot.slane %v1194_v15, 4 }
 0x4d4   :  { %v1787_v24 = vpop.eup %1786 }
 0x4d5   :  { %v1198_v26 = vadd.f32 1.0, %v1787_v24  ;;  %v1644_v31 = vmul.f32 -1.442695, %v1238_v23  ;;  %v1168_v40 = vpop.f32.mrf.mxu2  ;;  %v1181_v41 = vpop.f32.mrf.mxu3  ;;  %v1649_v23 = vld [vmem:[%s2628_s0 + $0x78] sm:$0xff] }
 0x4d6   :  { %v1789_v42 = vpop.eup %1788 }
 0x4d7   :  { %1790 = vrcp.f32 %v1198_v26  ;;  %v1220_v43 = vadd.f32 1.0, %v1789_v42  ;;  %v1210_v11 = vand.u32 2147483648, %v1198_v26  ;;  %v1208_v19 = vand.u32 2147483647, %v1198_v26 }
 0x4d8   :  { %1792 = vpow2.f32 %v1644_v31  ;;  %vm1204_vm11 = vweird.f32 %v1198_v26 }
 0x4d9   :  { %1794 = vrcp.f32 %v1220_v43  ;;  %v1232_v14 = vand.u32 2147483648, %v1220_v43  ;;  %v1230_v28 = vand.u32 2147483647, %v1220_v43  ;;  %v1211_v22 = vor.u32 1.1754944e-38, %v1210_v11 }
 0x4da   :  { %vm1226_vm15 = vweird.f32 %v1220_v43  ;;  %vm1209_vm1 = vcmp.eq.f32.partialorder %v1208_v19, 8.507059e+37 }
 0x4db   :  { %v1233_v39 = vor.u32 1.1754944e-38, %v1232_v14  ;;  %vm1231_vm3 = vcmp.eq.f32.partialorder %v1230_v28, 8.507059e+37 }
 0x4dd   :  { %v1791_v47 = vpop.eup %1790 }
 0x4de   :  { %v1793_v20 = vpop.eup %1792  ;;  %v1200_v1 = vmul.f32 %v1791_v47, %v1198_v26  ;;  %vm1205_vm10 = vweird.f32 %v1791_v47 }
 0x4df   :  { %v1795_v63 = vpop.eup %1794  ;;  %v1243_v4 = vadd.f32 1.0, %v1793_v20  ;;  %vm1206_vm13 = vmor %vm1204_vm11, %vm1205_vm10 }
 0x4e0   :  { %v1201_v54 = vsub.f32 1.0, %v1200_v1  ;;  %v1222_v6 = vmul.f32 %v1795_v63, %v1220_v43  ;;  %vm1227_vm12 = vweird.f32 %v1795_v63 }
 0x4e1   :  { %1796 = vrcp.f32 %v1243_v4  ;;  %vm1228_vm2 = vmor %vm1226_vm15, %vm1227_vm12  ;;  %v1255_v12 = vand.u32 2147483648, %v1243_v4  ;;  %vm1249_vm6 = vweird.f32 %v1243_v4  ;;  %v1253_v21 = vand.u32 2147483647, %v1243_v4 }
 0x4e2   :  { %v1223_v13 = vsub.f32 1.0, %v1222_v6  ;;  %v1202_v18 = vmul.f32 %v1791_v47, %v1201_v54  ;;  %1798 = vtanh.f32 %v1194_v15 }
 0x4e3   :  { %v1256_v25 = vor.u32 1.1754944e-38, %v1255_v12  ;;  %vm1254_vm8 = vcmp.eq.f32.partialorder %v1253_v21, 8.507059e+37 }
 0x4e4   :  { %v1224_v27 = vmul.f32 %v1795_v63, %v1223_v13  ;;  %v1203_v52 = vadd.f32 %v1791_v47, %v1202_v18 }
 0x4e6   :  { %v1207_v30 = vsel %vm1206_vm13, %v1791_v47, %v1203_v52  ;;  %v1225_v35 = vadd.f32 %v1795_v63, %v1224_v27 }
 0x4e7   :  { %v1797_v36 = vpop.eup %1796  ;;  %v1212_v49 = vsel %vm1209_vm1, %v1211_v22, %v1207_v30 }
 0x4e8   :  { %v1229_v2 = vsel %vm1228_vm2, %v1795_v63, %v1225_v35  ;;  %v1245_v51 = vmul.f32 %v1797_v36, %v1243_v4  ;;  %v1799_v53 = vpop.eup %1798  ;;  %vm1250_vm5 = vweird.f32 %v1797_v36 }
 0x4e9   :  { %v1234_v55 = vsel %vm1231_vm3, %v1233_v39, %v1229_v2  ;;  %v1260_v37 = vmul.f32 %v1799_v53, %v1212_v49  ;;  %vm1251_vm7 = vmor %vm1249_vm6, %vm1250_vm5 }
 0x4ea   :  { %v1246_v59 = vsub.f32 1.0, %v1245_v51  ;;  %v1259_v0 = vmul.f32 %v1234_v55, %v2555_v60 }
 0x4ec   :  { %v1261_v3 = vadd.f32 %v1260_v37, %v1259_v0  ;;  %v1247_v7 = vmul.f32 %v1797_v36, %v1246_v59 }
 0x4ee   :  { %1800 = vtanh.f32 %v1261_v3  ;;  %v1248_v8 = vadd.f32 %v1797_v36, %v1247_v7  ;;  %v2586_v16 = vsel %vm1277_vm4, %v1261_v3, %v2555_v60 }
 0x4f0   :  { %v1252_v32 = vsel %vm1251_vm7, %v1797_v36, %v1248_v8 }
 0x4f1   :  { %v1257_v29 = vsel %vm1254_vm8, %v1256_v25, %v1252_v32 }
 0x4f4   :  { %v1801_v61 = vpop.eup %1800 }
 0x4f5   :  { %v1263_v33 = vmul.f32 %v1801_v61, %v1257_v29 }
 0x4f7   :  { %v1266_v34 = vmul.f32 %v1645_v48, %v1263_v33  ;;  %v2590_v38 = vsel %vm1277_vm4, %v1263_v33, %v2559_v17 }
 0x4f8   :  { %v1283_v44 = vpack.c.bf16 %v2590_v38, %v2590_v38 }
 0x4f9   :  { %1646 = vst.msk [vmem:[%s2631_s3 + $0x18] sm:$0xf] %vm349_vm14, %v1266_v34 }
 0x4fa   :  { %1292 = vmatmul.bf16.vlgmr.msrb.gmra.mxu0 %v1283_v44  ;;  %1270 = vst [vmem:[#allocation1] ss:$2 sm:$0xff] %v1266_v34  ;;  %1305 = vmatmul.bf16.vlgmr.msrb.gmra.mxu1 %v1283_v44 }
 0x4fb   :  { %1318 = vmatmul.bf16.vlgmr.msrb.gmra.mxu2 %v1283_v44  ;;  %1331 = vmatmul.bf16.vlgmr.msrb.gmra.mxu3 %v1283_v44  ;;  %v1653_v44 = vld [vmem:[%s2629_s1 + $0x1c] sm:$0xf] }
 0x4fc   :  { %vm1429_vm6 = vcmp.gt.f32.partialorder %v1653_v44, 0.0 }
 0x501   :  { %v1271_v60 = vld.sshfl [vmem:[#allocation1] sm:$0xff pattern:$0x75316420] }
 0x502   :  { %1272 = vrot.lane.b32.xlu0 %v1271_v60, %s1845_s28 }
 0x574   :  { %v1273_v45 = vpop.permute.xlu0 %1272 }
 0x575   :  { %1647 = vst.msk [vmem:[%s2632_s4 + $0x4] sm:$0xf] %vm349_vm14, %v1273_v45 }
 0x577   :  { %v1293_v17 = vpop.f32.mrf.mxu0  ;;  %v1306_v46 = vpop.f32.mrf.mxu1 }
 0x578   :  { %v1340_v56 = vrot.slane %v1306_v46, 4 }
 0x57a   :  { %v1342_v57 = vsel %vm271_vm0, %v1293_v17, %v1340_v56 }
 0x57b   :  { %v1346_v58 = vadd.f32 %v1648_v50, %v1342_v57 }
 0x57d   :  { %v1650_v62 = vmul.f32 -1.442695, %v1346_v58  ;;  %v1368_v5 = vrot.slane %v1346_v58, 4 }
 0x57e   :  { %v1319_v9 = vpop.f32.mrf.mxu2  ;;  %v1332_v10 = vpop.f32.mrf.mxu3 }
 0x57f   :  { %1802 = vpow2.f32 %v1650_v62  ;;  %v1651_v15 = vmul.f32 -1.442695, %v1368_v5  ;;  %v1341_v24 = vrot.slane %v1332_v10, 4  ;;  %v1295_v26 = vpop.f32.mrf.mxu0  ;;  %v1308_v31 = vpop.f32.mrf.mxu1 }
 0x581   :  { %1804 = vpow2.f32 %v1651_v15  ;;  %v1343_v40 = vsel %vm271_vm0, %v1319_v9, %v1341_v24 }
 0x582   :  { %v1347_v41 = vadd.f32 %v1649_v23, %v1343_v40 }
 0x584   :  { %v1391_v42 = vrot.slane %v1347_v41, 4 }
 0x585   :  { %v1803_v43 = vpop.eup %1802 }
 0x586   :  { %v1351_v47 = vadd.f32 1.0, %v1803_v43  ;;  %v1652_v20 = vmul.f32 -1.442695, %v1391_v42  ;;  %v1321_v1 = vpop.f32.mrf.mxu2  ;;  %v1334_v63 = vpop.f32.mrf.mxu3 }
 0x587   :  { %v1805_v4 = vpop.eup %1804 }
 0x588   :  { %1806 = vrcp.f32 %v1351_v47  ;;  %v1373_v54 = vadd.f32 1.0, %v1805_v4  ;;  %v1363_v52 = vand.u32 2147483648, %v1351_v47  ;;  %v1361_v30 = vand.u32 2147483647, %v1351_v47 }
 0x589   :  { %1808 = vpow2.f32 %v1652_v20  ;;  %vm1357_vm9 = vweird.f32 %v1351_v47 }
 0x58a   :  { %1810 = vrcp.f32 %v1373_v54  ;;  %v1385_v35 = vand.u32 2147483648, %v1373_v54  ;;  %v1383_v49 = vand.u32 2147483647, %v1373_v54  ;;  %v1364_v2 = vor.u32 1.1754944e-38, %v1363_v52 }
 0x58b   :  { %vm1379_vm12 = vweird.f32 %v1373_v54  ;;  %vm1362_vm13 = vcmp.eq.f32.partialorder %v1361_v30, 8.507059e+37 }
 0x58c   :  { %v1386_v55 = vor.u32 1.1754944e-38, %v1385_v35  ;;  %vm1384_vm1 = vcmp.eq.f32.partialorder %v1383_v49, 8.507059e+37 }
 0x58e   :  { %v1807_v6 = vpop.eup %1806 }
 0x58f   :  { %v1809_v11 = vpop.eup %1808  ;;  %v1353_v13 = vmul.f32 %v1807_v6, %v1351_v47  ;;  %vm1358_vm0 = vweird.f32 %v1807_v6 }
 0x590   :  { %v1811_v18 = vpop.eup %1810  ;;  %v1396_v19 = vadd.f32 1.0, %v1809_v11  ;;  %vm1359_vm11 = vmor %vm1357_vm9, %vm1358_vm0 }
 0x591   :  { %v1354_v14 = vsub.f32 1.0, %v1353_v13  ;;  %v1375_v27 = vmul.f32 %v1811_v18, %v1373_v54  ;;  %vm1380_vm10 = vweird.f32 %v1811_v18 }
 0x592   :  { %1812 = vrcp.f32 %v1396_v19  ;;  %vm1381_vm15 = vmor %vm1379_vm12, %vm1380_vm10  ;;  %v1408_v29 = vand.u32 2147483648, %v1396_v19  ;;  %vm1402_vm3 = vweird.f32 %v1396_v19  ;;  %v1406_v33 = vand.u32 2147483647, %v1396_v19 }
 0x593   :  { %v1376_v28 = vsub.f32 1.0, %v1375_v27  ;;  %v1355_v22 = vmul.f32 %v1807_v6, %v1354_v14  ;;  %1814 = vtanh.f32 %v1347_v41 }
 0x594   :  { %v1409_v60 = vor.u32 1.1754944e-38, %v1408_v29  ;;  %vm1407_vm5 = vcmp.eq.f32.partialorder %v1406_v33, 8.507059e+37 }
 0x595   :  { %v1377_v36 = vmul.f32 %v1811_v18, %v1376_v28  ;;  %v1356_v39 = vadd.f32 %v1807_v6, %v1355_v22 }
 0x597   :  { %v1360_v51 = vsel %vm1359_vm11, %v1807_v6, %v1356_v39  ;;  %v1378_v48 = vadd.f32 %v1811_v18, %v1377_v36 }
 0x598   :  { %v1813_v53 = vpop.eup %1812  ;;  %v1365_v59 = vsel %vm1362_vm13, %v1364_v2, %v1360_v51 }
 0x599   :  { %v1382_v0 = vsel %vm1381_vm15, %v1811_v18, %v1378_v48  ;;  %v1398_v37 = vmul.f32 %v1813_v53, %v1396_v19  ;;  %v1815_v3 = vpop.eup %1814  ;;  %vm1403_vm2 = vweird.f32 %v1813_v53 }
 0x59a   :  { %v1387_v7 = vsel %vm1384_vm1, %v1386_v55, %v1382_v0  ;;  %v1413_v21 = vmul.f32 %v1815_v3, %v1365_v59  ;;  %vm1404_vm4 = vmor %vm1402_vm3, %vm1403_vm2 }
 0x59b   :  { %v1399_v8 = vsub.f32 1.0, %v1398_v37  ;;  %v1412_v12 = vmul.f32 %v1387_v7, %v2586_v16 }
 0x59d   :  { %v1400_v32 = vmul.f32 %v1813_v53, %v1399_v8  ;;  %v1414_v25 = vadd.f32 %v1413_v21, %v1412_v12 }
 0x59f   :  { %v1401_v61 = vadd.f32 %v1813_v53, %v1400_v32  ;;  %1816 = vtanh.f32 %v1414_v25 }
 0x5a1   :  { %v1405_v34 = vsel %vm1404_vm4, %v1813_v53, %v1401_v61 }
 0x5a2   :  { %v1410_v17 = vsel %vm1407_vm5, %v1409_v60, %v1405_v34 }
 0x5a5   :  { %v1817_v45 = vpop.eup %1816 }
 0x5a6   :  { %v1416_v16 = vmul.f32 %v1817_v45, %v1410_v17 }
 0x5a8   :  { %v1419_v46 = vmul.f32 %v1653_v44, %v1416_v16  ;;  %v1430_v50 = vsel %vm1429_vm6, %v1416_v16, %v2590_v38 }
 0x5a9   :  { %1431 = vst [vmem:[#allocation2] sm:$0xf] %v1430_v50 }
 0x5aa   :  { %1654 = vst.msk [vmem:[%s2631_s3 + $0x1c] sm:$0xf] %vm349_vm14, %v1419_v46  ;;  %1446 = dma.vmem_to_hbm [thread:$0]  %s1442_s21, 64, %s1444_s24, [#allocation3]  }
 0x5ab   :  { %1423 = vst [vmem:[#allocation1] ss:$2 sm:$0xff] %v1419_v46 }
 0x5b2   :  { %v1424_v56 = vld.sshfl [vmem:[#allocation1] sm:$0xff pattern:$0x75316420] }
 0x5b3   :  { %1425 = vrot.lane.b32.xlu1 %v1424_v56, %s1845_s28 }
 0x625   :  { %v1426_v57 = vpop.permute.xlu1 %1425 }
 0x626   :  { %1428 = vst.msk [vmem:[%s2632_s4] sm:$0xf] %vm349_vm14, %v1426_v57 }
 0x627   :  { %1842 = dma.done.wait [#allocation3], 64  }
 0x628   :  { %1843 = vsyncadd [#allocation3], 4294967232 }
 0x629   :  { %1455 = vsyncpa [#allocation3], 1 }

</bundles_post_ra>
